<compile_context>
chip_gen: v7x
topology: tpu7x:2x2x1
jax: 0.10.0
libtpu: 0.0.40
codegen_flags: <defaults>
</compile_context>

<pallas_src>
import functools

import jax
import jax.numpy as jnp
from jax.experimental import pallas as pl
from jax.experimental.pallas import tpu as pltpu

NEG_SLOPE = 0.2


def _leaky(v):
    # LeakyReLU(0.2): max(v, 0.2*v) == where(v >= 0, v, 0.2*v) for slope in (0,1).
    return jnp.maximum(v, NEG_SLOPE * v)


def goad_kernel(x_ref, w0t_ref, w1t_ref, w2t_ref, w3t_ref, w4t_ref,
                wh_ref, bh_ref, rep_ref, pred_ref, *, tb, L):
    """One grid step = `tb` samples.

    x_ref:     (tb, n_input, L)     NCL input block
    w0t_ref:   (n_input, n_hidden)  first conv weight, transposed (in, out)
    w1t..w4t:  (n_hidden, n_hidden) trunk conv weights, transposed (in, out)
    wh_ref:    (n_output, n_hidden) head conv weight, PyTorch (out, in) as-is
    bh_ref:    (n_output, 1)        head bias column
    rep_ref:   (tb, n_hidden, L)    NCL output block
    pred_ref:  (tb, n_output, L)    NCL output block
    """
    # ---- Trunk: batch-flattened, channels-last -----------------------------
    # Build (tb*L, n_input) rows with per-sample 2-D minor transposes (cheap
    # XLU work on the small input) + a sublane-aligned concat.  After that,
    # every trunk layer is a single matmul per grid step with M = tb*L.
    parts = [x_ref[b].T for b in range(tb)]                  # each (L, n_input)
    x_rows = parts[0] if tb == 1 else jnp.concatenate(parts, axis=0)

    h = jnp.dot(x_rows, w0t_ref[...], preferred_element_type=jnp.float32)
    for wt_ref in (w1t_ref, w2t_ref, w3t_ref, w4t_ref):
        h = jnp.dot(_leaky(h), wt_ref[...], preferred_element_type=jnp.float32)
    # h == rep in channels-last rows: (tb*L, n_hidden)

    # Channel-major view of rep for the NCL stores / head rhs.
    rep_cm_all = h.T                                         # (n_hidden, tb*L)

    # ---- Head + stores (lane-dense in L) ------------------------------------
    wh = wh_ref[...]                                         # hoisted, once/step
    bh = bh_ref[...]
    for b in range(tb):
        rep_cm = rep_cm_all[:, b * L:(b + 1) * L]            # (n_hidden, L)
        rep_ref[b] = rep_cm.astype(rep_ref.dtype)
        # Channel-major head matmul: result (n_output, L) is already in the
        # NCL store layout -> no relayout of the dominant pred bytes.
        pred = jnp.dot(wh, _leaky(rep_cm),
                       preferred_element_type=jnp.float32) + bh
        pred_ref[b] = pred.astype(pred_ref.dtype)


def _default_batch_tile(B, n_input, n_hidden, n_output, L):
    """Largest batch tile that (a) keeps >= 2 grid steps (v7x megacore uses both
    TensorCores on the "parallel" axis) and (b) stays well under the smallest
    default scoped-VMEM budget (v5e: 16 MiB; v6e/v7x: 32 MiB)."""
    bytes_per_sample = 4 * L * (2 * (n_input + n_hidden + n_output)   # dbl-buffered blocks
                                + 2 * n_output)                        # in-kernel temporaries
    budget = 10 * 1024 * 1024
    cap = max(1, budget // bytes_per_sample)
    return int(max(1, min(cap, pl.cdiv(B, 2))))


def goad_forward(x, params, *, batch_tile=None):
    """x: (B, n_input, L) float32 (PyTorch NCL).  Returns (rep, pred) in NCL."""
    w0, w1, w2, w3, w4, wh, bh = params
    B, n_input, L = x.shape
    n_hidden = w0.shape[0]
    n_output = wh.shape[0]

    if batch_tile is None:
        batch_tile = _default_batch_tile(B, n_input, n_hidden, n_output, L)
    tb = int(max(1, min(batch_tile, B)))
    pad = (-B) % tb
    if pad:
        x = jnp.pad(x, ((0, pad), (0, 0), (0, 0)))
    bp = B + pad
    grid = (bp // tb,)

    # Trunk weights pre-transposed in the wrapper (tiny arrays) so the kernel's
    # channels-last matmuls use them directly; head weight/bias kept as-is.
    w0t, w1t, w2t, w3t, w4t = (w.T for w in (w0, w1, w2, w3, w4))
    bh2d = bh.reshape(n_output, 1)

    def resident(shape):
        # Constant block index -> stays VMEM resident, no re-DMA across steps.
        return pl.BlockSpec(shape, lambda b: (0, 0))

    flops = 2 * bp * L * (n_input * n_hidden
                          + 4 * n_hidden * n_hidden
                          + n_hidden * n_output)
    bytes_accessed = 4 * (bp * L * (n_input + n_hidden + n_output)
                          + n_input * n_hidden
                          + 4 * n_hidden * n_hidden
                          + n_output * n_hidden + n_output)

    rep, pred = pl.pallas_call(
        functools.partial(goad_kernel, tb=tb, L=L),
        out_shape=(
            jax.ShapeDtypeStruct((bp, n_hidden, L), jnp.float32),
            jax.ShapeDtypeStruct((bp, n_output, L), jnp.float32),
        ),
        grid=grid,
        in_specs=[
            pl.BlockSpec((tb, n_input, L), lambda b: (b, 0, 0)),
            resident((n_input, n_hidden)),
            resident((n_hidden, n_hidden)),
            resident((n_hidden, n_hidden)),
            resident((n_hidden, n_hidden)),
            resident((n_hidden, n_hidden)),
            resident((n_output, n_hidden)),
            resident((n_output, 1)),
        ],
        out_specs=(
            pl.BlockSpec((tb, n_hidden, L), lambda b: (b, 0, 0)),
            pl.BlockSpec((tb, n_output, L), lambda b: (b, 0, 0)),
        ),
        compiler_params=pltpu.CompilerParams(
            dimension_semantics=("parallel",)),
        cost_estimate=pl.CostEstimate(flops=flops, transcendentals=0,
                                      bytes_accessed=bytes_accessed),
    )(x, w0t, w1t, w2t, w3t, w4t, wh, bh2d)

    if pad:
        rep = rep[:B]
        pred = pred[:B]
    return rep, pred


def goad_reference(x, params):
    """Plain-JAX reference of the same forward (for validation), NCL in/out."""
    w0, w1, w2, w3, w4, wh, bh = params
    h = jnp.einsum("oc,bcl->bol", w0, x)
    for w in (w1, w2, w3, w4):
        h = jnp.einsum("oc,bcl->bol", w, _leaky(h))
    rep = h
    pred = jnp.einsum("oc,bcl->bol", wh, _leaky(rep)) + bh[None, :, None]
    return rep, pred


def init_params(key, n_input, n_hidden, n_output, n_layers=5):
    """Deterministic init, PyTorch-Conv1d-style U(-1/sqrt(fan_in), +)."""
    keys = jax.random.split(key, n_layers + 2)

    def conv_w(k, out_c, in_c):
        bound = 1.0 / jnp.sqrt(jnp.float32(in_c))
        return jax.random.uniform(k, (out_c, in_c), jnp.float32, -bound, bound)

    w0 = conv_w(keys[0], n_hidden, n_input)
    ws = [conv_w(keys[i], n_hidden, n_hidden) for i in range(1, n_layers)]
    wh = conv_w(keys[n_layers], n_output, n_hidden)
    bh = jax.random.uniform(keys[n_layers + 1], (n_output,), jnp.float32,
                            -1.0 / jnp.sqrt(jnp.float32(n_hidden)),
                            1.0 / jnp.sqrt(jnp.float32(n_hidden)))
    return (w0, *ws, wh, bh)


if __name__ == "__main__":
    # GOAD feeds (batch, n_features, n_transforms) into the k=1 Conv1d net;
    # L=256 matches the usual number of random transforms (lane-dense).
    B, n_input, L = 4, 32, 256
    n_hidden, n_output = 8, 256

    key = jax.random.PRNGKey(0)
    k_x, k_p = jax.random.split(key)
    x = jax.random.normal(k_x, (B, n_input, L), jnp.float32)
    params = init_params(k_p, n_input, n_hidden, n_output, n_layers=5)

    fwd = jax.jit(goad_forward)
    rep, pred = fwd(x, params)
    jax.block_until_ready((rep, pred))

    rep_ref, pred_ref = goad_reference(x, params)
    assert rep.shape == (B, n_hidden, L) and pred.shape == (B, n_output, L)
    assert jnp.allclose(rep, rep_ref, atol=1e-5, rtol=1e-5)
    assert jnp.allclose(pred, pred_ref, atol=1e-5, rtol=1e-5)

    print("KERNEL_OK")
</pallas_src>

<mosaic_0001>
module attributes {stable_mosaic.version = 11 : i64} {
  func.func @goad_kernel(%arg0: i32, %arg1: memref<2x32x256xf32, #tpu.memory_space<vmem>>, %arg2: memref<32x8xf32, #tpu.memory_space<vmem>>, %arg3: memref<8x8xf32, #tpu.memory_space<vmem>>, %arg4: memref<8x8xf32, #tpu.memory_space<vmem>>, %arg5: memref<8x8xf32, #tpu.memory_space<vmem>>, %arg6: memref<8x8xf32, #tpu.memory_space<vmem>>, %arg7: memref<256x8xf32, #tpu.memory_space<vmem>>, %arg8: memref<256x1xf32, #tpu.memory_space<vmem>>, %arg9: memref<2x8x256xf32, #tpu.memory_space<vmem>>, %arg10: memref<2x256x256xf32, #tpu.memory_space<vmem>>) attributes {dimension_semantics = [#tpu.dimension_semantics<parallel>], iteration_bounds = array<i64: 2>, scalar_prefetch = 0 : i64, scratch_operands = 0 : i64, tpu.core_type = #tpu.core_type<tc>, window_params = [{transform_indices = @transform_0, window_bounds = array<i64: 2, 32, 256>}, {pipeline_mode = #tpu.pipeline_mode<synchronous>, transform_indices = @transform_1, window_bounds = array<i64: 32, 8>}, {pipeline_mode = #tpu.pipeline_mode<synchronous>, transform_indices = @transform_2, window_bounds = array<i64: 8, 8>}, {pipeline_mode = #tpu.pipeline_mode<synchronous>, transform_indices = @transform_3, window_bounds = array<i64: 8, 8>}, {pipeline_mode = #tpu.pipeline_mode<synchronous>, transform_indices = @transform_4, window_bounds = array<i64: 8, 8>}, {pipeline_mode = #tpu.pipeline_mode<synchronous>, transform_indices = @transform_5, window_bounds = array<i64: 8, 8>}, {pipeline_mode = #tpu.pipeline_mode<synchronous>, transform_indices = @transform_6, window_bounds = array<i64: 256, 8>}, {pipeline_mode = #tpu.pipeline_mode<synchronous>, transform_indices = @transform_7, window_bounds = array<i64: 256, 1>}, {transform_indices = @transform_8, window_bounds = array<i64: 2, 8, 256>}, {transform_indices = @transform_9, window_bounds = array<i64: 2, 256, 256>}]} {
    %c0 = arith.constant 0 : index
    %c0_0 = arith.constant 0 : index
    %c0_1 = arith.constant 0 : index
    %0 = vector.load %arg1[%c0, %c0_0, %c0_1] : memref<2x32x256xf32, #tpu.memory_space<vmem>>, vector<1x32x256xf32>
    %1 = vector.shape_cast %0 : vector<1x32x256xf32> to vector<32x256xf32>
    %2 = tpu.transpose %1, [1, 0] : vector<32x256xf32> -> vector<256x32xf32>
    %c1 = arith.constant 1 : index
    %c0_2 = arith.constant 0 : index
    %c0_3 = arith.constant 0 : index
    %3 = vector.load %arg1[%c1, %c0_2, %c0_3] : memref<2x32x256xf32, #tpu.memory_space<vmem>>, vector<1x32x256xf32>
    %4 = vector.shape_cast %3 : vector<1x32x256xf32> to vector<32x256xf32>
    %5 = tpu.transpose %4, [1, 0] : vector<32x256xf32> -> vector<256x32xf32>
    %6 = tpu.concatenate %2, %5 in 0 : vector<256x32xf32>, vector<256x32xf32> -> vector<512x32xf32>
    %c0_4 = arith.constant 0 : index
    %c0_5 = arith.constant 0 : index
    %7 = vector.load %arg2[%c0_4, %c0_5] : memref<32x8xf32, #tpu.memory_space<vmem>>, vector<32x8xf32>
    %cst = arith.constant dense<0.000000e+00> : vector<512x8xf32>
    %8 = tpu.matmul %6, %7, %cst {dimension_numbers = #tpu.dot_dimension_numbers<[1], [0], [0], [1], [0, 0, 1, 1], [], []>} : vector<512x32xf32>, vector<32x8xf32>, vector<512x8xf32> -> vector<512x8xf32>
    %cst_6 = arith.constant 2.000000e-01 : f32
    %9 = vector.broadcast %cst_6 : f32 to vector<512x8xf32>
    %10 = arith.mulf %9, %8 : vector<512x8xf32>
    %11 = arith.maximumf %8, %10 : vector<512x8xf32>
    %c0_7 = arith.constant 0 : index
    %c0_8 = arith.constant 0 : index
    %12 = vector.load %arg3[%c0_7, %c0_8] : memref<8x8xf32, #tpu.memory_space<vmem>>, vector<8x8xf32>
    %cst_9 = arith.constant dense<0.000000e+00> : vector<512x8xf32>
    %13 = tpu.matmul %11, %12, %cst_9 {dimension_numbers = #tpu.dot_dimension_numbers<[1], [0], [0], [1], [0, 0, 1, 1], [], []>} : vector<512x8xf32>, vector<8x8xf32>, vector<512x8xf32> -> vector<512x8xf32>
    %cst_10 = arith.constant 2.000000e-01 : f32
    %14 = vector.broadcast %cst_10 : f32 to vector<512x8xf32>
    %15 = arith.mulf %14, %13 : vector<512x8xf32>
    %16 = arith.maximumf %13, %15 : vector<512x8xf32>
    %c0_11 = arith.constant 0 : index
    %c0_12 = arith.constant 0 : index
    %17 = vector.load %arg4[%c0_11, %c0_12] : memref<8x8xf32, #tpu.memory_space<vmem>>, vector<8x8xf32>
    %cst_13 = arith.constant dense<0.000000e+00> : vector<512x8xf32>
    %18 = tpu.matmul %16, %17, %cst_13 {dimension_numbers = #tpu.dot_dimension_numbers<[1], [0], [0], [1], [0, 0, 1, 1], [], []>} : vector<512x8xf32>, vector<8x8xf32>, vector<512x8xf32> -> vector<512x8xf32>
    %cst_14 = arith.constant 2.000000e-01 : f32
    %19 = vector.broadcast %cst_14 : f32 to vector<512x8xf32>
    %20 = arith.mulf %19, %18 : vector<512x8xf32>
    %21 = arith.maximumf %18, %20 : vector<512x8xf32>
    %c0_15 = arith.constant 0 : index
    %c0_16 = arith.constant 0 : index
    %22 = vector.load %arg5[%c0_15, %c0_16] : memref<8x8xf32, #tpu.memory_space<vmem>>, vector<8x8xf32>
    %cst_17 = arith.constant dense<0.000000e+00> : vector<512x8xf32>
    %23 = tpu.matmul %21, %22, %cst_17 {dimension_numbers = #tpu.dot_dimension_numbers<[1], [0], [0], [1], [0, 0, 1, 1], [], []>} : vector<512x8xf32>, vector<8x8xf32>, vector<512x8xf32> -> vector<512x8xf32>
    %cst_18 = arith.constant 2.000000e-01 : f32
    %24 = vector.broadcast %cst_18 : f32 to vector<512x8xf32>
    %25 = arith.mulf %24, %23 : vector<512x8xf32>
    %26 = arith.maximumf %23, %25 : vector<512x8xf32>
    %c0_19 = arith.constant 0 : index
    %c0_20 = arith.constant 0 : index
    %27 = vector.load %arg6[%c0_19, %c0_20] : memref<8x8xf32, #tpu.memory_space<vmem>>, vector<8x8xf32>
    %cst_21 = arith.constant dense<0.000000e+00> : vector<512x8xf32>
    %28 = tpu.matmul %26, %27, %cst_21 {dimension_numbers = #tpu.dot_dimension_numbers<[1], [0], [0], [1], [0, 0, 1, 1], [], []>} : vector<512x8xf32>, vector<8x8xf32>, vector<512x8xf32> -> vector<512x8xf32>
    %29 = tpu.transpose %28, [1, 0] : vector<512x8xf32> -> vector<8x512xf32>
    %c0_22 = arith.constant 0 : index
    %c0_23 = arith.constant 0 : index
    %30 = vector.load %arg7[%c0_22, %c0_23] : memref<256x8xf32, #tpu.memory_space<vmem>>, vector<256x8xf32>
    %c0_24 = arith.constant 0 : index
    %c0_25 = arith.constant 0 : index
    %31 = vector.load %arg8[%c0_24, %c0_25] : memref<256x1xf32, #tpu.memory_space<vmem>>, vector<256x1xf32>
    %32 = vector.extract_strided_slice %29 {offsets = [0, 0], sizes = [8, 256], strides = [1, 1]} : vector<8x512xf32> to vector<8x256xf32>
    %c0_26 = arith.constant 0 : index
    %c0_27 = arith.constant 0 : index
    %c0_28 = arith.constant 0 : index
    %33 = vector.load %arg9[%c0_26, %c0_27, %c0_28] : memref<2x8x256xf32, #tpu.memory_space<vmem>>, vector<1x8x256xf32>
    %34 = vector.shape_cast %33 : vector<1x8x256xf32> to vector<8x256xf32>
    %35 = vector.shape_cast %32 : vector<8x256xf32> to vector<1x8x256xf32>
    tpu.vector_store %arg9[%c0_26, %c0_27, %c0_28], %35 {strides = array<i32>} : memref<2x8x256xf32, #tpu.memory_space<vmem>>, vector<1x8x256xf32>,
    %cst_29 = arith.constant 2.000000e-01 : f32
    %36 = vector.broadcast %cst_29 : f32 to vector<8x256xf32>
    %37 = arith.mulf %36, %32 : vector<8x256xf32>
    %38 = arith.maximumf %32, %37 : vector<8x256xf32>
    %cst_30 = arith.constant dense<0.000000e+00> : vector<256x256xf32>
    %39 = tpu.matmul %30, %38, %cst_30 {dimension_numbers = #tpu.dot_dimension_numbers<[1], [0], [0], [1], [0, 0, 1, 1], [], []>} : vector<256x8xf32>, vector<8x256xf32>, vector<256x256xf32> -> vector<256x256xf32>
    %40 = vector.broadcast %31 : vector<256x1xf32> to vector<256x256xf32>
    %41 = arith.addf %39, %40 : vector<256x256xf32>
    %c0_31 = arith.constant 0 : index
    %c0_32 = arith.constant 0 : index
    %c0_33 = arith.constant 0 : index
    %42 = vector.load %arg10[%c0_31, %c0_32, %c0_33] : memref<2x256x256xf32, #tpu.memory_space<vmem>>, vector<1x256x256xf32>
    %43 = vector.shape_cast %42 : vector<1x256x256xf32> to vector<256x256xf32>
    %44 = vector.shape_cast %41 : vector<256x256xf32> to vector<1x256x256xf32>
    tpu.vector_store %arg10[%c0_31, %c0_32, %c0_33], %44 {strides = array<i32>} : memref<2x256x256xf32, #tpu.memory_space<vmem>>, vector<1x256x256xf32>,
    %45 = vector.extract_strided_slice %29 {offsets = [0, 256], sizes = [8, 256], strides = [1, 1]} : vector<8x512xf32> to vector<8x256xf32>
    %c1_34 = arith.constant 1 : index
    %c0_35 = arith.constant 0 : index
    %c0_36 = arith.constant 0 : index
    %46 = vector.load %arg9[%c1_34, %c0_35, %c0_36] : memref<2x8x256xf32, #tpu.memory_space<vmem>>, vector<1x8x256xf32>
    %47 = vector.shape_cast %46 : vector<1x8x256xf32> to vector<8x256xf32>
    %48 = vector.shape_cast %45 : vector<8x256xf32> to vector<1x8x256xf32>
    tpu.vector_store %arg9[%c1_34, %c0_35, %c0_36], %48 {strides = array<i32>} : memref<2x8x256xf32, #tpu.memory_space<vmem>>, vector<1x8x256xf32>,
    %cst_37 = arith.constant 2.000000e-01 : f32
    %49 = vector.broadcast %cst_37 : f32 to vector<8x256xf32>
    %50 = arith.mulf %49, %45 : vector<8x256xf32>
    %51 = arith.maximumf %45, %50 : vector<8x256xf32>
    %cst_38 = arith.constant dense<0.000000e+00> : vector<256x256xf32>
    %52 = tpu.matmul %30, %51, %cst_38 {dimension_numbers = #tpu.dot_dimension_numbers<[1], [0], [0], [1], [0, 0, 1, 1], [], []>} : vector<256x8xf32>, vector<8x256xf32>, vector<256x256xf32> -> vector<256x256xf32>
    %53 = vector.broadcast %31 : vector<256x1xf32> to vector<256x256xf32>
    %54 = arith.addf %52, %53 : vector<256x256xf32>
    %c1_39 = arith.constant 1 : index
    %c0_40 = arith.constant 0 : index
    %c0_41 = arith.constant 0 : index
    %55 = vector.load %arg10[%c1_39, %c0_40, %c0_41] : memref<2x256x256xf32, #tpu.memory_space<vmem>>, vector<1x256x256xf32>
    %56 = vector.shape_cast %55 : vector<1x256x256xf32> to vector<256x256xf32>
    %57 = vector.shape_cast %54 : vector<256x256xf32> to vector<1x256x256xf32>
    tpu.vector_store %arg10[%c1_39, %c0_40, %c0_41], %57 {strides = array<i32>} : memref<2x256x256xf32, #tpu.memory_space<vmem>>, vector<1x256x256xf32>,
    return
  }
  func.func @transform_0(%arg0: i32) -> (i32, i32, i32) {
    %c0_i32 = arith.constant 0 : i32
    %c0_i32_0 = arith.constant 0 : i32
    %c0_i32_1 = arith.constant 0 : i32
    return %arg0, %c0_i32, %c0_i32_0 : i32, i32, i32
  }
  func.func @transform_1(%arg0: i32) -> (i32, i32) {
    %c0_i32 = arith.constant 0 : i32
    %c0_i32_0 = arith.constant 0 : i32
    %c0_i32_1 = arith.constant 0 : i32
    return %c0_i32, %c0_i32_0 : i32, i32
  }
  func.func @transform_2(%arg0: i32) -> (i32, i32) {
    %c0_i32 = arith.constant 0 : i32
    %c0_i32_0 = arith.constant 0 : i32
    %c0_i32_1 = arith.constant 0 : i32
    return %c0_i32, %c0_i32_0 : i32, i32
  }
  func.func @transform_3(%arg0: i32) -> (i32, i32) {
    %c0_i32 = arith.constant 0 : i32
    %c0_i32_0 = arith.constant 0 : i32
    %c0_i32_1 = arith.constant 0 : i32
    return %c0_i32, %c0_i32_0 : i32, i32
  }
  func.func @transform_4(%arg0: i32) -> (i32, i32) {
    %c0_i32 = arith.constant 0 : i32
    %c0_i32_0 = arith.constant 0 : i32
    %c0_i32_1 = arith.constant 0 : i32
    return %c0_i32, %c0_i32_0 : i32, i32
  }
  func.func @transform_5(%arg0: i32) -> (i32, i32) {
    %c0_i32 = arith.constant 0 : i32
    %c0_i32_0 = arith.constant 0 : i32
    %c0_i32_1 = arith.constant 0 : i32
    return %c0_i32, %c0_i32_0 : i32, i32
  }
  func.func @transform_6(%arg0: i32) -> (i32, i32) {
    %c0_i32 = arith.constant 0 : i32
    %c0_i32_0 = arith.constant 0 : i32
    %c0_i32_1 = arith.constant 0 : i32
    return %c0_i32, %c0_i32_0 : i32, i32
  }
  func.func @transform_7(%arg0: i32) -> (i32, i32) {
    %c0_i32 = arith.constant 0 : i32
    %c0_i32_0 = arith.constant 0 : i32
    %c0_i32_1 = arith.constant 0 : i32
    return %c0_i32, %c0_i32_0 : i32, i32
  }
  func.func @transform_8(%arg0: i32) -> (i32, i32, i32) {
    %c0_i32 = arith.constant 0 : i32
    %c0_i32_0 = arith.constant 0 : i32
    %c0_i32_1 = arith.constant 0 : i32
    return %arg0, %c0_i32, %c0_i32_0 : i32, i32, i32
  }
  func.func @transform_9(%arg0: i32) -> (i32, i32, i32) {
    %c0_i32 = arith.constant 0 : i32
    %c0_i32_0 = arith.constant 0 : i32
    %c0_i32_1 = arith.constant 0 : i32
    return %arg0, %c0_i32, %c0_i32_0 : i32, i32, i32
  }
}

</mosaic_0001>

<bundles_post_ra>
// kernel: goad_forward.1
= control target key start
LH: loop header
LB: loop body
LE: loop exit
PB: predicated region body
PF: predicated region fallthrough
CT: control target
= control target key end

     0   :  { %15 = vsyncpa [#allocation3], 0  ;;  %s7998_s0 = inlined_call_operand.vmem [shape: f32[4,32,256], index: 0, kind: input, shape index: {}]   ;;  %s7999_s1 = inlined_call_operand.vmem [shape: f32[32,8], index: 1, kind: input, shape index: {}]   ;;  %s8000_s2 = inlined_call_operand.vmem [shape: f32[8,8], index: 2, kind: input, shape index: {}]   ;;  %s8001_s3 = inlined_call_operand.vmem [shape: f32[8,8], index: 3, kind: input, shape index: {}]   ;;  %s8002_s4 = inlined_call_operand.vmem [shape: f32[8,8], index: 4, kind: input, shape index: {}]   ;;  %s8003_s5 = inlined_call_operand.vmem [shape: f32[8,8], index: 5, kind: input, shape index: {}]   ;;  %s8004_s6 = inlined_call_operand.vmem [shape: f32[256,8], index: 6, kind: input, shape index: {}]   ;;  %s8005_s7 = inlined_call_operand.vmem [shape: f32[256,1], index: 7, kind: input, shape index: {}]   ;;  %s8006_s8 = inlined_call_operand.hbm [shape: f32[4,8,256], index: 8, kind: output, shape index: {0}]   ;;  %s8007_s9 = inlined_call_operand.hbm [shape: f32[4,256,256], index: 9, kind: output, shape index: {1}]  }
   0x1   :  { %17 = vsyncpa [#allocation3 + $0x1], 0 }
   0x2   :  { %18 = vsyncpa [#allocation5], 0 }
   0x3   :  { %20 = vsyncpa [#allocation5 + $0x1], 0  ;;  %s6654_s30 = smov 0   ;;  %s6656_s10 = smov 0  }
   0x4   :  { %s6658_s11 = smov 0   ;;  %s6660_s12 = smov 0  }
   0x5 LB: > { %s6675_s13 = sadd.s32 4294967295, %s6596_s12   ;;  %s5136_s14 = sadd.s32 4294967294, %s6596_s12   ;;  %s6596_s12 = sphi %s6660_s12, %s8016_s12   ;;  %s6592_s11 = sphi %s6658_s11, %s8015_s11   ;;  %s6588_s10 = sphi %s6656_s10, %s8014_s10   ;;  %s6584_s30 = sphi %s6654_s30, %s8013_s30  }
   0x6   : > { %s6679_s15 = sadd.s32 1, %s6596_s12   ;;  %s206_s16 = sadd.s32 1, %s6592_s11 }
   0x7   : > { %s203_s17 = ssub.s32 %s6596_s12, %s6679_s15  ;;  %p216_p0 = scmp.ne.s32.totalorder %s6592_s11, %s6588_s10 }
   0x8   : > { %p204_p1 = scmp.eq.s32.totalorder %s203_s17, 0  ;;  %p217_p2 = scmp.eq.s32.totalorder %s6675_s13, 1 }
   0x9   : > { %p222_p3 = scmp.ne.s32.totalorder %s6588_s10, %s6584_s30  ;;  %p223_p4 = scmp.eq.s32.totalorder %s5136_s14, 1 }
   0xa   : > { %s6690_s18 = scalar_select %p204_p1, %s6592_s11, %s206_s16  }
   0xb   : > { %p6692_p5 = por %p217_p2, %p216_p0  ;;  %p6696_p6 = por %p223_p4, %p222_p3 }
   0xc   : > { %p5139_p7 = scmp.ge.s32.totalorder %s6596_s12, 1  ;;  %p298_p8 = scmp.lt.s32.totalorder %s6596_s12, 3 }
   0xe   : > { %p299_p9 = pnand %p5139_p7, %p298_p8 }
   0xf   : > { %s5142_s21 = sshll.u32 (!%p299_p9), %s6675_s13, 1  ;;  %v494_v0 = vld [vmem:[%s7999_s1] sm:$0xff] (!%p299_p9)  ;;  %v495_v1 = vld [vmem:[%s7999_s1 + $0x8] sm:$0xff] (!%p299_p9)  ;;  %v496_v3 = vld [vmem:[%s7999_s1 + $0x10] sm:$0xff] (!%p299_p9)  ;;  %vm498_vm0 = vcmask (!%p299_p9), 261120   ;;  %vm1205_vm1 = vcmask (!%p299_p9), 64512  }
  0x10   : > { %302 = sbr.rel (%p299_p9) target bundleno = 1921 (0x781), region = 52  ;;  %p341_p10 = scmp.lt.s32.totalorder (!%p299_p9), %s5142_s21, 3  ;;  %v6442_v2 = vpack.c.bf16 (!%p299_p9), %v495_v1, %v494_v0  ;;  %v497_v4 = vld [vmem:[%s7999_s1 + $0x18] sm:$0xff] (!%p299_p9) }
  0x11   : > { %v6446_v6 = vpack.c.bf16 (!%p299_p9), %v497_v4, %v496_v3  ;;  %v1204_v3 = vld [vmem:[%s8000_s2] sm:$0xff] (!%p299_p9)  ;;  %s7150_s14 = sand.u32 (!%p299_p9), 1, %s6588_s10   ;;  %s6600_s27 = smov (!%p299_p9), [#allocation2]  }
  0x12   : > { %6443 = vmatprep.subr.bf16.mxu0 (!%p299_p9), %v6442_v2  ;;  %6450 = vmatprep.subr.mxu1 (!%p299_p9), %v1204_v3  ;;  %s5140_s16 = sshll.u32 (!%p299_p9), %s7150_s14, 5  ;;  %s6506_s28 = sshll.u32 (!%p299_p9), %s6600_s27, 4  ;;  %s6507_s28 = int_to_ptr.vmem [resolvable:$false] %s6506_s28 }
  0x13   : > { %6445 = vmatpush3.bf16.msra.mxu0 (!%p299_p9), %v6442_v2  ;;  %6451 = vmatpush3.msra.mxu1 (!%p299_p9), %v1204_v3  ;;  %s7155_s17 = scalar_lea.vmem (!%p299_p9), [#allocation2], %s5140_s16 }
  0x14   : > { %6447 = vmatprep.subr.bf16.mxu0 (!%p299_p9), %v6446_v6  ;;  %s5025_s22 = sshll.u32 (!%p299_p9), %s7155_s17, 4  ;;  %s7684_s22 = int_to_ptr.vmem [resolvable:$true] %s5025_s22 }
  0x15   : > { %p6509_p0 = scmp.lt.s32.totalorder (!%p299_p9), %s7684_s22, %s6507_s28 }
  0x17   : > { %s8018_s21 = smov (!%p341_p10, %s5142_s21), 3  ;;  %6449 = vmatpush3.bf16.msra.mxu0 %v6446_v6 }
  0x18   : > { %s5613_s26 = sshll.u32 %s8018_s21, 6  ;;  %6050 = vmatprep.subr.mxu0 %v1204_v3  ;;  %s5615_s21 = sshll.u32 %s6675_s13, 9 }
  0x19   : > { %s6712_s29 = scalar_lea.vmem %s7998_s0, %s5613_s26  ;;  %s7694_s24 = scalar_lea.hbm %s8006_s8, %s5615_s21 }
  0x1a   : > { %v349_v5 = vld [vmem:[%s6712_s29] sm:$0xff]  ;;  %v350_v7 = vld [vmem:[%s6712_s29 + $0x8] sm:$0xff]  ;;  %v351_v8 = vld [vmem:[%s6712_s29 + $0x10] sm:$0xff]  ;;  %s6502_s26 = scalar_lea.vmem %s7684_s22, 512 }
  0x1b   : > { %357 = vxpose.xlu0.b32.start [1/4] (short) %v349_v5, 128  ;;  %389 = vxpose.xlu1.b32.start [1/4] (short) %v350_v7, 128  ;;  %v352_v9 = vld [vmem:[%s6712_s29 + $0x18] sm:$0xff]  ;;  %v353_v10 = vld [vmem:[%s6712_s29 + $0x20] sm:$0xff]  ;;  %v354_v11 = vld [vmem:[%s6712_s29 + $0x28] sm:$0xff]  ;;  %p6503_p11 = scmp.ne.s32.totalorder %s7684_s22, %s6502_s26 }
  0x1c   : > { %v355_v12 = vld [vmem:[%s6712_s29 + $0x30] sm:$0xff]  ;;  %v356_v13 = vld [vmem:[%s6712_s29 + $0x38] sm:$0xff]  ;;  %v5145_v14 = vld [vmem:[%s6712_s29 + $0x40] sm:$0xff] }
  0x1d   : > { %v5146_v15 = vld [vmem:[%s6712_s29 + $0x48] sm:$0xff]  ;;  %v5147_v16 = vld [vmem:[%s6712_s29 + $0x50] sm:$0xff]  ;;  %v5148_v17 = vld [vmem:[%s6712_s29 + $0x58] sm:$0xff]  ;;  %p6504_p12 = pnand %p6503_p11, %p6692_p5 }
  0x1e   : > { %v5149_v18 = vld [vmem:[%s6712_s29 + $0x60] sm:$0xff]  ;;  %v5150_v19 = vld [vmem:[%s6712_s29 + $0x68] sm:$0xff]  ;;  %v5151_v20 = vld [vmem:[%s6712_s29 + $0x70] sm:$0xff] }
  0x1f   : > { %358 = vxpose.xlu0.b32.cont [2/4] (short) %v351_v8, 128  ;;  %390 = vxpose.xlu1.b32.cont [2/4] (short) %v352_v9, 128  ;;  %v5152_v21 = vld [vmem:[%s6712_s29 + $0x78] sm:$0xff]  ;;  %s5141_s29 = sshll.u32 %s7150_s14, 10  ;;  %p6505_p13 = pneg %p6504_p12 }
  0x20   : > { %s7593_s16 = scalar_lea.vmem [#allocation4], %s5141_s29  ;;  %s6508_s29 = scalar_lea.vmem %s6507_s28, 1024 }
  0x21   : > { %p6510_p1 = scmp.lt.s32.totalorder %s6508_s29, %s6502_s26 }
  0x23   : > { %359 = vxpose.xlu0.b32.cont [3/4] (short) %v353_v10, 128  ;;  %391 = vxpose.xlu1.b32.cont [3/4] (short) %v354_v11, 128  ;;  %p6511_p2 = por %p6510_p1, %p6509_p0 }
  0x25   : > { %p6512_p3 = pnand %p6511_p2, %p6505_p13 }
  0x27   : > { %360 = vxpose.xlu0.b32.end [4/4] (short) %v355_v12, 128  ;;  %392 = vxpose.xlu1.b32.end [4/4] (short) %v356_v13, 128 }
  0x58   : > { %430 = vxpose.xlu0.b32.start [1/4] (short) %v5145_v14, 128  ;;  %462 = vxpose.xlu1.b32.start [1/4] (short) %v5146_v15, 128 }
  0x5c   : > { %431 = vxpose.xlu0.b32.cont [2/4] (short) %v5147_v16, 128  ;;  %463 = vxpose.xlu1.b32.cont [2/4] (short) %v5148_v17, 128 }
  0x60   : > { %432 = vxpose.xlu0.b32.cont [3/4] (short) %v5149_v18, 128  ;;  %464 = vxpose.xlu1.b32.cont [3/4] (short) %v5150_v19, 128 }
  0x64   : > { %433 = vxpose.xlu0.b32.end [4/4] (short) %v5151_v20, 128  ;;  %465 = vxpose.xlu1.b32.end [4/4] (short) %v5152_v21, 128 }
  0x9b   : > { %v373_v22 = vpop.trf.xlu0  ;;  %v405_v23 = vpop.trf.xlu1 }
  0x9c   : > { %5954 = vmatprep.mubr.msk.f32.mxu0 %vm498_vm0, %v373_v22 }
  0x9f   : > { %v374_v24 = vpop.trf.xlu0  ;;  %v406_v25 = vpop.trf.xlu1 }
  0xa0   : > { %5955 = vmatmul.mubr.msk.f32.vlgmr.msra.gmra.mrb[0].mxu0 %vm498_vm0, %v374_v24 }
  0xa1   : > { %6051 = vmatpush3.msra.mxu0 %v1204_v3 }
  0xa3   : > { %v375_v26 = vpop.trf.xlu0  ;;  %v407_v27 = vpop.trf.xlu1 }
  0xa4   : > { %5957 = vmatprep.mubr.msk.f32.mxu0 %vm498_vm0, %v375_v26 }
  0xa7   : > { %v376_v28 = vpop.trf.xlu0  ;;  %v408_v29 = vpop.trf.xlu1 }
  0xa8   : > { %5958 = vmatmul.mubr.msk.f32.gmra.mrb[2].mxu0 %vm498_vm0, %v376_v28 }
  0xab   : > { %v377_v30 = vpop.trf.xlu0  ;;  %v409_v31 = vpop.trf.xlu1 }
  0xac   : > { %5960 = vmatprep.mubr.msk.f32.mxu0 %vm498_vm0, %v377_v30 }
  0xaf   : > { %v378_v32 = vpop.trf.xlu0  ;;  %v410_v33 = vpop.trf.xlu1 }
  0xb0   : > { %5961 = vmatmul.mubr.msk.f32.gmra.mrb[4].mxu0 %vm498_vm0, %v378_v32 }
  0xb3   : > { %v379_v34 = vpop.trf.xlu0  ;;  %v411_v35 = vpop.trf.xlu1 }
  0xb4   : > { %5963 = vmatprep.mubr.msk.f32.mxu0 %vm498_vm0, %v379_v34 }
  0xb7   : > { %v380_v36 = vpop.trf.xlu0  ;;  %v412_v37 = vpop.trf.xlu1 }
  0xb8   : > { %5964 = vmatmul.mubr.msk.f32.gmra.mrb[6].mxu0 %vm498_vm0, %v380_v36 }
  0xbb   : > { %v381_v38 = vpop.trf.xlu0  ;;  %v413_v39 = vpop.trf.xlu1 }
  0xbc   : > { %5966 = vmatprep.mubr.msk.f32.mxu0 %vm498_vm0, %v381_v38 }
  0xbf   : > { %v382_v40 = vpop.trf.xlu0  ;;  %v414_v41 = vpop.trf.xlu1 }
  0xc0   : > { %5967 = vmatmul.mubr.msk.f32.gmra.mrb[8].mxu0 %vm498_vm0, %v382_v40 }
  0xc3   : > { %v383_v42 = vpop.trf.xlu0  ;;  %v415_v43 = vpop.trf.xlu1 }
  0xc4   : > { %5969 = vmatprep.mubr.msk.f32.mxu0 %vm498_vm0, %v383_v42 }
  0xc7   : > { %v384_v44 = vpop.trf.xlu0  ;;  %v416_v45 = vpop.trf.xlu1 }
  0xc8   : > { %5970 = vmatmul.mubr.msk.f32.gmra.mrb[10].mxu0 %vm498_vm0, %v384_v44 }
  0xcb   : > { %v385_v46 = vpop.trf.xlu0  ;;  %v417_v47 = vpop.trf.xlu1 }
  0xcc   : > { %5972 = vmatprep.mubr.msk.f32.mxu0 %vm498_vm0, %v385_v46 }
  0xcf   : > { %v386_v48 = vpop.trf.xlu0  ;;  %v418_v49 = vpop.trf.xlu1 }
  0xd0   : > { %5973 = vmatmul.mubr.msk.f32.gmra.mrb[12].mxu0 %vm498_vm0, %v386_v48 }
  0xd3   : > { %v387_v50 = vpop.trf.xlu0  ;;  %v419_v51 = vpop.trf.xlu1 }
  0xd4   : > { %5975 = vmatprep.mubr.msk.f32.mxu0 %vm498_vm0, %v387_v50 }
  0xd7   : > { %v388_v52 = vpop.trf.xlu0  ;;  %v420_v53 = vpop.trf.xlu1 }
  0xd8   : > { %5976 = vmatmul.mubr.msk.f32.gmra.mrb[14].mxu0 %vm498_vm0, %v388_v52 }
  0xd9   : > { %5978 = vmatprep.mubr.msk.f32.mxu0 %vm498_vm0, %v405_v23 }
  0xdb   : > { %v446_v54 = vpop.trf.xlu0  ;;  %v478_v55 = vpop.trf.xlu1 }
  0xdc   : > { %5979 = vmatmul.mubr.msk.f32.gmra.mrb[16].mxu0 %vm498_vm0, %v406_v25 }
  0xdd   : > { %5981 = vmatprep.mubr.msk.f32.mxu0 %vm498_vm0, %v407_v27 }
  0xdf   : > { %v447_v56 = vpop.trf.xlu0  ;;  %v479_v57 = vpop.trf.xlu1 }
  0xe0   : > { %5982 = vmatmul.mubr.msk.f32.gmra.mrb[18].mxu0 %vm498_vm0, %v408_v29 }
  0xe1   : > { %5984 = vmatprep.mubr.msk.f32.mxu0 %vm498_vm0, %v409_v31 }
  0xe3   : > { %v448_v58 = vpop.trf.xlu0  ;;  %v480_v60 = vpop.trf.xlu1 }
  0xe4   : > { %5985 = vmatmul.mubr.msk.f32.gmra.mrb[20].mxu0 %vm498_vm0, %v410_v33 }
  0xe5   : > { %5987 = vmatprep.mubr.msk.f32.mxu0 %vm498_vm0, %v411_v35 }
  0xe7   : > { %v449_v59 = vpop.trf.xlu0  ;;  %v481_v62 = vpop.trf.xlu1 }
  0xe8   : > { %5988 = vmatmul.mubr.msk.f32.gmra.mrb[22].mxu0 %vm498_vm0, %v412_v37 }
  0xe9   : > { %5990 = vmatprep.mubr.msk.f32.mxu0 %vm498_vm0, %v413_v39 }
  0xeb   : > { %v450_v61 = vpop.trf.xlu0  ;;  %v482_v1 = vpop.trf.xlu1 }
  0xec   : > { %5991 = vmatmul.mubr.msk.f32.gmra.mrb[24].mxu0 %vm498_vm0, %v414_v41 }
  0xed   : > { %5993 = vmatprep.mubr.msk.f32.mxu0 %vm498_vm0, %v415_v43 }
  0xef   : > { %v451_v63 = vpop.trf.xlu0  ;;  %v483_v4 = vpop.trf.xlu1 }
  0xf0   : > { %5994 = vmatmul.mubr.msk.f32.gmra.mrb[26].mxu0 %vm498_vm0, %v416_v45 }
  0xf1   : > { %5996 = vmatprep.mubr.msk.f32.mxu0 %vm498_vm0, %v417_v47 }
  0xf3   : > { %v452_v0 = vpop.trf.xlu0  ;;  %v484_v7 = vpop.trf.xlu1 }
  0xf4   : > { %5997 = vmatmul.mubr.msk.f32.gmra.mrb[28].mxu0 %vm498_vm0, %v418_v49 }
  0xf5   : > { %5999 = vmatprep.mubr.msk.f32.mxu0 %vm498_vm0, %v419_v51 }
  0xf7   : > { %v453_v2 = vpop.trf.xlu0  ;;  %v485_v9 = vpop.trf.xlu1 }
  0xf8   : > { %6000 = vmatmul.mubr.msk.f32.gmra.mrb[30].mxu0 %vm498_vm0, %v420_v53 }
  0xf9   : > { %6002 = vmatprep.mubr.msk.f32.mxu0 %vm498_vm0, %v446_v54 }
  0xfb   : > { %v454_v5 = vpop.trf.xlu0  ;;  %v486_v12 = vpop.trf.xlu1 }
  0xfc   : > { %6003 = vmatmul.mubr.msk.f32.gmra.mrb[32].mxu0 %vm498_vm0, %v447_v56 }
  0xfd   : > { %6005 = vmatprep.mubr.msk.f32.mxu0 %vm498_vm0, %v448_v58 }
  0xff   : > { %v455_v6 = vpop.trf.xlu0  ;;  %v487_v14 = vpop.trf.xlu1 }
 0x100   : > { %6006 = vmatmul.mubr.msk.f32.gmra.mrb[34].mxu0 %vm498_vm0, %v449_v59 }
 0x101   : > { %6008 = vmatprep.mubr.msk.f32.mxu0 %vm498_vm0, %v450_v61 }
 0x103   : > { %v456_v8 = vpop.trf.xlu0  ;;  %v488_v17 = vpop.trf.xlu1 }
 0x104   : > { %6009 = vmatmul.mubr.msk.f32.gmra.mrb[36].mxu0 %vm498_vm0, %v451_v63 }
 0x105   : > { %6011 = vmatprep.mubr.msk.f32.mxu0 %vm498_vm0, %v452_v0 }
 0x107   : > { %v457_v10 = vpop.trf.xlu0  ;;  %v489_v18 = vpop.trf.xlu1 }
 0x108   : > { %6012 = vmatmul.mubr.msk.f32.gmra.mrb[38].mxu0 %vm498_vm0, %v453_v2 }
 0x109   : > { %6014 = vmatprep.mubr.msk.f32.mxu0 %vm498_vm0, %v454_v5 }
 0x10b   : > { %v458_v11 = vpop.trf.xlu0  ;;  %v490_v19 = vpop.trf.xlu1 }
 0x10c   : > { %6015 = vmatmul.mubr.msk.f32.gmra.mrb[40].mxu0 %vm498_vm0, %v455_v6 }
 0x10d   : > { %6017 = vmatprep.mubr.msk.f32.mxu0 %vm498_vm0, %v456_v8 }
 0x10f   : > { %v459_v13 = vpop.trf.xlu0  ;;  %v491_v20 = vpop.trf.xlu1 }
 0x110   : > { %6018 = vmatmul.mubr.msk.f32.gmra.mrb[42].mxu0 %vm498_vm0, %v457_v10 }
 0x111   : > { %6020 = vmatprep.mubr.msk.f32.mxu0 %vm498_vm0, %v458_v11 }
 0x113   : > { %v460_v15 = vpop.trf.xlu0  ;;  %v492_v21 = vpop.trf.xlu1 }
 0x114   : > { %6021 = vmatmul.mubr.msk.f32.gmra.mrb[44].mxu0 %vm498_vm0, %v459_v13 }
 0x115   : > { %6023 = vmatprep.mubr.msk.f32.mxu0 %vm498_vm0, %v460_v15 }
 0x117   : > { %v461_v16 = vpop.trf.xlu0  ;;  %v493_v22 = vpop.trf.xlu1 }
 0x118   : > { %6024 = vmatmul.mubr.msk.f32.gmra.mrb[46].mxu0 %vm498_vm0, %v461_v16 }
 0x119   : > { %6026 = vmatprep.mubr.msk.f32.mxu0 %vm498_vm0, %v478_v55 }
 0x11c   : > { %6027 = vmatmul.mubr.msk.f32.gmra.mrb[48].mxu0 %vm498_vm0, %v479_v57 }
 0x11d   : > { %6029 = vmatprep.mubr.msk.f32.mxu0 %vm498_vm0, %v480_v60 }
 0x120   : > { %6030 = vmatmul.mubr.msk.f32.gmra.mrb[50].mxu0 %vm498_vm0, %v481_v62 }
 0x121   : > { %6032 = vmatprep.mubr.msk.f32.mxu0 %vm498_vm0, %v482_v1 }
 0x124   : > { %6033 = vmatmul.mubr.msk.f32.gmra.mrb[52].mxu0 %vm498_vm0, %v483_v4 }
 0x125   : > { %6035 = vmatprep.mubr.msk.f32.mxu0 %vm498_vm0, %v484_v7 }
 0x128   : > { %6036 = vmatmul.mubr.msk.f32.gmra.mrb[54].mxu0 %vm498_vm0, %v485_v9 }
 0x129   : > { %6038 = vmatprep.mubr.msk.f32.mxu0 %vm498_vm0, %v486_v12 }
 0x12c   : > { %6039 = vmatmul.mubr.msk.f32.gmra.mrb[56].mxu0 %vm498_vm0, %v487_v14 }
 0x12d   : > { %6041 = vmatprep.mubr.msk.f32.mxu0 %vm498_vm0, %v488_v17 }
 0x130   : > { %6042 = vmatmul.mubr.msk.f32.gmra.mrb[58].mxu0 %vm498_vm0, %v489_v18 }
 0x131   : > { %6044 = vmatprep.mubr.msk.f32.mxu0 %vm498_vm0, %v490_v19 }
 0x134   : > { %6045 = vmatmul.mubr.msk.f32.gmra.mrb[60].mxu0 %vm498_vm0, %v491_v20 }
 0x135   : > { %6047 = vmatprep.mubr.msk.f32.mxu0 %vm498_vm0, %v492_v21 }
 0x138   : > { %6048 = vmatmul.mubr.msk.f32.gmra.mrb[62].mxu0 %vm498_vm0, %v493_v22 }
 0x173   : > { %v5956_v23 = vpop.f32.mrb[0].mxu0 }
 0x174   : > { %v1077_v24 = vmul.f32 0.2, %v5956_v23  ;;  %v757_v25 = vpop.f32.mrb[1].mxu0 }
 0x175   : > { %v1076_v26 = vmul.f32 0.2, %v757_v25 }
 0x176   : > { %v1141_v28 = vmax.f32 %v5956_v23, %v1077_v24 }
 0x177   : > { %v1140_v27 = vmax.f32 %v757_v25, %v1076_v26 }
 0x179   : > { %6052 = vmatprep.mubr.msk.f32.mxu0 %vm1205_vm1, %v1140_v27 }
 0x17a   : > { %6053 = vmatmul.mubr.msk.f32.vlgmr.msra.gmra.mrb[64].mxu0 %vm1205_vm1, %v1141_v28 }
 0x17b   : > { %v5959_v29 = vpop.f32.mrb[2].mxu0 }
 0x17c   : > { %v1079_v30 = vmul.f32 0.2, %v5959_v29  ;;  %v767_v31 = vpop.f32.mrb[3].mxu0 }
 0x17d   : > { %v1078_v32 = vmul.f32 0.2, %v767_v31 }
 0x17e   : > { %v1143_v34 = vmax.f32 %v5959_v29, %v1079_v30 }
 0x17f   : > { %v1142_v33 = vmax.f32 %v767_v31, %v1078_v32 }
 0x181   : > { %6055 = vmatprep.mubr.msk.f32.mxu0 %vm1205_vm1, %v1142_v33 }
 0x182   : > { %6056 = vmatmul.mubr.msk.f32.gmra.mrb[66].mxu0 %vm1205_vm1, %v1143_v34 }
 0x183   : > { %v5962_v35 = vpop.f32.mrb[4].mxu0 }
 0x184   : > { %v1081_v36 = vmul.f32 0.2, %v5962_v35  ;;  %v777_v37 = vpop.f32.mrb[5].mxu0 }
 0x185   : > { %v1080_v38 = vmul.f32 0.2, %v777_v37 }
 0x186   : > { %v1145_v40 = vmax.f32 %v5962_v35, %v1081_v36 }
 0x187   : > { %v1144_v39 = vmax.f32 %v777_v37, %v1080_v38 }
 0x189   : > { %6058 = vmatprep.mubr.msk.f32.mxu0 %vm1205_vm1, %v1144_v39 }
 0x18a   : > { %6059 = vmatmul.mubr.msk.f32.gmra.mrb[68].mxu0 %vm1205_vm1, %v1145_v40 }
 0x18b   : > { %v5965_v41 = vpop.f32.mrb[6].mxu0 }
 0x18c   : > { %v1083_v42 = vmul.f32 0.2, %v5965_v41  ;;  %v787_v43 = vpop.f32.mrb[7].mxu0 }
 0x18d   : > { %v1082_v44 = vmul.f32 0.2, %v787_v43 }
 0x18e   : > { %v1147_v46 = vmax.f32 %v5965_v41, %v1083_v42 }
 0x18f   : > { %v1146_v45 = vmax.f32 %v787_v43, %v1082_v44 }
 0x191   : > { %6061 = vmatprep.mubr.msk.f32.mxu0 %vm1205_vm1, %v1146_v45 }
 0x192   : > { %6062 = vmatmul.mubr.msk.f32.gmra.mrb[70].mxu0 %vm1205_vm1, %v1147_v46 }
 0x193   : > { %v5968_v47 = vpop.f32.mrb[8].mxu0 }
 0x194   : > { %v1085_v48 = vmul.f32 0.2, %v5968_v47  ;;  %v797_v49 = vpop.f32.mrb[9].mxu0 }
 0x195   : > { %v1084_v50 = vmul.f32 0.2, %v797_v49 }
 0x196   : > { %v1149_v52 = vmax.f32 %v5968_v47, %v1085_v48 }
 0x197   : > { %v1148_v51 = vmax.f32 %v797_v49, %v1084_v50 }
 0x199   : > { %6064 = vmatprep.mubr.msk.f32.mxu0 %vm1205_vm1, %v1148_v51 }
 0x19a   : > { %6065 = vmatmul.mubr.msk.f32.gmra.mrb[72].mxu0 %vm1205_vm1, %v1149_v52 }
 0x19b   : > { %v5971_v53 = vpop.f32.mrb[10].mxu0 }
 0x19c   : > { %v1087_v54 = vmul.f32 0.2, %v5971_v53  ;;  %v807_v55 = vpop.f32.mrb[11].mxu0 }
 0x19d   : > { %v1086_v56 = vmul.f32 0.2, %v807_v55 }
 0x19e   : > { %v1151_v58 = vmax.f32 %v5971_v53, %v1087_v54 }
 0x19f   : > { %v1150_v57 = vmax.f32 %v807_v55, %v1086_v56 }
 0x1a1   : > { %6067 = vmatprep.mubr.msk.f32.mxu0 %vm1205_vm1, %v1150_v57 }
 0x1a2   : > { %6068 = vmatmul.mubr.msk.f32.gmra.mrb[74].mxu0 %vm1205_vm1, %v1151_v58 }
 0x1a3   : > { %v5974_v59 = vpop.f32.mrb[12].mxu0 }
 0x1a4   : > { %v1089_v60 = vmul.f32 0.2, %v5974_v59  ;;  %v817_v61 = vpop.f32.mrb[13].mxu0 }
 0x1a5   : > { %v1088_v62 = vmul.f32 0.2, %v817_v61 }
 0x1a6   : > { %v1153_v0 = vmax.f32 %v5974_v59, %v1089_v60  ;;  %v1911_v59 = vld [vmem:[%s8001_s3] sm:$0xff] }
 0x1a7   : > { %v1152_v63 = vmax.f32 %v817_v61, %v1088_v62  ;;  %6148 = vmatprep.subr.mxu1 %v1911_v59 }
 0x1a9   : > { %6070 = vmatprep.mubr.msk.f32.mxu0 %vm1205_vm1, %v1152_v63 }
 0x1aa   : > { %6071 = vmatmul.mubr.msk.f32.gmra.mrb[76].mxu0 %vm1205_vm1, %v1153_v0 }
 0x1ab   : > { %v5977_v1 = vpop.f32.mrb[14].mxu0 }
 0x1ac   : > { %v1091_v2 = vmul.f32 0.2, %v5977_v1  ;;  %v827_v3 = vpop.f32.mrb[15].mxu0 }
 0x1ad   : > { %v1090_v4 = vmul.f32 0.2, %v827_v3 }
 0x1ae   : > { %v1155_v7 = vmax.f32 %v5977_v1, %v1091_v2 }
 0x1af   : > { %v1154_v5 = vmax.f32 %v827_v3, %v1090_v4  ;;  %v5980_v6 = vpop.f32.mrb[16].mxu0 }
 0x1b0   : > { %v1093_v8 = vmul.f32 0.2, %v5980_v6  ;;  %v837_v9 = vpop.f32.mrb[17].mxu0 }
 0x1b1   : > { %v1092_v10 = vmul.f32 0.2, %v837_v9  ;;  %6073 = vmatprep.mubr.msk.f32.mxu0 %vm1205_vm1, %v1154_v5 }
 0x1b2   : > { %6074 = vmatmul.mubr.msk.f32.gmra.mrb[78].mxu0 %vm1205_vm1, %v1155_v7  ;;  %v1157_v13 = vmax.f32 %v5980_v6, %v1093_v8 }
 0x1b3   : > { %v1156_v11 = vmax.f32 %v837_v9, %v1092_v10  ;;  %v5983_v12 = vpop.f32.mrb[18].mxu0 }
 0x1b4   : > { %v1095_v14 = vmul.f32 0.2, %v5983_v12  ;;  %v847_v15 = vpop.f32.mrb[19].mxu0 }
 0x1b5   : > { %v1094_v16 = vmul.f32 0.2, %v847_v15  ;;  %6076 = vmatprep.mubr.msk.f32.mxu0 %vm1205_vm1, %v1156_v11 }
 0x1b6   : > { %6077 = vmatmul.mubr.msk.f32.gmra.mrb[80].mxu0 %vm1205_vm1, %v1157_v13  ;;  %v1159_v19 = vmax.f32 %v5983_v12, %v1095_v14 }
 0x1b7   : > { %v1158_v17 = vmax.f32 %v847_v15, %v1094_v16  ;;  %v5986_v18 = vpop.f32.mrb[20].mxu0 }
 0x1b8   : > { %v1097_v20 = vmul.f32 0.2, %v5986_v18  ;;  %v857_v21 = vpop.f32.mrb[21].mxu0 }
 0x1b9   : > { %v1096_v22 = vmul.f32 0.2, %v857_v21  ;;  %6079 = vmatprep.mubr.msk.f32.mxu0 %vm1205_vm1, %v1158_v17 }
 0x1ba   : > { %6080 = vmatmul.mubr.msk.f32.gmra.mrb[82].mxu0 %vm1205_vm1, %v1159_v19  ;;  %v1161_v25 = vmax.f32 %v5986_v18, %v1097_v20 }
 0x1bb   : > { %v1160_v23 = vmax.f32 %v857_v21, %v1096_v22  ;;  %v5989_v24 = vpop.f32.mrb[22].mxu0 }
 0x1bc   : > { %v1099_v26 = vmul.f32 0.2, %v5989_v24  ;;  %v867_v27 = vpop.f32.mrb[23].mxu0 }
 0x1bd   : > { %v1098_v28 = vmul.f32 0.2, %v867_v27  ;;  %6082 = vmatprep.mubr.msk.f32.mxu0 %vm1205_vm1, %v1160_v23 }
 0x1be   : > { %6083 = vmatmul.mubr.msk.f32.gmra.mrb[84].mxu0 %vm1205_vm1, %v1161_v25  ;;  %v1163_v31 = vmax.f32 %v5989_v24, %v1099_v26 }
 0x1bf   : > { %v1162_v29 = vmax.f32 %v867_v27, %v1098_v28  ;;  %v5992_v30 = vpop.f32.mrb[24].mxu0 }
 0x1c0   : > { %v1101_v32 = vmul.f32 0.2, %v5992_v30  ;;  %v877_v33 = vpop.f32.mrb[25].mxu0 }
 0x1c1   : > { %v1100_v34 = vmul.f32 0.2, %v877_v33  ;;  %6085 = vmatprep.mubr.msk.f32.mxu0 %vm1205_vm1, %v1162_v29 }
 0x1c2   : > { %6086 = vmatmul.mubr.msk.f32.gmra.mrb[86].mxu0 %vm1205_vm1, %v1163_v31  ;;  %v1165_v37 = vmax.f32 %v5992_v30, %v1101_v32 }
 0x1c3   : > { %v1164_v35 = vmax.f32 %v877_v33, %v1100_v34  ;;  %v5995_v36 = vpop.f32.mrb[26].mxu0 }
 0x1c4   : > { %v1103_v38 = vmul.f32 0.2, %v5995_v36  ;;  %v887_v39 = vpop.f32.mrb[27].mxu0 }
 0x1c5   : > { %v1102_v40 = vmul.f32 0.2, %v887_v39  ;;  %6088 = vmatprep.mubr.msk.f32.mxu0 %vm1205_vm1, %v1164_v35 }
 0x1c6   : > { %6089 = vmatmul.mubr.msk.f32.gmra.mrb[88].mxu0 %vm1205_vm1, %v1165_v37  ;;  %v1167_v43 = vmax.f32 %v5995_v36, %v1103_v38 }
 0x1c7   : > { %v1166_v41 = vmax.f32 %v887_v39, %v1102_v40  ;;  %v5998_v42 = vpop.f32.mrb[28].mxu0 }
 0x1c8   : > { %v1105_v44 = vmul.f32 0.2, %v5998_v42  ;;  %v897_v45 = vpop.f32.mrb[29].mxu0 }
 0x1c9   : > { %v1104_v46 = vmul.f32 0.2, %v897_v45  ;;  %6091 = vmatprep.mubr.msk.f32.mxu0 %vm1205_vm1, %v1166_v41 }
 0x1ca   : > { %6092 = vmatmul.mubr.msk.f32.gmra.mrb[90].mxu0 %vm1205_vm1, %v1167_v43  ;;  %v1169_v49 = vmax.f32 %v5998_v42, %v1105_v44 }
 0x1cb   : > { %v1168_v47 = vmax.f32 %v897_v45, %v1104_v46  ;;  %v6001_v48 = vpop.f32.mrb[30].mxu0 }
 0x1cc   : > { %v1107_v50 = vmul.f32 0.2, %v6001_v48  ;;  %v907_v51 = vpop.f32.mrb[31].mxu0 }
 0x1cd   : > { %v1106_v52 = vmul.f32 0.2, %v907_v51  ;;  %6094 = vmatprep.mubr.msk.f32.mxu0 %vm1205_vm1, %v1168_v47 }
 0x1ce   : > { %6095 = vmatmul.mubr.msk.f32.gmra.mrb[92].mxu0 %vm1205_vm1, %v1169_v49  ;;  %v1171_v55 = vmax.f32 %v6001_v48, %v1107_v50 }
 0x1cf   : > { %v6004_v53 = vpop.f32.mrb[32].mxu0  ;;  %v1170_v54 = vmax.f32 %v907_v51, %v1106_v52 }
 0x1d0   : > { %v1109_v56 = vmul.f32 0.2, %v6004_v53  ;;  %v917_v57 = vpop.f32.mrb[33].mxu0 }
 0x1d1   : > { %v1108_v58 = vmul.f32 0.2, %v917_v57  ;;  %6097 = vmatprep.mubr.msk.f32.mxu1 %vm1205_vm1, %v1170_v54 }
 0x1d2   : > { %6098 = vmatmul.mubr.msk.f32.vlgmr.msra.gmra.mrb[0].mxu1 %vm1205_vm1, %v1171_v55  ;;  %v1173_v62 = vmax.f32 %v6004_v53, %v1109_v56 }
 0x1d3   : > { %v1172_v60 = vmax.f32 %v917_v57, %v1108_v58  ;;  %v6007_v61 = vpop.f32.mrb[34].mxu0  ;;  %6149 = vmatpush3.msra.mxu1 %v1911_v59 }
 0x1d4   : > { %v1111_v63 = vmul.f32 0.2, %v6007_v61  ;;  %v927_v0 = vpop.f32.mrb[35].mxu0 }
 0x1d5   : > { %v1110_v1 = vmul.f32 0.2, %v927_v0  ;;  %6100 = vmatprep.mubr.msk.f32.mxu1 %vm1205_vm1, %v1172_v60 }
 0x1d6   : > { %6101 = vmatmul.mubr.msk.f32.gmra.mrb[2].mxu1 %vm1205_vm1, %v1173_v62  ;;  %v1175_v4 = vmax.f32 %v6007_v61, %v1111_v63 }
 0x1d7   : > { %v1174_v2 = vmax.f32 %v927_v0, %v1110_v1  ;;  %v6010_v3 = vpop.f32.mrb[36].mxu0 }
 0x1d8   : > { %v1113_v5 = vmul.f32 0.2, %v6010_v3  ;;  %v937_v6 = vpop.f32.mrb[37].mxu0 }
 0x1d9   : > { %v1112_v7 = vmul.f32 0.2, %v937_v6  ;;  %6103 = vmatprep.mubr.msk.f32.mxu1 %vm1205_vm1, %v1174_v2 }
 0x1da   : > { %6104 = vmatmul.mubr.msk.f32.gmra.mrb[4].mxu1 %vm1205_vm1, %v1175_v4  ;;  %v1177_v10 = vmax.f32 %v6010_v3, %v1113_v5 }
 0x1db   : > { %v1176_v8 = vmax.f32 %v937_v6, %v1112_v7  ;;  %v6013_v9 = vpop.f32.mrb[38].mxu0 }
 0x1dc   : > { %v1115_v11 = vmul.f32 0.2, %v6013_v9  ;;  %v947_v12 = vpop.f32.mrb[39].mxu0 }
 0x1dd   : > { %v1114_v13 = vmul.f32 0.2, %v947_v12  ;;  %6106 = vmatprep.mubr.msk.f32.mxu1 %vm1205_vm1, %v1176_v8 }
 0x1de   : > { %6107 = vmatmul.mubr.msk.f32.gmra.mrb[6].mxu1 %vm1205_vm1, %v1177_v10  ;;  %v1179_v16 = vmax.f32 %v6013_v9, %v1115_v11 }
 0x1df   : > { %v1178_v14 = vmax.f32 %v947_v12, %v1114_v13  ;;  %v6016_v15 = vpop.f32.mrb[40].mxu0 }
 0x1e0   : > { %v1117_v17 = vmul.f32 0.2, %v6016_v15  ;;  %v957_v18 = vpop.f32.mrb[41].mxu0 }
 0x1e1   : > { %v1116_v19 = vmul.f32 0.2, %v957_v18  ;;  %6109 = vmatprep.mubr.msk.f32.mxu1 %vm1205_vm1, %v1178_v14 }
 0x1e2   : > { %6110 = vmatmul.mubr.msk.f32.gmra.mrb[8].mxu1 %vm1205_vm1, %v1179_v16  ;;  %v1181_v22 = vmax.f32 %v6016_v15, %v1117_v17 }
 0x1e3   : > { %v1180_v20 = vmax.f32 %v957_v18, %v1116_v19  ;;  %v6019_v21 = vpop.f32.mrb[42].mxu0 }
 0x1e4   : > { %v1119_v23 = vmul.f32 0.2, %v6019_v21  ;;  %v967_v24 = vpop.f32.mrb[43].mxu0 }
 0x1e5   : > { %v1118_v25 = vmul.f32 0.2, %v967_v24  ;;  %6112 = vmatprep.mubr.msk.f32.mxu1 %vm1205_vm1, %v1180_v20 }
 0x1e6   : > { %6113 = vmatmul.mubr.msk.f32.gmra.mrb[10].mxu1 %vm1205_vm1, %v1181_v22  ;;  %v1183_v28 = vmax.f32 %v6019_v21, %v1119_v23 }
 0x1e7   : > { %v1182_v26 = vmax.f32 %v967_v24, %v1118_v25  ;;  %v6022_v27 = vpop.f32.mrb[44].mxu0 }
 0x1e8   : > { %v1121_v29 = vmul.f32 0.2, %v6022_v27  ;;  %v977_v30 = vpop.f32.mrb[45].mxu0 }
 0x1e9   : > { %v1120_v31 = vmul.f32 0.2, %v977_v30  ;;  %6115 = vmatprep.mubr.msk.f32.mxu1 %vm1205_vm1, %v1182_v26 }
 0x1ea   : > { %6116 = vmatmul.mubr.msk.f32.gmra.mrb[12].mxu1 %vm1205_vm1, %v1183_v28  ;;  %v1185_v34 = vmax.f32 %v6022_v27, %v1121_v29 }
 0x1eb   : > { %v1184_v32 = vmax.f32 %v977_v30, %v1120_v31  ;;  %v6025_v33 = vpop.f32.mrb[46].mxu0 }
 0x1ec   : > { %v1123_v35 = vmul.f32 0.2, %v6025_v33  ;;  %v987_v36 = vpop.f32.mrb[47].mxu0 }
 0x1ed   : > { %v1122_v37 = vmul.f32 0.2, %v987_v36  ;;  %6118 = vmatprep.mubr.msk.f32.mxu1 %vm1205_vm1, %v1184_v32 }
 0x1ee   : > { %6119 = vmatmul.mubr.msk.f32.gmra.mrb[14].mxu1 %vm1205_vm1, %v1185_v34  ;;  %v1187_v40 = vmax.f32 %v6025_v33, %v1123_v35 }
 0x1ef   : > { %v1186_v38 = vmax.f32 %v987_v36, %v1122_v37  ;;  %v6028_v39 = vpop.f32.mrb[48].mxu0 }
 0x1f0   : > { %v1125_v41 = vmul.f32 0.2, %v6028_v39  ;;  %v997_v42 = vpop.f32.mrb[49].mxu0 }
 0x1f1   : > { %v1124_v43 = vmul.f32 0.2, %v997_v42  ;;  %6121 = vmatprep.mubr.msk.f32.mxu1 %vm1205_vm1, %v1186_v38 }
 0x1f2   : > { %6122 = vmatmul.mubr.msk.f32.gmra.mrb[16].mxu1 %vm1205_vm1, %v1187_v40  ;;  %v1189_v46 = vmax.f32 %v6028_v39, %v1125_v41 }
 0x1f3   : > { %v1188_v44 = vmax.f32 %v997_v42, %v1124_v43  ;;  %v6031_v45 = vpop.f32.mrb[50].mxu0 }
 0x1f4   : > { %v1127_v47 = vmul.f32 0.2, %v6031_v45  ;;  %v1007_v48 = vpop.f32.mrb[51].mxu0 }
 0x1f5   : > { %v1126_v49 = vmul.f32 0.2, %v1007_v48  ;;  %6124 = vmatprep.mubr.msk.f32.mxu1 %vm1205_vm1, %v1188_v44 }
 0x1f6   : > { %v1191_v50 = vmax.f32 %v6031_v45, %v1127_v47  ;;  %6125 = vmatmul.mubr.msk.f32.gmra.mrb[18].mxu1 %vm1205_vm1, %v1189_v46 }
 0x1f7   : > { %v1190_v51 = vmax.f32 %v1007_v48, %v1126_v49  ;;  %v6034_v52 = vpop.f32.mrb[52].mxu0 }
 0x1f8   : > { %v1129_v53 = vmul.f32 0.2, %v6034_v52  ;;  %v1017_v54 = vpop.f32.mrb[53].mxu0 }
 0x1f9   : > { %v1128_v55 = vmul.f32 0.2, %v1017_v54  ;;  %6127 = vmatprep.mubr.msk.f32.mxu1 %vm1205_vm1, %v1190_v51 }
 0x1fa   : > { %v1193_v56 = vmax.f32 %v6034_v52, %v1129_v53  ;;  %6128 = vmatmul.mubr.msk.f32.gmra.mrb[20].mxu1 %vm1205_vm1, %v1191_v50 }
 0x1fb   : > { %v1192_v57 = vmax.f32 %v1017_v54, %v1128_v55  ;;  %v6037_v58 = vpop.f32.mrb[54].mxu0 }
 0x1fc   : > { %v1131_v59 = vmul.f32 0.2, %v6037_v58  ;;  %v1027_v60 = vpop.f32.mrb[55].mxu0 }
 0x1fd   : > { %v1130_v61 = vmul.f32 0.2, %v1027_v60  ;;  %6130 = vmatprep.mubr.msk.f32.mxu1 %vm1205_vm1, %v1192_v57 }
 0x1fe   : > { %v1195_v62 = vmax.f32 %v6037_v58, %v1131_v59  ;;  %6131 = vmatmul.mubr.msk.f32.gmra.mrb[22].mxu1 %vm1205_vm1, %v1193_v56 }
 0x1ff   : > { %v1194_v63 = vmax.f32 %v1027_v60, %v1130_v61  ;;  %v6040_v0 = vpop.f32.mrb[56].mxu0 }
 0x200   : > { %v1133_v1 = vmul.f32 0.2, %v6040_v0  ;;  %v1037_v2 = vpop.f32.mrb[57].mxu0 }
 0x201   : > { %v1132_v3 = vmul.f32 0.2, %v1037_v2  ;;  %6133 = vmatprep.mubr.msk.f32.mxu1 %vm1205_vm1, %v1194_v63 }
 0x202   : > { %v1197_v4 = vmax.f32 %v6040_v0, %v1133_v1  ;;  %6134 = vmatmul.mubr.msk.f32.gmra.mrb[24].mxu1 %vm1205_vm1, %v1195_v62 }
 0x203   : > { %v1196_v5 = vmax.f32 %v1037_v2, %v1132_v3  ;;  %v6043_v6 = vpop.f32.mrb[58].mxu0 }
 0x204   : > { %v1135_v7 = vmul.f32 0.2, %v6043_v6  ;;  %v1047_v8 = vpop.f32.mrb[59].mxu0 }
 0x205   : > { %6136 = vmatprep.mubr.msk.f32.mxu1 %vm1205_vm1, %v1196_v5  ;;  %v1134_v9 = vmul.f32 0.2, %v1047_v8 }
 0x206   : > { %v1199_v10 = vmax.f32 %v6043_v6, %v1135_v7  ;;  %6137 = vmatmul.mubr.msk.f32.gmra.mrb[26].mxu1 %vm1205_vm1, %v1197_v4 }
 0x207   : > { %v1198_v11 = vmax.f32 %v1047_v8, %v1134_v9  ;;  %v6046_v12 = vpop.f32.mrb[60].mxu0 }
 0x208   : > { %v1137_v13 = vmul.f32 0.2, %v6046_v12  ;;  %v1057_v14 = vpop.f32.mrb[61].mxu0 }
 0x209   : > { %6139 = vmatprep.mubr.msk.f32.mxu1 %vm1205_vm1, %v1198_v11  ;;  %v1136_v15 = vmul.f32 0.2, %v1057_v14 }
 0x20a   : > { %6140 = vmatmul.mubr.msk.f32.gmra.mrb[28].mxu1 %vm1205_vm1, %v1199_v10  ;;  %v1201_v16 = vmax.f32 %v6046_v12, %v1137_v13 }
 0x20b   : > { %v1200_v17 = vmax.f32 %v1057_v14, %v1136_v15  ;;  %v6049_v18 = vpop.f32.mrb[62].mxu0 }
 0x20c   : > { %v1139_v19 = vmul.f32 0.2, %v6049_v18  ;;  %v1067_v20 = vpop.f32.mrb[63].mxu0 }
 0x20d   : > { %6142 = vmatprep.mubr.msk.f32.mxu1 %vm1205_vm1, %v1200_v17  ;;  %v1138_v21 = vmul.f32 0.2, %v1067_v20 }
 0x20e   : > { %6143 = vmatmul.mubr.msk.f32.gmra.mrb[30].mxu1 %vm1205_vm1, %v1201_v16  ;;  %v1203_v22 = vmax.f32 %v6049_v18, %v1139_v19 }
 0x20f   : > { %v1202_v23 = vmax.f32 %v1067_v20, %v1138_v21 }
 0x211   : > { %6145 = vmatprep.mubr.msk.f32.mxu1 %vm1205_vm1, %v1202_v23 }
 0x212   : > { %6146 = vmatmul.mubr.msk.f32.gmra.mrb[32].mxu1 %vm1205_vm1, %v1203_v22 }
 0x24d   : > { %v6054_v24 = vpop.f32.mrb[64].mxu0 }
 0x24e   : > { %v1784_v25 = vmul.f32 0.2, %v6054_v24  ;;  %v1464_v26 = vpop.f32.mrb[65].mxu0 }
 0x24f   : > { %v1783_v27 = vmul.f32 0.2, %v1464_v26 }
 0x250   : > { %v1848_v29 = vmax.f32 %v6054_v24, %v1784_v25 }
 0x251   : > { %v1847_v28 = vmax.f32 %v1464_v26, %v1783_v27 }
 0x253   : > { %6150 = vmatprep.mubr.msk.f32.mxu1 %vm1205_vm1, %v1847_v28 }
 0x254   : > { %6151 = vmatmul.mubr.msk.f32.vlgmr.msra.gmra.mrb[34].mxu1 %vm1205_vm1, %v1848_v29 }
 0x255   : > { %v6057_v30 = vpop.f32.mrb[66].mxu0 }
 0x256   : > { %v1786_v31 = vmul.f32 0.2, %v6057_v30  ;;  %v1474_v32 = vpop.f32.mrb[67].mxu0 }
 0x257   : > { %v1785_v33 = vmul.f32 0.2, %v1474_v32 }
 0x258   : > { %v1850_v35 = vmax.f32 %v6057_v30, %v1786_v31 }
 0x259   : > { %v1849_v34 = vmax.f32 %v1474_v32, %v1785_v33 }
 0x25b   : > { %6153 = vmatprep.mubr.msk.f32.mxu1 %vm1205_vm1, %v1849_v34 }
 0x25c   : > { %6154 = vmatmul.mubr.msk.f32.gmra.mrb[36].mxu1 %vm1205_vm1, %v1850_v35 }
 0x25d   : > { %v6060_v36 = vpop.f32.mrb[68].mxu0 }
 0x25e   : > { %v1788_v37 = vmul.f32 0.2, %v6060_v36  ;;  %v1484_v38 = vpop.f32.mrb[69].mxu0 }
 0x25f   : > { %v1787_v39 = vmul.f32 0.2, %v1484_v38 }
 0x260   : > { %v1852_v41 = vmax.f32 %v6060_v36, %v1788_v37 }
 0x261   : > { %v1851_v40 = vmax.f32 %v1484_v38, %v1787_v39 }
 0x263   : > { %6156 = vmatprep.mubr.msk.f32.mxu1 %vm1205_vm1, %v1851_v40 }
 0x264   : > { %6157 = vmatmul.mubr.msk.f32.gmra.mrb[38].mxu1 %vm1205_vm1, %v1852_v41 }
 0x265   : > { %v6063_v42 = vpop.f32.mrb[70].mxu0 }
 0x266   : > { %v1790_v43 = vmul.f32 0.2, %v6063_v42  ;;  %v1494_v44 = vpop.f32.mrb[71].mxu0 }
 0x267   : > { %v1789_v45 = vmul.f32 0.2, %v1494_v44 }
 0x268   : > { %v1854_v47 = vmax.f32 %v6063_v42, %v1790_v43 }
 0x269   : > { %v1853_v46 = vmax.f32 %v1494_v44, %v1789_v45 }
 0x26b   : > { %6159 = vmatprep.mubr.msk.f32.mxu1 %vm1205_vm1, %v1853_v46 }
 0x26c   : > { %6160 = vmatmul.mubr.msk.f32.gmra.mrb[40].mxu1 %vm1205_vm1, %v1854_v47 }
 0x26d   : > { %v6066_v48 = vpop.f32.mrb[72].mxu0 }
 0x26e   : > { %v1792_v49 = vmul.f32 0.2, %v6066_v48  ;;  %v1504_v50 = vpop.f32.mrb[73].mxu0 }
 0x26f   : > { %v1791_v51 = vmul.f32 0.2, %v1504_v50 }
 0x270   : > { %v1856_v53 = vmax.f32 %v6066_v48, %v1792_v49 }
 0x271   : > { %v1855_v52 = vmax.f32 %v1504_v50, %v1791_v51 }
 0x273   : > { %6162 = vmatprep.mubr.msk.f32.mxu1 %vm1205_vm1, %v1855_v52 }
 0x274   : > { %6163 = vmatmul.mubr.msk.f32.gmra.mrb[42].mxu1 %vm1205_vm1, %v1856_v53 }
 0x275   : > { %v6069_v54 = vpop.f32.mrb[74].mxu0 }
 0x276   : > { %v1794_v55 = vmul.f32 0.2, %v6069_v54  ;;  %v1514_v56 = vpop.f32.mrb[75].mxu0 }
 0x277   : > { %v1793_v57 = vmul.f32 0.2, %v1514_v56 }
 0x278   : > { %v1858_v59 = vmax.f32 %v6069_v54, %v1794_v55 }
 0x279   : > { %v1857_v58 = vmax.f32 %v1514_v56, %v1793_v57 }
 0x27b   : > { %6165 = vmatprep.mubr.msk.f32.mxu1 %vm1205_vm1, %v1857_v58 }
 0x27c   : > { %6166 = vmatmul.mubr.msk.f32.gmra.mrb[44].mxu1 %vm1205_vm1, %v1858_v59 }
 0x27d   : > { %v6072_v60 = vpop.f32.mrb[76].mxu0 }
 0x27e   : > { %v1796_v61 = vmul.f32 0.2, %v6072_v60  ;;  %v1524_v62 = vpop.f32.mrb[77].mxu0 }
 0x27f   : > { %v1795_v63 = vmul.f32 0.2, %v1524_v62 }
 0x280   : > { %v1860_v1 = vmax.f32 %v6072_v60, %v1796_v61  ;;  %v2617_v60 = vld [vmem:[%s8002_s4] sm:$0xff] }
 0x281   : > { %v1859_v0 = vmax.f32 %v1524_v62, %v1795_v63  ;;  %6246 = vmatprep.subr.mxu0 %v2617_v60 }
 0x282   : > { %6247 = vmatpush3.msra.mxu0 %v2617_v60 }
 0x283   : > { %6168 = vmatprep.mubr.msk.f32.mxu1 %vm1205_vm1, %v1859_v0 }
 0x284   : > { %6169 = vmatmul.mubr.msk.f32.gmra.mrb[46].mxu1 %vm1205_vm1, %v1860_v1 }
 0x285   : > { %v6075_v2 = vpop.f32.mrb[78].mxu0 }
 0x286   : > { %v1798_v3 = vmul.f32 0.2, %v6075_v2  ;;  %v1534_v4 = vpop.f32.mrb[79].mxu0 }
 0x287   : > { %v1797_v5 = vmul.f32 0.2, %v1534_v4 }
 0x288   : > { %v1862_v8 = vmax.f32 %v6075_v2, %v1798_v3 }
 0x289   : > { %v1861_v6 = vmax.f32 %v1534_v4, %v1797_v5  ;;  %v6078_v7 = vpop.f32.mrb[80].mxu0 }
 0x28a   : > { %v1800_v9 = vmul.f32 0.2, %v6078_v7  ;;  %v1544_v10 = vpop.f32.mrb[81].mxu0 }
 0x28b   : > { %v1799_v11 = vmul.f32 0.2, %v1544_v10  ;;  %6171 = vmatprep.mubr.msk.f32.mxu1 %vm1205_vm1, %v1861_v6 }
 0x28c   : > { %6172 = vmatmul.mubr.msk.f32.gmra.mrb[48].mxu1 %vm1205_vm1, %v1862_v8  ;;  %v1864_v14 = vmax.f32 %v6078_v7, %v1800_v9 }
 0x28d   : > { %v1863_v12 = vmax.f32 %v1544_v10, %v1799_v11  ;;  %v6081_v13 = vpop.f32.mrb[82].mxu0 }
 0x28e   : > { %v1802_v15 = vmul.f32 0.2, %v6081_v13  ;;  %v1554_v16 = vpop.f32.mrb[83].mxu0 }
 0x28f   : > { %v1801_v17 = vmul.f32 0.2, %v1554_v16  ;;  %6174 = vmatprep.mubr.msk.f32.mxu1 %vm1205_vm1, %v1863_v12 }
 0x290   : > { %6175 = vmatmul.mubr.msk.f32.gmra.mrb[50].mxu1 %vm1205_vm1, %v1864_v14  ;;  %v1866_v20 = vmax.f32 %v6081_v13, %v1802_v15 }
 0x291   : > { %v1865_v18 = vmax.f32 %v1554_v16, %v1801_v17  ;;  %v6084_v19 = vpop.f32.mrb[84].mxu0 }
 0x292   : > { %v1804_v21 = vmul.f32 0.2, %v6084_v19  ;;  %v1564_v22 = vpop.f32.mrb[85].mxu0 }
 0x293   : > { %v1803_v23 = vmul.f32 0.2, %v1564_v22  ;;  %6177 = vmatprep.mubr.msk.f32.mxu1 %vm1205_vm1, %v1865_v18 }
 0x294   : > { %6178 = vmatmul.mubr.msk.f32.gmra.mrb[52].mxu1 %vm1205_vm1, %v1866_v20  ;;  %v1868_v26 = vmax.f32 %v6084_v19, %v1804_v21 }
 0x295   : > { %v1867_v24 = vmax.f32 %v1564_v22, %v1803_v23  ;;  %v6087_v25 = vpop.f32.mrb[86].mxu0 }
 0x296   : > { %v1806_v27 = vmul.f32 0.2, %v6087_v25  ;;  %v1574_v28 = vpop.f32.mrb[87].mxu0 }
 0x297   : > { %v1805_v29 = vmul.f32 0.2, %v1574_v28  ;;  %6180 = vmatprep.mubr.msk.f32.mxu1 %vm1205_vm1, %v1867_v24 }
 0x298   : > { %6181 = vmatmul.mubr.msk.f32.gmra.mrb[54].mxu1 %vm1205_vm1, %v1868_v26  ;;  %v1870_v32 = vmax.f32 %v6087_v25, %v1806_v27 }
 0x299   : > { %v1869_v30 = vmax.f32 %v1574_v28, %v1805_v29  ;;  %v6090_v31 = vpop.f32.mrb[88].mxu0 }
 0x29a   : > { %v1808_v33 = vmul.f32 0.2, %v6090_v31  ;;  %v1584_v34 = vpop.f32.mrb[89].mxu0 }
 0x29b   : > { %v1807_v35 = vmul.f32 0.2, %v1584_v34  ;;  %6183 = vmatprep.mubr.msk.f32.mxu1 %vm1205_vm1, %v1869_v30 }
 0x29c   : > { %6184 = vmatmul.mubr.msk.f32.gmra.mrb[56].mxu1 %vm1205_vm1, %v1870_v32  ;;  %v1872_v38 = vmax.f32 %v6090_v31, %v1808_v33 }
 0x29d   : > { %v1871_v36 = vmax.f32 %v1584_v34, %v1807_v35  ;;  %v6093_v37 = vpop.f32.mrb[90].mxu0 }
 0x29e   : > { %v1810_v39 = vmul.f32 0.2, %v6093_v37  ;;  %v1594_v40 = vpop.f32.mrb[91].mxu0 }
 0x29f   : > { %v1809_v41 = vmul.f32 0.2, %v1594_v40  ;;  %6186 = vmatprep.mubr.msk.f32.mxu1 %vm1205_vm1, %v1871_v36 }
 0x2a0   : > { %6187 = vmatmul.mubr.msk.f32.gmra.mrb[58].mxu1 %vm1205_vm1, %v1872_v38  ;;  %v1874_v44 = vmax.f32 %v6093_v37, %v1810_v39 }
 0x2a1   : > { %v1873_v42 = vmax.f32 %v1594_v40, %v1809_v41  ;;  %v6096_v43 = vpop.f32.mrb[92].mxu0 }
 0x2a2   : > { %v1812_v45 = vmul.f32 0.2, %v6096_v43  ;;  %v1604_v46 = vpop.f32.mrb[93].mxu0 }
 0x2a3   : > { %v1811_v47 = vmul.f32 0.2, %v1604_v46  ;;  %6189 = vmatprep.mubr.msk.f32.mxu1 %vm1205_vm1, %v1873_v42 }
 0x2a4   : > { %6190 = vmatmul.mubr.msk.f32.gmra.mrb[60].mxu1 %vm1205_vm1, %v1874_v44  ;;  %v1876_v50 = vmax.f32 %v6096_v43, %v1812_v45 }
 0x2a5   : > { %v1875_v48 = vmax.f32 %v1604_v46, %v1811_v47  ;;  %v6099_v49 = vpop.f32.mrb[0].mxu1 }
 0x2a6   : > { %v1814_v51 = vmul.f32 0.2, %v6099_v49  ;;  %v1614_v52 = vpop.f32.mrb[1].mxu1 }
 0x2a7   : > { %v1813_v53 = vmul.f32 0.2, %v1614_v52  ;;  %6192 = vmatprep.mubr.msk.f32.mxu1 %vm1205_vm1, %v1875_v48 }
 0x2a8   : > { %6193 = vmatmul.mubr.msk.f32.gmra.mrb[62].mxu1 %vm1205_vm1, %v1876_v50  ;;  %v1878_v56 = vmax.f32 %v6099_v49, %v1814_v51 }
 0x2a9   : > { %v1877_v54 = vmax.f32 %v1614_v52, %v1813_v53  ;;  %v6102_v55 = vpop.f32.mrb[2].mxu1 }
 0x2aa   : > { %v1816_v57 = vmul.f32 0.2, %v6102_v55  ;;  %v1624_v58 = vpop.f32.mrb[3].mxu1 }
 0x2ab   : > { %v1815_v59 = vmul.f32 0.2, %v1624_v58  ;;  %6195 = vmatprep.mubr.msk.f32.mxu1 %vm1205_vm1, %v1877_v54 }
 0x2ac   : > { %6196 = vmatmul.mubr.msk.f32.gmra.mrb[64].mxu1 %vm1205_vm1, %v1878_v56  ;;  %v1880_v63 = vmax.f32 %v6102_v55, %v1816_v57 }
 0x2ad   : > { %v1879_v61 = vmax.f32 %v1624_v58, %v1815_v59  ;;  %v6105_v62 = vpop.f32.mrb[4].mxu1 }
 0x2ae   : > { %v1818_v0 = vmul.f32 0.2, %v6105_v62  ;;  %v1634_v1 = vpop.f32.mrb[5].mxu1 }
 0x2af   : > { %v1817_v2 = vmul.f32 0.2, %v1634_v1  ;;  %6198 = vmatprep.mubr.msk.f32.mxu1 %vm1205_vm1, %v1879_v61 }
 0x2b0   : > { %6199 = vmatmul.mubr.msk.f32.gmra.mrb[66].mxu1 %vm1205_vm1, %v1880_v63  ;;  %v1882_v5 = vmax.f32 %v6105_v62, %v1818_v0 }
 0x2b1   : > { %v1881_v3 = vmax.f32 %v1634_v1, %v1817_v2  ;;  %v6108_v4 = vpop.f32.mrb[6].mxu1 }
 0x2b2   : > { %v1820_v6 = vmul.f32 0.2, %v6108_v4  ;;  %v1644_v7 = vpop.f32.mrb[7].mxu1 }
 0x2b3   : > { %v1819_v8 = vmul.f32 0.2, %v1644_v7  ;;  %6201 = vmatprep.mubr.msk.f32.mxu1 %vm1205_vm1, %v1881_v3 }
 0x2b4   : > { %6202 = vmatmul.mubr.msk.f32.gmra.mrb[68].mxu1 %vm1205_vm1, %v1882_v5  ;;  %v1884_v11 = vmax.f32 %v6108_v4, %v1820_v6 }
 0x2b5   : > { %v1883_v9 = vmax.f32 %v1644_v7, %v1819_v8  ;;  %v6111_v10 = vpop.f32.mrb[8].mxu1 }
 0x2b6   : > { %v1822_v12 = vmul.f32 0.2, %v6111_v10  ;;  %v1654_v13 = vpop.f32.mrb[9].mxu1 }
 0x2b7   : > { %v1821_v14 = vmul.f32 0.2, %v1654_v13  ;;  %6204 = vmatprep.mubr.msk.f32.mxu1 %vm1205_vm1, %v1883_v9 }
 0x2b8   : > { %6205 = vmatmul.mubr.msk.f32.gmra.mrb[70].mxu1 %vm1205_vm1, %v1884_v11  ;;  %v1886_v17 = vmax.f32 %v6111_v10, %v1822_v12 }
 0x2b9   : > { %v1885_v15 = vmax.f32 %v1654_v13, %v1821_v14  ;;  %v6114_v16 = vpop.f32.mrb[10].mxu1 }
 0x2ba   : > { %v1824_v18 = vmul.f32 0.2, %v6114_v16  ;;  %v1664_v19 = vpop.f32.mrb[11].mxu1 }
 0x2bb   : > { %v1823_v20 = vmul.f32 0.2, %v1664_v19  ;;  %6207 = vmatprep.mubr.msk.f32.mxu1 %vm1205_vm1, %v1885_v15 }
 0x2bc   : > { %6208 = vmatmul.mubr.msk.f32.gmra.mrb[72].mxu1 %vm1205_vm1, %v1886_v17  ;;  %v1888_v23 = vmax.f32 %v6114_v16, %v1824_v18 }
 0x2bd   : > { %v1887_v21 = vmax.f32 %v1664_v19, %v1823_v20  ;;  %v6117_v22 = vpop.f32.mrb[12].mxu1 }
 0x2be   : > { %v1826_v24 = vmul.f32 0.2, %v6117_v22  ;;  %v1674_v25 = vpop.f32.mrb[13].mxu1 }
 0x2bf   : > { %v1825_v26 = vmul.f32 0.2, %v1674_v25  ;;  %6210 = vmatprep.mubr.msk.f32.mxu1 %vm1205_vm1, %v1887_v21 }
 0x2c0   : > { %6211 = vmatmul.mubr.msk.f32.gmra.mrb[74].mxu1 %vm1205_vm1, %v1888_v23  ;;  %v1890_v29 = vmax.f32 %v6117_v22, %v1826_v24 }
 0x2c1   : > { %v1889_v27 = vmax.f32 %v1674_v25, %v1825_v26  ;;  %v6120_v28 = vpop.f32.mrb[14].mxu1 }
 0x2c2   : > { %v1828_v30 = vmul.f32 0.2, %v6120_v28  ;;  %v1684_v31 = vpop.f32.mrb[15].mxu1 }
 0x2c3   : > { %v1827_v32 = vmul.f32 0.2, %v1684_v31  ;;  %6213 = vmatprep.mubr.msk.f32.mxu1 %vm1205_vm1, %v1889_v27 }
 0x2c4   : > { %6214 = vmatmul.mubr.msk.f32.gmra.mrb[76].mxu1 %vm1205_vm1, %v1890_v29  ;;  %v1892_v35 = vmax.f32 %v6120_v28, %v1828_v30 }
 0x2c5   : > { %v1891_v33 = vmax.f32 %v1684_v31, %v1827_v32  ;;  %v6123_v34 = vpop.f32.mrb[16].mxu1 }
 0x2c6   : > { %v1830_v36 = vmul.f32 0.2, %v6123_v34  ;;  %v1694_v37 = vpop.f32.mrb[17].mxu1 }
 0x2c7   : > { %v1829_v38 = vmul.f32 0.2, %v1694_v37  ;;  %6216 = vmatprep.mubr.msk.f32.mxu1 %vm1205_vm1, %v1891_v33 }
 0x2c8   : > { %6217 = vmatmul.mubr.msk.f32.gmra.mrb[78].mxu1 %vm1205_vm1, %v1892_v35  ;;  %v1894_v41 = vmax.f32 %v6123_v34, %v1830_v36 }
 0x2c9   : > { %v1893_v39 = vmax.f32 %v1694_v37, %v1829_v38  ;;  %v6126_v40 = vpop.f32.mrb[18].mxu1 }
 0x2ca   : > { %v1832_v42 = vmul.f32 0.2, %v6126_v40  ;;  %v1704_v43 = vpop.f32.mrb[19].mxu1 }
 0x2cb   : > { %v1831_v44 = vmul.f32 0.2, %v1704_v43  ;;  %6219 = vmatprep.mubr.msk.f32.mxu1 %vm1205_vm1, %v1893_v39 }
 0x2cc   : > { %6220 = vmatmul.mubr.msk.f32.gmra.mrb[80].mxu1 %vm1205_vm1, %v1894_v41  ;;  %v1896_v47 = vmax.f32 %v6126_v40, %v1832_v42 }
 0x2cd   : > { %v1895_v45 = vmax.f32 %v1704_v43, %v1831_v44  ;;  %v6129_v46 = vpop.f32.mrb[20].mxu1 }
 0x2ce   : > { %v1834_v48 = vmul.f32 0.2, %v6129_v46  ;;  %v1714_v49 = vpop.f32.mrb[21].mxu1 }
 0x2cf   : > { %v1833_v50 = vmul.f32 0.2, %v1714_v49  ;;  %6222 = vmatprep.mubr.msk.f32.mxu1 %vm1205_vm1, %v1895_v45 }
 0x2d0   : > { %6223 = vmatmul.mubr.msk.f32.gmra.mrb[82].mxu1 %vm1205_vm1, %v1896_v47  ;;  %v1898_v53 = vmax.f32 %v6129_v46, %v1834_v48 }
 0x2d1   : > { %v1897_v51 = vmax.f32 %v1714_v49, %v1833_v50  ;;  %v6132_v52 = vpop.f32.mrb[22].mxu1 }
 0x2d2   : > { %v1836_v54 = vmul.f32 0.2, %v6132_v52  ;;  %v1724_v55 = vpop.f32.mrb[23].mxu1 }
 0x2d3   : > { %v1835_v56 = vmul.f32 0.2, %v1724_v55  ;;  %6225 = vmatprep.mubr.msk.f32.mxu1 %vm1205_vm1, %v1897_v51 }
 0x2d4   : > { %v1900_v57 = vmax.f32 %v6132_v52, %v1836_v54  ;;  %6226 = vmatmul.mubr.msk.f32.gmra.mrb[84].mxu1 %vm1205_vm1, %v1898_v53 }
 0x2d5   : > { %v1899_v58 = vmax.f32 %v1724_v55, %v1835_v56  ;;  %v6135_v59 = vpop.f32.mrb[24].mxu1 }
 0x2d6   : > { %v1838_v60 = vmul.f32 0.2, %v6135_v59  ;;  %v1734_v61 = vpop.f32.mrb[25].mxu1 }
 0x2d7   : > { %v1837_v62 = vmul.f32 0.2, %v1734_v61  ;;  %6228 = vmatprep.mubr.msk.f32.mxu1 %vm1205_vm1, %v1899_v58 }
 0x2d8   : > { %v1902_v63 = vmax.f32 %v6135_v59, %v1838_v60  ;;  %6229 = vmatmul.mubr.msk.f32.gmra.mrb[86].mxu1 %vm1205_vm1, %v1900_v57 }
 0x2d9   : > { %v1901_v0 = vmax.f32 %v1734_v61, %v1837_v62  ;;  %v6138_v1 = vpop.f32.mrb[26].mxu1 }
 0x2da   : > { %v1840_v2 = vmul.f32 0.2, %v6138_v1  ;;  %v1744_v3 = vpop.f32.mrb[27].mxu1 }
 0x2db   : > { %v1839_v4 = vmul.f32 0.2, %v1744_v3  ;;  %6231 = vmatprep.mubr.msk.f32.mxu1 %vm1205_vm1, %v1901_v0 }
 0x2dc   : > { %v1904_v5 = vmax.f32 %v6138_v1, %v1840_v2  ;;  %6232 = vmatmul.mubr.msk.f32.gmra.mrb[88].mxu1 %vm1205_vm1, %v1902_v63 }
 0x2dd   : > { %v1903_v6 = vmax.f32 %v1744_v3, %v1839_v4  ;;  %v6141_v7 = vpop.f32.mrb[28].mxu1 }
 0x2de   : > { %v1842_v8 = vmul.f32 0.2, %v6141_v7  ;;  %v1754_v9 = vpop.f32.mrb[29].mxu1 }
 0x2df   : > { %6234 = vmatprep.mubr.msk.f32.mxu1 %vm1205_vm1, %v1903_v6  ;;  %v1841_v10 = vmul.f32 0.2, %v1754_v9 }
 0x2e0   : > { %v1906_v11 = vmax.f32 %v6141_v7, %v1842_v8  ;;  %6235 = vmatmul.mubr.msk.f32.gmra.mrb[90].mxu1 %vm1205_vm1, %v1904_v5 }
 0x2e1   : > { %v1905_v12 = vmax.f32 %v1754_v9, %v1841_v10  ;;  %v6144_v13 = vpop.f32.mrb[30].mxu1 }
 0x2e2   : > { %v1844_v14 = vmul.f32 0.2, %v6144_v13  ;;  %v1764_v15 = vpop.f32.mrb[31].mxu1 }
 0x2e3   : > { %6237 = vmatprep.mubr.msk.f32.mxu1 %vm1205_vm1, %v1905_v12  ;;  %v1843_v16 = vmul.f32 0.2, %v1764_v15 }
 0x2e4   : > { %6238 = vmatmul.mubr.msk.f32.gmra.mrb[92].mxu1 %vm1205_vm1, %v1906_v11  ;;  %v1908_v17 = vmax.f32 %v6144_v13, %v1844_v14 }
 0x2e5   : > { %v1907_v18 = vmax.f32 %v1764_v15, %v1843_v16  ;;  %v6147_v19 = vpop.f32.mrb[32].mxu1 }
 0x2e6   : > { %v1846_v20 = vmul.f32 0.2, %v6147_v19  ;;  %v1774_v21 = vpop.f32.mrb[33].mxu1 }
 0x2e7   : > { %6240 = vmatprep.mubr.msk.f32.mxu1 %vm1205_vm1, %v1907_v18  ;;  %v1845_v22 = vmul.f32 0.2, %v1774_v21 }
 0x2e8   : > { %6241 = vmatmul.mubr.msk.f32.gmra.mrb[94].mxu1 %vm1205_vm1, %v1908_v17  ;;  %v1910_v23 = vmax.f32 %v6147_v19, %v1846_v20 }
 0x2e9   : > { %v1909_v24 = vmax.f32 %v1774_v21, %v1845_v22 }
 0x2eb   : > { %6243 = vmatprep.mubr.msk.f32.mxu1 %vm1205_vm1, %v1909_v24 }
 0x2ec   : > { %6244 = vmatmul.mubr.msk.f32.gmra.mrb[96].mxu1 %vm1205_vm1, %v1910_v23 }
 0x327   : > { %v6152_v25 = vpop.f32.mrb[34].mxu1 }
 0x328   : > { %v2490_v26 = vmul.f32 0.2, %v6152_v25  ;;  %v2170_v27 = vpop.f32.mrb[35].mxu1 }
 0x329   : > { %v2489_v28 = vmul.f32 0.2, %v2170_v27 }
 0x32a   : > { %v2554_v30 = vmax.f32 %v6152_v25, %v2490_v26 }
 0x32b   : > { %v2553_v29 = vmax.f32 %v2170_v27, %v2489_v28 }
 0x32d   : > { %6248 = vmatprep.mubr.msk.f32.mxu0 %vm1205_vm1, %v2553_v29 }
 0x32e   : > { %6249 = vmatmul.mubr.msk.f32.vlgmr.msra.gmra.mrb[94].mxu0 %vm1205_vm1, %v2554_v30 }
 0x32f   : > { %v6155_v31 = vpop.f32.mrb[36].mxu1 }
 0x330   : > { %v2492_v32 = vmul.f32 0.2, %v6155_v31  ;;  %v2180_v33 = vpop.f32.mrb[37].mxu1 }
 0x331   : > { %v2491_v34 = vmul.f32 0.2, %v2180_v33 }
 0x332   : > { %v2556_v36 = vmax.f32 %v6155_v31, %v2492_v32 }
 0x333   : > { %v2555_v35 = vmax.f32 %v2180_v33, %v2491_v34 }
 0x335   : > { %6251 = vmatprep.mubr.msk.f32.mxu0 %vm1205_vm1, %v2555_v35 }
 0x336   : > { %6252 = vmatmul.mubr.msk.f32.gmra.mrb[96].mxu0 %vm1205_vm1, %v2556_v36 }
 0x337   : > { %v6158_v37 = vpop.f32.mrb[38].mxu1 }
 0x338   : > { %v2494_v38 = vmul.f32 0.2, %v6158_v37  ;;  %v2190_v39 = vpop.f32.mrb[39].mxu1 }
 0x339   : > { %v2493_v40 = vmul.f32 0.2, %v2190_v39 }
 0x33a   : > { %v2558_v42 = vmax.f32 %v6158_v37, %v2494_v38 }
 0x33b   : > { %v2557_v41 = vmax.f32 %v2190_v39, %v2493_v40 }
 0x33d   : > { %6254 = vmatprep.mubr.msk.f32.mxu0 %vm1205_vm1, %v2557_v41 }
 0x33e   : > { %6255 = vmatmul.mubr.msk.f32.gmra.mrb[98].mxu0 %vm1205_vm1, %v2558_v42 }
 0x33f   : > { %v6161_v43 = vpop.f32.mrb[40].mxu1 }
 0x340   : > { %v2496_v44 = vmul.f32 0.2, %v6161_v43  ;;  %v2200_v45 = vpop.f32.mrb[41].mxu1 }
 0x341   : > { %v2495_v46 = vmul.f32 0.2, %v2200_v45 }
 0x342   : > { %v2560_v48 = vmax.f32 %v6161_v43, %v2496_v44 }
 0x343   : > { %v2559_v47 = vmax.f32 %v2200_v45, %v2495_v46 }
 0x345   : > { %6257 = vmatprep.mubr.msk.f32.mxu0 %vm1205_vm1, %v2559_v47 }
 0x346   : > { %6258 = vmatmul.mubr.msk.f32.gmra.mrb[100].mxu0 %vm1205_vm1, %v2560_v48 }
 0x347   : > { %v6164_v49 = vpop.f32.mrb[42].mxu1 }
 0x348   : > { %v2498_v50 = vmul.f32 0.2, %v6164_v49  ;;  %v2210_v51 = vpop.f32.mrb[43].mxu1 }
 0x349   : > { %v2497_v52 = vmul.f32 0.2, %v2210_v51 }
 0x34a   : > { %v2562_v54 = vmax.f32 %v6164_v49, %v2498_v50 }
 0x34b   : > { %v2561_v53 = vmax.f32 %v2210_v51, %v2497_v52 }
 0x34d   : > { %6260 = vmatprep.mubr.msk.f32.mxu0 %vm1205_vm1, %v2561_v53 }
 0x34e   : > { %6261 = vmatmul.mubr.msk.f32.gmra.mrb[102].mxu0 %vm1205_vm1, %v2562_v54 }
 0x34f   : > { %v6167_v55 = vpop.f32.mrb[44].mxu1 }
 0x350   : > { %v2500_v56 = vmul.f32 0.2, %v6167_v55  ;;  %v2220_v57 = vpop.f32.mrb[45].mxu1 }
 0x351   : > { %v2499_v58 = vmul.f32 0.2, %v2220_v57 }
 0x352   : > { %v2564_v60 = vmax.f32 %v6167_v55, %v2500_v56 }
 0x353   : > { %v2563_v59 = vmax.f32 %v2220_v57, %v2499_v58 }
 0x355   : > { %6263 = vmatprep.mubr.msk.f32.mxu0 %vm1205_vm1, %v2563_v59 }
 0x356   : > { %6264 = vmatmul.mubr.msk.f32.gmra.mrb[104].mxu0 %vm1205_vm1, %v2564_v60 }
 0x357   : > { %v6170_v61 = vpop.f32.mrb[46].mxu1 }
 0x358   : > { %v2502_v62 = vmul.f32 0.2, %v6170_v61  ;;  %v2230_v63 = vpop.f32.mrb[47].mxu1 }
 0x359   : > { %v2501_v0 = vmul.f32 0.2, %v2230_v63 }
 0x35a   : > { %v2566_v2 = vmax.f32 %v6170_v61, %v2502_v62  ;;  %v3323_v61 = vld [vmem:[%s8003_s5] sm:$0xff] }
 0x35b   : > { %v2565_v1 = vmax.f32 %v2230_v63, %v2501_v0  ;;  %6344 = vmatprep.subr.mxu1 %v3323_v61 }
 0x35c   : > { %6345 = vmatpush3.msra.mxu1 %v3323_v61 }
 0x35d   : > { %6266 = vmatprep.mubr.msk.f32.mxu0 %vm1205_vm1, %v2565_v1 }
 0x35e   : > { %6267 = vmatmul.mubr.msk.f32.gmra.mrb[106].mxu0 %vm1205_vm1, %v2566_v2 }
 0x35f   : > { %v6173_v3 = vpop.f32.mrb[48].mxu1 }
 0x360   : > { %v2504_v4 = vmul.f32 0.2, %v6173_v3  ;;  %v2240_v5 = vpop.f32.mrb[49].mxu1 }
 0x361   : > { %v2503_v6 = vmul.f32 0.2, %v2240_v5 }
 0x362   : > { %v2568_v9 = vmax.f32 %v6173_v3, %v2504_v4 }
 0x363   : > { %v2567_v7 = vmax.f32 %v2240_v5, %v2503_v6  ;;  %v6176_v8 = vpop.f32.mrb[50].mxu1 }
 0x364   : > { %v2506_v10 = vmul.f32 0.2, %v6176_v8  ;;  %v2250_v11 = vpop.f32.mrb[51].mxu1 }
 0x365   : > { %v2505_v12 = vmul.f32 0.2, %v2250_v11  ;;  %6269 = vmatprep.mubr.msk.f32.mxu0 %vm1205_vm1, %v2567_v7 }
 0x366   : > { %6270 = vmatmul.mubr.msk.f32.gmra.mrb[108].mxu0 %vm1205_vm1, %v2568_v9  ;;  %v2570_v15 = vmax.f32 %v6176_v8, %v2506_v10 }
 0x367   : > { %v2569_v13 = vmax.f32 %v2250_v11, %v2505_v12  ;;  %v6179_v14 = vpop.f32.mrb[52].mxu1 }
 0x368   : > { %v2508_v16 = vmul.f32 0.2, %v6179_v14  ;;  %v2260_v17 = vpop.f32.mrb[53].mxu1 }
 0x369   : > { %v2507_v18 = vmul.f32 0.2, %v2260_v17  ;;  %6272 = vmatprep.mubr.msk.f32.mxu0 %vm1205_vm1, %v2569_v13 }
 0x36a   : > { %6273 = vmatmul.mubr.msk.f32.gmra.mrb[110].mxu0 %vm1205_vm1, %v2570_v15  ;;  %v2572_v21 = vmax.f32 %v6179_v14, %v2508_v16 }
 0x36b   : > { %v2571_v19 = vmax.f32 %v2260_v17, %v2507_v18  ;;  %v6182_v20 = vpop.f32.mrb[54].mxu1 }
 0x36c   : > { %v2510_v22 = vmul.f32 0.2, %v6182_v20  ;;  %v2270_v23 = vpop.f32.mrb[55].mxu1 }
 0x36d   : > { %v2509_v24 = vmul.f32 0.2, %v2270_v23  ;;  %6275 = vmatprep.mubr.msk.f32.mxu0 %vm1205_vm1, %v2571_v19 }
 0x36e   : > { %6276 = vmatmul.mubr.msk.f32.gmra.mrb[112].mxu0 %vm1205_vm1, %v2572_v21  ;;  %v2574_v27 = vmax.f32 %v6182_v20, %v2510_v22 }
 0x36f   : > { %v2573_v25 = vmax.f32 %v2270_v23, %v2509_v24  ;;  %v6185_v26 = vpop.f32.mrb[56].mxu1 }
 0x370   : > { %v2512_v28 = vmul.f32 0.2, %v6185_v26  ;;  %v2280_v29 = vpop.f32.mrb[57].mxu1 }
 0x371   : > { %v2511_v30 = vmul.f32 0.2, %v2280_v29  ;;  %6278 = vmatprep.mubr.msk.f32.mxu0 %vm1205_vm1, %v2573_v25 }
 0x372   : > { %6279 = vmatmul.mubr.msk.f32.gmra.mrb[114].mxu0 %vm1205_vm1, %v2574_v27  ;;  %v2576_v33 = vmax.f32 %v6185_v26, %v2512_v28 }
 0x373   : > { %v2575_v31 = vmax.f32 %v2280_v29, %v2511_v30  ;;  %v6188_v32 = vpop.f32.mrb[58].mxu1 }
 0x374   : > { %v2514_v34 = vmul.f32 0.2, %v6188_v32  ;;  %v2290_v35 = vpop.f32.mrb[59].mxu1 }
 0x375   : > { %v2513_v36 = vmul.f32 0.2, %v2290_v35  ;;  %6281 = vmatprep.mubr.msk.f32.mxu0 %vm1205_vm1, %v2575_v31 }
 0x376   : > { %6282 = vmatmul.mubr.msk.f32.gmra.mrb[116].mxu0 %vm1205_vm1, %v2576_v33  ;;  %v2578_v39 = vmax.f32 %v6188_v32, %v2514_v34 }
 0x377   : > { %v2577_v37 = vmax.f32 %v2290_v35, %v2513_v36  ;;  %v6191_v38 = vpop.f32.mrb[60].mxu1 }
 0x378   : > { %v2516_v40 = vmul.f32 0.2, %v6191_v38  ;;  %v2300_v41 = vpop.f32.mrb[61].mxu1 }
 0x379   : > { %v2515_v42 = vmul.f32 0.2, %v2300_v41  ;;  %6284 = vmatprep.mubr.msk.f32.mxu0 %vm1205_vm1, %v2577_v37 }
 0x37a   : > { %6285 = vmatmul.mubr.msk.f32.gmra.mrb[118].mxu0 %vm1205_vm1, %v2578_v39  ;;  %v2580_v45 = vmax.f32 %v6191_v38, %v2516_v40 }
 0x37b   : > { %v2579_v43 = vmax.f32 %v2300_v41, %v2515_v42  ;;  %v6194_v44 = vpop.f32.mrb[62].mxu1 }
 0x37c   : > { %v2518_v46 = vmul.f32 0.2, %v6194_v44  ;;  %v2310_v47 = vpop.f32.mrb[63].mxu1 }
 0x37d   : > { %v2517_v48 = vmul.f32 0.2, %v2310_v47  ;;  %6287 = vmatprep.mubr.msk.f32.mxu0 %vm1205_vm1, %v2579_v43 }
 0x37e   : > { %6288 = vmatmul.mubr.msk.f32.gmra.mrb[120].mxu0 %vm1205_vm1, %v2580_v45  ;;  %v2582_v51 = vmax.f32 %v6194_v44, %v2518_v46 }
 0x37f   : > { %v2581_v49 = vmax.f32 %v2310_v47, %v2517_v48  ;;  %v6197_v50 = vpop.f32.mrb[64].mxu1 }
 0x380   : > { %v2520_v52 = vmul.f32 0.2, %v6197_v50  ;;  %v2320_v53 = vpop.f32.mrb[65].mxu1 }
 0x381   : > { %v2519_v54 = vmul.f32 0.2, %v2320_v53  ;;  %6290 = vmatprep.mubr.msk.f32.mxu0 %vm1205_vm1, %v2581_v49 }
 0x382   : > { %6291 = vmatmul.mubr.msk.f32.gmra.mrb[122].mxu0 %vm1205_vm1, %v2582_v51  ;;  %v2584_v57 = vmax.f32 %v6197_v50, %v2520_v52 }
 0x383   : > { %v2583_v55 = vmax.f32 %v2320_v53, %v2519_v54  ;;  %v6200_v56 = vpop.f32.mrb[66].mxu1 }
 0x384   : > { %v2522_v58 = vmul.f32 0.2, %v6200_v56  ;;  %v2330_v59 = vpop.f32.mrb[67].mxu1 }
 0x385   : > { %v2521_v60 = vmul.f32 0.2, %v2330_v59  ;;  %6293 = vmatprep.mubr.msk.f32.mxu0 %vm1205_vm1, %v2583_v55 }
 0x386   : > { %6294 = vmatmul.mubr.msk.f32.gmra.mrb[124].mxu0 %vm1205_vm1, %v2584_v57  ;;  %v2586_v0 = vmax.f32 %v6200_v56, %v2522_v58 }
 0x387   : > { %v2585_v62 = vmax.f32 %v2330_v59, %v2521_v60  ;;  %v6203_v63 = vpop.f32.mrb[68].mxu1 }
 0x388   : > { %v2524_v1 = vmul.f32 0.2, %v6203_v63  ;;  %v2340_v2 = vpop.f32.mrb[69].mxu1 }
 0x389   : > { %v2523_v3 = vmul.f32 0.2, %v2340_v2  ;;  %6296 = vmatprep.mubr.msk.f32.mxu0 %vm1205_vm1, %v2585_v62 }
 0x38a   : > { %6297 = vmatmul.mubr.msk.f32.gmra.mrb[126].mxu0 %vm1205_vm1, %v2586_v0  ;;  %v2588_v6 = vmax.f32 %v6203_v63, %v2524_v1 }
 0x38b   : > { %v2587_v4 = vmax.f32 %v2340_v2, %v2523_v3  ;;  %v6206_v5 = vpop.f32.mrb[70].mxu1 }
 0x38c   : > { %v2526_v7 = vmul.f32 0.2, %v6206_v5  ;;  %v2350_v8 = vpop.f32.mrb[71].mxu1 }
 0x38d   : > { %v2525_v9 = vmul.f32 0.2, %v2350_v8  ;;  %6299 = vmatprep.mubr.msk.f32.mxu0 %vm1205_vm1, %v2587_v4 }
 0x38e   : > { %6300 = vmatmul.mubr.msk.f32.gmra.mrb[128].mxu0 %vm1205_vm1, %v2588_v6  ;;  %v2590_v12 = vmax.f32 %v6206_v5, %v2526_v7 }
 0x38f   : > { %v2589_v10 = vmax.f32 %v2350_v8, %v2525_v9  ;;  %v6209_v11 = vpop.f32.mrb[72].mxu1 }
 0x390   : > { %v2528_v13 = vmul.f32 0.2, %v6209_v11  ;;  %v2360_v14 = vpop.f32.mrb[73].mxu1 }
 0x391   : > { %v2527_v15 = vmul.f32 0.2, %v2360_v14  ;;  %6302 = vmatprep.mubr.msk.f32.mxu0 %vm1205_vm1, %v2589_v10 }
 0x392   : > { %6303 = vmatmul.mubr.msk.f32.gmra.mrb[130].mxu0 %vm1205_vm1, %v2590_v12  ;;  %v2592_v18 = vmax.f32 %v6209_v11, %v2528_v13 }
 0x393   : > { %v2591_v16 = vmax.f32 %v2360_v14, %v2527_v15  ;;  %v6212_v17 = vpop.f32.mrb[74].mxu1 }
 0x394   : > { %v2530_v19 = vmul.f32 0.2, %v6212_v17  ;;  %v2370_v20 = vpop.f32.mrb[75].mxu1 }
 0x395   : > { %v2529_v21 = vmul.f32 0.2, %v2370_v20  ;;  %6305 = vmatprep.mubr.msk.f32.mxu0 %vm1205_vm1, %v2591_v16 }
 0x396   : > { %6306 = vmatmul.mubr.msk.f32.gmra.mrb[132].mxu0 %vm1205_vm1, %v2592_v18  ;;  %v2594_v24 = vmax.f32 %v6212_v17, %v2530_v19 }
 0x397   : > { %v2593_v22 = vmax.f32 %v2370_v20, %v2529_v21  ;;  %v6215_v23 = vpop.f32.mrb[76].mxu1 }
 0x398   : > { %v2532_v25 = vmul.f32 0.2, %v6215_v23  ;;  %v2380_v26 = vpop.f32.mrb[77].mxu1 }
 0x399   : > { %v2531_v27 = vmul.f32 0.2, %v2380_v26  ;;  %6308 = vmatprep.mubr.msk.f32.mxu0 %vm1205_vm1, %v2593_v22 }
 0x39a   : > { %6309 = vmatmul.mubr.msk.f32.gmra.mrb[134].mxu0 %vm1205_vm1, %v2594_v24  ;;  %v2596_v30 = vmax.f32 %v6215_v23, %v2532_v25 }
 0x39b   : > { %v2595_v28 = vmax.f32 %v2380_v26, %v2531_v27  ;;  %v6218_v29 = vpop.f32.mrb[78].mxu1 }
 0x39c   : > { %v2534_v31 = vmul.f32 0.2, %v6218_v29  ;;  %v2390_v32 = vpop.f32.mrb[79].mxu1 }
 0x39d   : > { %v2533_v33 = vmul.f32 0.2, %v2390_v32  ;;  %6311 = vmatprep.mubr.msk.f32.mxu0 %vm1205_vm1, %v2595_v28 }
 0x39e   : > { %6312 = vmatmul.mubr.msk.f32.gmra.mrb[136].mxu0 %vm1205_vm1, %v2596_v30  ;;  %v2598_v36 = vmax.f32 %v6218_v29, %v2534_v31 }
 0x39f   : > { %v2597_v34 = vmax.f32 %v2390_v32, %v2533_v33  ;;  %v6221_v35 = vpop.f32.mrb[80].mxu1 }
 0x3a0   : > { %v2536_v37 = vmul.f32 0.2, %v6221_v35  ;;  %v2400_v38 = vpop.f32.mrb[81].mxu1 }
 0x3a1   : > { %v2535_v39 = vmul.f32 0.2, %v2400_v38  ;;  %6314 = vmatprep.mubr.msk.f32.mxu0 %vm1205_vm1, %v2597_v34 }
 0x3a2   : > { %6315 = vmatmul.mubr.msk.f32.gmra.mrb[138].mxu0 %vm1205_vm1, %v2598_v36  ;;  %v2600_v42 = vmax.f32 %v6221_v35, %v2536_v37 }
 0x3a3   : > { %v2599_v40 = vmax.f32 %v2400_v38, %v2535_v39  ;;  %v6224_v41 = vpop.f32.mrb[82].mxu1 }
 0x3a4   : > { %v2538_v43 = vmul.f32 0.2, %v6224_v41  ;;  %v2410_v44 = vpop.f32.mrb[83].mxu1 }
 0x3a5   : > { %v2537_v45 = vmul.f32 0.2, %v2410_v44  ;;  %6317 = vmatprep.mubr.msk.f32.mxu0 %vm1205_vm1, %v2599_v40 }
 0x3a6   : > { %6318 = vmatmul.mubr.msk.f32.gmra.mrb[140].mxu0 %vm1205_vm1, %v2600_v42  ;;  %v2602_v48 = vmax.f32 %v6224_v41, %v2538_v43 }
 0x3a7   : > { %v2601_v46 = vmax.f32 %v2410_v44, %v2537_v45  ;;  %v6227_v47 = vpop.f32.mrb[84].mxu1 }
 0x3a8   : > { %v2540_v49 = vmul.f32 0.2, %v6227_v47  ;;  %v2420_v50 = vpop.f32.mrb[85].mxu1 }
 0x3a9   : > { %v2539_v51 = vmul.f32 0.2, %v2420_v50  ;;  %6320 = vmatprep.mubr.msk.f32.mxu0 %vm1205_vm1, %v2601_v46 }
 0x3aa   : > { %6321 = vmatmul.mubr.msk.f32.gmra.mrb[142].mxu0 %vm1205_vm1, %v2602_v48  ;;  %v2604_v54 = vmax.f32 %v6227_v47, %v2540_v49 }
 0x3ab   : > { %v2603_v52 = vmax.f32 %v2420_v50, %v2539_v51  ;;  %v6230_v53 = vpop.f32.mrb[86].mxu1 }
 0x3ac   : > { %v2542_v55 = vmul.f32 0.2, %v6230_v53  ;;  %v2430_v56 = vpop.f32.mrb[87].mxu1 }
 0x3ad   : > { %v2541_v57 = vmul.f32 0.2, %v2430_v56  ;;  %6323 = vmatprep.mubr.msk.f32.mxu0 %vm1205_vm1, %v2603_v52 }
 0x3ae   : > { %6324 = vmatmul.mubr.msk.f32.gmra.mrb[144].mxu0 %vm1205_vm1, %v2604_v54  ;;  %v2606_v60 = vmax.f32 %v6230_v53, %v2542_v55 }
 0x3af   : > { %v2605_v58 = vmax.f32 %v2430_v56, %v2541_v57  ;;  %v6233_v59 = vpop.f32.mrb[88].mxu1 }
 0x3b0   : > { %v2544_v61 = vmul.f32 0.2, %v6233_v59  ;;  %v2440_v62 = vpop.f32.mrb[89].mxu1 }
 0x3b1   : > { %v2543_v63 = vmul.f32 0.2, %v2440_v62  ;;  %6326 = vmatprep.mubr.msk.f32.mxu0 %vm1205_vm1, %v2605_v58 }
 0x3b2   : > { %v2608_v0 = vmax.f32 %v6233_v59, %v2544_v61  ;;  %6327 = vmatmul.mubr.msk.f32.gmra.mrb[146].mxu0 %vm1205_vm1, %v2606_v60 }
 0x3b3   : > { %v2607_v1 = vmax.f32 %v2440_v62, %v2543_v63  ;;  %v6236_v2 = vpop.f32.mrb[90].mxu1 }
 0x3b4   : > { %v2546_v3 = vmul.f32 0.2, %v6236_v2  ;;  %v2450_v4 = vpop.f32.mrb[91].mxu1 }
 0x3b5   : > { %v2545_v5 = vmul.f32 0.2, %v2450_v4  ;;  %6329 = vmatprep.mubr.msk.f32.mxu0 %vm1205_vm1, %v2607_v1 }
 0x3b6   : > { %v2610_v6 = vmax.f32 %v6236_v2, %v2546_v3  ;;  %6330 = vmatmul.mubr.msk.f32.gmra.mrb[148].mxu0 %vm1205_vm1, %v2608_v0 }
 0x3b7   : > { %v2609_v7 = vmax.f32 %v2450_v4, %v2545_v5  ;;  %v6239_v8 = vpop.f32.mrb[92].mxu1 }
 0x3b8   : > { %v2548_v9 = vmul.f32 0.2, %v6239_v8  ;;  %v2460_v10 = vpop.f32.mrb[93].mxu1 }
 0x3b9   : > { %6332 = vmatprep.mubr.msk.f32.mxu0 %vm1205_vm1, %v2609_v7  ;;  %v2547_v11 = vmul.f32 0.2, %v2460_v10 }
 0x3ba   : > { %v2612_v12 = vmax.f32 %v6239_v8, %v2548_v9  ;;  %6333 = vmatmul.mubr.msk.f32.gmra.mrb[150].mxu0 %vm1205_vm1, %v2610_v6 }
 0x3bb   : > { %v2611_v13 = vmax.f32 %v2460_v10, %v2547_v11  ;;  %v6242_v14 = vpop.f32.mrb[94].mxu1 }
 0x3bc   : > { %v2550_v15 = vmul.f32 0.2, %v6242_v14  ;;  %v2470_v16 = vpop.f32.mrb[95].mxu1 }
 0x3bd   : > { %6335 = vmatprep.mubr.msk.f32.mxu0 %vm1205_vm1, %v2611_v13  ;;  %v2549_v17 = vmul.f32 0.2, %v2470_v16 }
 0x3be   : > { %6336 = vmatmul.mubr.msk.f32.gmra.mrb[152].mxu0 %vm1205_vm1, %v2612_v12  ;;  %v2614_v18 = vmax.f32 %v6242_v14, %v2550_v15 }
 0x3bf   : > { %v2613_v19 = vmax.f32 %v2470_v16, %v2549_v17  ;;  %v6245_v20 = vpop.f32.mrb[96].mxu1 }
 0x3c0   : > { %v2552_v21 = vmul.f32 0.2, %v6245_v20  ;;  %v2480_v22 = vpop.f32.mrb[97].mxu1 }
 0x3c1   : > { %6338 = vmatprep.mubr.msk.f32.mxu0 %vm1205_vm1, %v2613_v19  ;;  %v2551_v23 = vmul.f32 0.2, %v2480_v22 }
 0x3c2   : > { %6339 = vmatmul.mubr.msk.f32.gmra.mrb[154].mxu0 %vm1205_vm1, %v2614_v18  ;;  %v2616_v24 = vmax.f32 %v6245_v20, %v2552_v21 }
 0x3c3   : > { %v2615_v25 = vmax.f32 %v2480_v22, %v2551_v23 }
 0x3c5   : > { %6341 = vmatprep.mubr.msk.f32.mxu0 %vm1205_vm1, %v2615_v25 }
 0x3c6   : > { %6342 = vmatmul.mubr.msk.f32.gmra.mrb[156].mxu0 %vm1205_vm1, %v2616_v24 }
 0x401   : > { %v6250_v26 = vpop.f32.mrb[94].mxu0 }
 0x402   : > { %v3196_v27 = vmul.f32 0.2, %v6250_v26  ;;  %v2876_v28 = vpop.f32.mrb[95].mxu0 }
 0x403   : > { %v3195_v29 = vmul.f32 0.2, %v2876_v28 }
 0x404   : > { %v3260_v31 = vmax.f32 %v6250_v26, %v3196_v27 }
 0x405   : > { %v3259_v30 = vmax.f32 %v2876_v28, %v3195_v29 }
 0x407   : > { %6346 = vmatprep.mubr.msk.f32.mxu1 %vm1205_vm1, %v3259_v30 }
 0x408   : > { %6347 = vmatmul.mubr.msk.f32.vlgmr.msra.gmra.mrb[98].mxu1 %vm1205_vm1, %v3260_v31 }
 0x409   : > { %v6253_v32 = vpop.f32.mrb[96].mxu0 }
 0x40a   : > { %v3198_v33 = vmul.f32 0.2, %v6253_v32  ;;  %v2886_v34 = vpop.f32.mrb[97].mxu0 }
 0x40b   : > { %v3197_v35 = vmul.f32 0.2, %v2886_v34 }
 0x40c   : > { %v3262_v37 = vmax.f32 %v6253_v32, %v3198_v33 }
 0x40d   : > { %v3261_v36 = vmax.f32 %v2886_v34, %v3197_v35 }
 0x40f   : > { %6349 = vmatprep.mubr.msk.f32.mxu1 %vm1205_vm1, %v3261_v36 }
 0x410   : > { %6350 = vmatmul.mubr.msk.f32.gmra.mrb[100].mxu1 %vm1205_vm1, %v3262_v37 }
 0x411   : > { %v6256_v38 = vpop.f32.mrb[98].mxu0 }
 0x412   : > { %v3200_v39 = vmul.f32 0.2, %v6256_v38  ;;  %v2896_v40 = vpop.f32.mrb[99].mxu0 }
 0x413   : > { %v3199_v41 = vmul.f32 0.2, %v2896_v40 }
 0x414   : > { %v3264_v43 = vmax.f32 %v6256_v38, %v3200_v39 }
 0x415   : > { %v3263_v42 = vmax.f32 %v2896_v40, %v3199_v41 }
 0x417   : > { %6352 = vmatprep.mubr.msk.f32.mxu1 %vm1205_vm1, %v3263_v42 }
 0x418   : > { %6353 = vmatmul.mubr.msk.f32.gmra.mrb[102].mxu1 %vm1205_vm1, %v3264_v43 }
 0x419   : > { %v6259_v44 = vpop.f32.mrb[100].mxu0 }
 0x41a   : > { %v3202_v45 = vmul.f32 0.2, %v6259_v44  ;;  %v2906_v46 = vpop.f32.mrb[101].mxu0 }
 0x41b   : > { %v3201_v47 = vmul.f32 0.2, %v2906_v46 }
 0x41c   : > { %v3266_v49 = vmax.f32 %v6259_v44, %v3202_v45 }
 0x41d   : > { %v3265_v48 = vmax.f32 %v2906_v46, %v3201_v47 }
 0x41f   : > { %6355 = vmatprep.mubr.msk.f32.mxu1 %vm1205_vm1, %v3265_v48 }
 0x420   : > { %6356 = vmatmul.mubr.msk.f32.gmra.mrb[104].mxu1 %vm1205_vm1, %v3266_v49 }
 0x421   : > { %v6262_v50 = vpop.f32.mrb[102].mxu0 }
 0x422   : > { %v3204_v51 = vmul.f32 0.2, %v6262_v50  ;;  %v2916_v52 = vpop.f32.mrb[103].mxu0 }
 0x423   : > { %v3203_v53 = vmul.f32 0.2, %v2916_v52 }
 0x424   : > { %v3268_v55 = vmax.f32 %v6262_v50, %v3204_v51 }
 0x425   : > { %v3267_v54 = vmax.f32 %v2916_v52, %v3203_v53 }
 0x427   : > { %6358 = vmatprep.mubr.msk.f32.mxu1 %vm1205_vm1, %v3267_v54 }
 0x428   : > { %6359 = vmatmul.mubr.msk.f32.gmra.mrb[106].mxu1 %vm1205_vm1, %v3268_v55 }
 0x429   : > { %v6265_v56 = vpop.f32.mrb[104].mxu0 }
 0x42a   : > { %v3206_v57 = vmul.f32 0.2, %v6265_v56  ;;  %v2926_v58 = vpop.f32.mrb[105].mxu0 }
 0x42b   : > { %v3205_v59 = vmul.f32 0.2, %v2926_v58 }
 0x42c   : > { %v3270_v61 = vmax.f32 %v6265_v56, %v3206_v57 }
 0x42d   : > { %v3269_v60 = vmax.f32 %v2926_v58, %v3205_v59 }
 0x42f   : > { %6361 = vmatprep.mubr.msk.f32.mxu1 %vm1205_vm1, %v3269_v60 }
 0x430   : > { %6362 = vmatmul.mubr.msk.f32.gmra.mrb[108].mxu1 %vm1205_vm1, %v3270_v61 }
 0x431   : > { %v6268_v62 = vpop.f32.mrb[106].mxu0 }
 0x432   : > { %v3208_v63 = vmul.f32 0.2, %v6268_v62  ;;  %v2936_v0 = vpop.f32.mrb[107].mxu0 }
 0x433   : > { %v3207_v1 = vmul.f32 0.2, %v2936_v0 }
 0x434   : > { %v3272_v3 = vmax.f32 %v6268_v62, %v3208_v63 }
 0x435   : > { %v3271_v2 = vmax.f32 %v2936_v0, %v3207_v1 }
 0x437   : > { %6364 = vmatprep.mubr.msk.f32.mxu1 %vm1205_vm1, %v3271_v2 }
 0x438   : > { %6365 = vmatmul.mubr.msk.f32.gmra.mrb[110].mxu1 %vm1205_vm1, %v3272_v3 }
 0x439   : > { %v6271_v4 = vpop.f32.mrb[108].mxu0 }
 0x43a   : > { %v3210_v5 = vmul.f32 0.2, %v6271_v4  ;;  %v2946_v6 = vpop.f32.mrb[109].mxu0 }
 0x43b   : > { %v3209_v7 = vmul.f32 0.2, %v2946_v6 }
 0x43c   : > { %v3274_v10 = vmax.f32 %v6271_v4, %v3210_v5 }
 0x43d   : > { %v3273_v8 = vmax.f32 %v2946_v6, %v3209_v7  ;;  %v6274_v9 = vpop.f32.mrb[110].mxu0 }
 0x43e   : > { %v3212_v11 = vmul.f32 0.2, %v6274_v9  ;;  %v2956_v12 = vpop.f32.mrb[111].mxu0 }
 0x43f   : > { %v3211_v13 = vmul.f32 0.2, %v2956_v12  ;;  %6367 = vmatprep.mubr.msk.f32.mxu1 %vm1205_vm1, %v3273_v8 }
 0x440   : > { %6368 = vmatmul.mubr.msk.f32.gmra.mrb[112].mxu1 %vm1205_vm1, %v3274_v10  ;;  %v3276_v16 = vmax.f32 %v6274_v9, %v3212_v11 }
 0x441   : > { %v3275_v14 = vmax.f32 %v2956_v12, %v3211_v13  ;;  %v6277_v15 = vpop.f32.mrb[112].mxu0 }
 0x442   : > { %v3214_v17 = vmul.f32 0.2, %v6277_v15  ;;  %v2966_v18 = vpop.f32.mrb[113].mxu0 }
 0x443   : > { %v3213_v19 = vmul.f32 0.2, %v2966_v18  ;;  %6370 = vmatprep.mubr.msk.f32.mxu1 %vm1205_vm1, %v3275_v14 }
 0x444   : > { %6371 = vmatmul.mubr.msk.f32.gmra.mrb[114].mxu1 %vm1205_vm1, %v3276_v16  ;;  %v3278_v22 = vmax.f32 %v6277_v15, %v3214_v17 }
 0x445   : > { %v3277_v20 = vmax.f32 %v2966_v18, %v3213_v19  ;;  %v6280_v21 = vpop.f32.mrb[114].mxu0 }
 0x446   : > { %v3216_v23 = vmul.f32 0.2, %v6280_v21  ;;  %v2976_v24 = vpop.f32.mrb[115].mxu0 }
 0x447   : > { %v3215_v25 = vmul.f32 0.2, %v2976_v24  ;;  %6373 = vmatprep.mubr.msk.f32.mxu1 %vm1205_vm1, %v3277_v20 }
 0x448   : > { %6374 = vmatmul.mubr.msk.f32.gmra.mrb[116].mxu1 %vm1205_vm1, %v3278_v22  ;;  %v3280_v28 = vmax.f32 %v6280_v21, %v3216_v23 }
 0x449   : > { %v3279_v26 = vmax.f32 %v2976_v24, %v3215_v25  ;;  %v6283_v27 = vpop.f32.mrb[116].mxu0 }
 0x44a   : > { %v3218_v29 = vmul.f32 0.2, %v6283_v27  ;;  %v2986_v30 = vpop.f32.mrb[117].mxu0 }
 0x44b   : > { %v3217_v31 = vmul.f32 0.2, %v2986_v30  ;;  %6376 = vmatprep.mubr.msk.f32.mxu1 %vm1205_vm1, %v3279_v26 }
 0x44c   : > { %6377 = vmatmul.mubr.msk.f32.gmra.mrb[118].mxu1 %vm1205_vm1, %v3280_v28  ;;  %v3282_v34 = vmax.f32 %v6283_v27, %v3218_v29 }
 0x44d   : > { %v3281_v32 = vmax.f32 %v2986_v30, %v3217_v31  ;;  %v6286_v33 = vpop.f32.mrb[118].mxu0 }
 0x44e   : > { %v3220_v35 = vmul.f32 0.2, %v6286_v33  ;;  %v2996_v36 = vpop.f32.mrb[119].mxu0 }
 0x44f   : > { %v3219_v37 = vmul.f32 0.2, %v2996_v36  ;;  %6379 = vmatprep.mubr.msk.f32.mxu1 %vm1205_vm1, %v3281_v32 }
 0x450   : > { %6380 = vmatmul.mubr.msk.f32.gmra.mrb[120].mxu1 %vm1205_vm1, %v3282_v34  ;;  %v3284_v40 = vmax.f32 %v6286_v33, %v3220_v35 }
 0x451   : > { %v3283_v38 = vmax.f32 %v2996_v36, %v3219_v37  ;;  %v6289_v39 = vpop.f32.mrb[120].mxu0 }
 0x452   : > { %v3222_v41 = vmul.f32 0.2, %v6289_v39  ;;  %v3006_v42 = vpop.f32.mrb[121].mxu0 }
 0x453   : > { %v3221_v43 = vmul.f32 0.2, %v3006_v42  ;;  %6382 = vmatprep.mubr.msk.f32.mxu1 %vm1205_vm1, %v3283_v38 }
 0x454   : > { %6383 = vmatmul.mubr.msk.f32.gmra.mrb[122].mxu1 %vm1205_vm1, %v3284_v40  ;;  %v3286_v46 = vmax.f32 %v6289_v39, %v3222_v41 }
 0x455   : > { %v3285_v44 = vmax.f32 %v3006_v42, %v3221_v43  ;;  %v6292_v45 = vpop.f32.mrb[122].mxu0 }
 0x456   : > { %v3224_v47 = vmul.f32 0.2, %v6292_v45  ;;  %v3016_v48 = vpop.f32.mrb[123].mxu0 }
 0x457   : > { %v3223_v49 = vmul.f32 0.2, %v3016_v48  ;;  %6385 = vmatprep.mubr.msk.f32.mxu1 %vm1205_vm1, %v3285_v44 }
 0x458   : > { %6386 = vmatmul.mubr.msk.f32.gmra.mrb[124].mxu1 %vm1205_vm1, %v3286_v46  ;;  %v3288_v52 = vmax.f32 %v6292_v45, %v3224_v47 }
 0x459   : > { %v3287_v50 = vmax.f32 %v3016_v48, %v3223_v49  ;;  %v6295_v51 = vpop.f32.mrb[124].mxu0 }
 0x45a   : > { %v3226_v53 = vmul.f32 0.2, %v6295_v51  ;;  %v3026_v54 = vpop.f32.mrb[125].mxu0 }
 0x45b   : > { %v3225_v55 = vmul.f32 0.2, %v3026_v54  ;;  %6388 = vmatprep.mubr.msk.f32.mxu1 %vm1205_vm1, %v3287_v50 }
 0x45c   : > { %6389 = vmatmul.mubr.msk.f32.gmra.mrb[126].mxu1 %vm1205_vm1, %v3288_v52  ;;  %v3290_v58 = vmax.f32 %v6295_v51, %v3226_v53 }
 0x45d   : > { %v3289_v56 = vmax.f32 %v3026_v54, %v3225_v55  ;;  %v6298_v57 = vpop.f32.mrb[126].mxu0 }
 0x45e   : > { %v3228_v59 = vmul.f32 0.2, %v6298_v57  ;;  %v3036_v60 = vpop.f32.mrb[127].mxu0 }
 0x45f   : > { %v3227_v61 = vmul.f32 0.2, %v3036_v60  ;;  %6391 = vmatprep.mubr.msk.f32.mxu1 %vm1205_vm1, %v3289_v56 }
 0x460   : > { %6392 = vmatmul.mubr.msk.f32.gmra.mrb[128].mxu1 %vm1205_vm1, %v3290_v58  ;;  %v3292_v0 = vmax.f32 %v6298_v57, %v3228_v59 }
 0x461   : > { %v3291_v62 = vmax.f32 %v3036_v60, %v3227_v61  ;;  %v6301_v63 = vpop.f32.mrb[128].mxu0 }
 0x462   : > { %v3230_v1 = vmul.f32 0.2, %v6301_v63  ;;  %v3046_v2 = vpop.f32.mrb[129].mxu0 }
 0x463   : > { %v3229_v3 = vmul.f32 0.2, %v3046_v2  ;;  %6394 = vmatprep.mubr.msk.f32.mxu1 %vm1205_vm1, %v3291_v62 }
 0x464   : > { %6395 = vmatmul.mubr.msk.f32.gmra.mrb[130].mxu1 %vm1205_vm1, %v3292_v0  ;;  %v3294_v6 = vmax.f32 %v6301_v63, %v3230_v1 }
 0x465   : > { %v3293_v4 = vmax.f32 %v3046_v2, %v3229_v3  ;;  %v6304_v5 = vpop.f32.mrb[130].mxu0 }
 0x466   : > { %v3232_v7 = vmul.f32 0.2, %v6304_v5  ;;  %v3056_v8 = vpop.f32.mrb[131].mxu0 }
 0x467   : > { %v3231_v9 = vmul.f32 0.2, %v3056_v8  ;;  %6397 = vmatprep.mubr.msk.f32.mxu1 %vm1205_vm1, %v3293_v4 }
 0x468   : > { %6398 = vmatmul.mubr.msk.f32.gmra.mrb[132].mxu1 %vm1205_vm1, %v3294_v6  ;;  %v3296_v12 = vmax.f32 %v6304_v5, %v3232_v7 }
 0x469   : > { %v3295_v10 = vmax.f32 %v3056_v8, %v3231_v9  ;;  %v6307_v11 = vpop.f32.mrb[132].mxu0 }
 0x46a   : > { %v3234_v13 = vmul.f32 0.2, %v6307_v11  ;;  %v3066_v14 = vpop.f32.mrb[133].mxu0 }
 0x46b   : > { %v3233_v15 = vmul.f32 0.2, %v3066_v14  ;;  %6400 = vmatprep.mubr.msk.f32.mxu1 %vm1205_vm1, %v3295_v10 }
 0x46c   : > { %6401 = vmatmul.mubr.msk.f32.gmra.mrb[134].mxu1 %vm1205_vm1, %v3296_v12  ;;  %v3298_v18 = vmax.f32 %v6307_v11, %v3234_v13 }
 0x46d   : > { %v3297_v16 = vmax.f32 %v3066_v14, %v3233_v15  ;;  %v6310_v17 = vpop.f32.mrb[134].mxu0 }
 0x46e   : > { %v3236_v19 = vmul.f32 0.2, %v6310_v17  ;;  %v3076_v20 = vpop.f32.mrb[135].mxu0 }
 0x46f   : > { %v3235_v21 = vmul.f32 0.2, %v3076_v20  ;;  %6403 = vmatprep.mubr.msk.f32.mxu1 %vm1205_vm1, %v3297_v16 }
 0x470   : > { %6404 = vmatmul.mubr.msk.f32.gmra.mrb[136].mxu1 %vm1205_vm1, %v3298_v18  ;;  %v3300_v24 = vmax.f32 %v6310_v17, %v3236_v19 }
 0x471   : > { %v3299_v22 = vmax.f32 %v3076_v20, %v3235_v21  ;;  %v6313_v23 = vpop.f32.mrb[136].mxu0 }
 0x472   : > { %v3238_v25 = vmul.f32 0.2, %v6313_v23  ;;  %v3086_v26 = vpop.f32.mrb[137].mxu0 }
 0x473   : > { %v3237_v27 = vmul.f32 0.2, %v3086_v26  ;;  %6406 = vmatprep.mubr.msk.f32.mxu1 %vm1205_vm1, %v3299_v22 }
 0x474   : > { %6407 = vmatmul.mubr.msk.f32.gmra.mrb[138].mxu1 %vm1205_vm1, %v3300_v24  ;;  %v3302_v30 = vmax.f32 %v6313_v23, %v3238_v25 }
 0x475   : > { %v3301_v28 = vmax.f32 %v3086_v26, %v3237_v27  ;;  %v6316_v29 = vpop.f32.mrb[138].mxu0 }
 0x476   : > { %v3240_v31 = vmul.f32 0.2, %v6316_v29  ;;  %v3096_v32 = vpop.f32.mrb[139].mxu0 }
 0x477   : > { %v3239_v33 = vmul.f32 0.2, %v3096_v32  ;;  %6409 = vmatprep.mubr.msk.f32.mxu1 %vm1205_vm1, %v3301_v28 }
 0x478   : > { %6410 = vmatmul.mubr.msk.f32.gmra.mrb[140].mxu1 %vm1205_vm1, %v3302_v30  ;;  %v3304_v36 = vmax.f32 %v6316_v29, %v3240_v31 }
 0x479   : > { %v3303_v34 = vmax.f32 %v3096_v32, %v3239_v33  ;;  %v6319_v35 = vpop.f32.mrb[140].mxu0 }
 0x47a   : > { %v3242_v37 = vmul.f32 0.2, %v6319_v35  ;;  %v3106_v38 = vpop.f32.mrb[141].mxu0 }
 0x47b   : > { %v3241_v39 = vmul.f32 0.2, %v3106_v38  ;;  %6412 = vmatprep.mubr.msk.f32.mxu1 %vm1205_vm1, %v3303_v34 }
 0x47c   : > { %6413 = vmatmul.mubr.msk.f32.gmra.mrb[142].mxu1 %vm1205_vm1, %v3304_v36  ;;  %v3306_v42 = vmax.f32 %v6319_v35, %v3242_v37 }
 0x47d   : > { %v3305_v40 = vmax.f32 %v3106_v38, %v3241_v39  ;;  %v6322_v41 = vpop.f32.mrb[142].mxu0 }
 0x47e   : > { %v3244_v43 = vmul.f32 0.2, %v6322_v41  ;;  %v3116_v44 = vpop.f32.mrb[143].mxu0 }
 0x47f   : > { %v3243_v45 = vmul.f32 0.2, %v3116_v44  ;;  %6415 = vmatprep.mubr.msk.f32.mxu1 %vm1205_vm1, %v3305_v40 }
 0x480   : > { %6416 = vmatmul.mubr.msk.f32.gmra.mrb[144].mxu1 %vm1205_vm1, %v3306_v42  ;;  %v3308_v48 = vmax.f32 %v6322_v41, %v3244_v43 }
 0x481   : > { %v3307_v46 = vmax.f32 %v3116_v44, %v3243_v45  ;;  %v6325_v47 = vpop.f32.mrb[144].mxu0 }
 0x482   : > { %v3246_v49 = vmul.f32 0.2, %v6325_v47  ;;  %v3126_v50 = vpop.f32.mrb[145].mxu0 }
 0x483   : > { %v3245_v51 = vmul.f32 0.2, %v3126_v50  ;;  %6418 = vmatprep.mubr.msk.f32.mxu1 %vm1205_vm1, %v3307_v46 }
 0x484   : > { %6419 = vmatmul.mubr.msk.f32.gmra.mrb[146].mxu1 %vm1205_vm1, %v3308_v48  ;;  %v3310_v54 = vmax.f32 %v6325_v47, %v3246_v49 }
 0x485   : > { %v3309_v52 = vmax.f32 %v3126_v50, %v3245_v51  ;;  %v6328_v53 = vpop.f32.mrb[146].mxu0 }
 0x486   : > { %v3248_v55 = vmul.f32 0.2, %v6328_v53  ;;  %v3136_v56 = vpop.f32.mrb[147].mxu0 }
 0x487   : > { %v3247_v57 = vmul.f32 0.2, %v3136_v56  ;;  %6421 = vmatprep.mubr.msk.f32.mxu1 %vm1205_vm1, %v3309_v52 }
 0x488   : > { %6422 = vmatmul.mubr.msk.f32.gmra.mrb[148].mxu1 %vm1205_vm1, %v3310_v54  ;;  %v3312_v60 = vmax.f32 %v6328_v53, %v3248_v55 }
 0x489   : > { %v3311_v58 = vmax.f32 %v3136_v56, %v3247_v57  ;;  %v6331_v59 = vpop.f32.mrb[148].mxu0 }
 0x48a   : > { %v3250_v61 = vmul.f32 0.2, %v6331_v59  ;;  %v3146_v62 = vpop.f32.mrb[149].mxu0 }
 0x48b   : > { %v3249_v63 = vmul.f32 0.2, %v3146_v62  ;;  %6424 = vmatprep.mubr.msk.f32.mxu1 %vm1205_vm1, %v3311_v58 }
 0x48c   : > { %6425 = vmatmul.mubr.msk.f32.gmra.mrb[150].mxu1 %vm1205_vm1, %v3312_v60  ;;  %v3314_v2 = vmax.f32 %v6331_v59, %v3250_v61 }
 0x48d   : > { %v3313_v0 = vmax.f32 %v3146_v62, %v3249_v63  ;;  %v6334_v1 = vpop.f32.mrb[150].mxu0 }
 0x48e   : > { %v3252_v3 = vmul.f32 0.2, %v6334_v1  ;;  %v3156_v4 = vpop.f32.mrb[151].mxu0 }
 0x48f   : > { %v3251_v5 = vmul.f32 0.2, %v3156_v4  ;;  %6427 = vmatprep.mubr.msk.f32.mxu1 %vm1205_vm1, %v3313_v0 }
 0x490   : > { %v3316_v6 = vmax.f32 %v6334_v1, %v3252_v3  ;;  %6428 = vmatmul.mubr.msk.f32.gmra.mrb[152].mxu1 %vm1205_vm1, %v3314_v2 }
 0x491   : > { %v3315_v7 = vmax.f32 %v3156_v4, %v3251_v5  ;;  %v6337_v8 = vpop.f32.mrb[152].mxu0 }
 0x492   : > { %v3254_v9 = vmul.f32 0.2, %v6337_v8  ;;  %v3166_v10 = vpop.f32.mrb[153].mxu0 }
 0x493   : > { %6430 = vmatprep.mubr.msk.f32.mxu1 %vm1205_vm1, %v3315_v7  ;;  %v3253_v11 = vmul.f32 0.2, %v3166_v10 }
 0x494   : > { %v3318_v12 = vmax.f32 %v6337_v8, %v3254_v9  ;;  %6431 = vmatmul.mubr.msk.f32.gmra.mrb[154].mxu1 %vm1205_vm1, %v3316_v6 }
 0x495   : > { %v3317_v13 = vmax.f32 %v3166_v10, %v3253_v11  ;;  %v6340_v14 = vpop.f32.mrb[154].mxu0 }
 0x496   : > { %v3256_v15 = vmul.f32 0.2, %v6340_v14  ;;  %v3176_v16 = vpop.f32.mrb[155].mxu0 }
 0x497   : > { %6433 = vmatprep.mubr.msk.f32.mxu1 %vm1205_vm1, %v3317_v13  ;;  %v3255_v17 = vmul.f32 0.2, %v3176_v16 }
 0x498   : > { %6434 = vmatmul.mubr.msk.f32.gmra.mrb[156].mxu1 %vm1205_vm1, %v3318_v12  ;;  %v3320_v18 = vmax.f32 %v6340_v14, %v3256_v15 }
 0x499   : > { %v3319_v19 = vmax.f32 %v3176_v16, %v3255_v17  ;;  %v6343_v20 = vpop.f32.mrb[156].mxu0  ;;  %v6598_v16 = vmov 0.0  }
 0x49a   : > { %v3258_v21 = vmul.f32 0.2, %v6343_v20  ;;  %v3186_v22 = vpop.f32.mrb[157].mxu0  ;;  %4419 = vmatprep.mubr.f32.mxu0 %v6598_v16 }
 0x49b   : > { %6436 = vmatprep.mubr.msk.f32.mxu1 %vm1205_vm1, %v3319_v19  ;;  %v3257_v23 = vmul.f32 0.2, %v3186_v22 }
 0x49c   : > { %6437 = vmatmul.mubr.msk.f32.gmra.mrb[158].mxu1 %vm1205_vm1, %v3320_v18  ;;  %v3322_v24 = vmax.f32 %v6343_v20, %v3258_v21 }
 0x49d   : > { %v3321_v25 = vmax.f32 %v3186_v22, %v3257_v23 }
 0x49f   : > { %6439 = vmatprep.mubr.msk.f32.mxu1 %vm1205_vm1, %v3321_v25 }
 0x4a0   : > { %6440 = vmatmul.mubr.msk.f32.gmra.mrb[160].mxu1 %vm1205_vm1, %v3322_v24 }
 0x4a1   : > { %4747 = vmatprep.mubr.f32.mxu1 %v6598_v16 }
 0x4db   : > { %v7068_v26 = vpop.f32.mrb[98].mxu1 }
 0x4dc   : > { %v7070_v27 = vpop.f32.mrb[99].mxu1 }
 0x4e3   : > { %v7072_v28 = vpop.f32.mrb[100].mxu1 }
 0x4e4   : > { %v7074_v29 = vpop.f32.mrb[101].mxu1 }
 0x4eb   : > { %v7076_v30 = vpop.f32.mrb[102].mxu1 }
 0x4ec   : > { %v7078_v31 = vpop.f32.mrb[103].mxu1 }
 0x4f3   : > { %v7080_v32 = vpop.f32.mrb[104].mxu1 }
 0x4f4   : > { %v7082_v33 = vpop.f32.mrb[105].mxu1 }
 0x4fb   : > { %v7084_v34 = vpop.f32.mrb[106].mxu1 }
 0x4fc   : > { %v7086_v35 = vpop.f32.mrb[107].mxu1 }
 0x503   : > { %v7088_v36 = vpop.f32.mrb[108].mxu1 }
 0x504   : > { %v7090_v37 = vpop.f32.mrb[109].mxu1 }
 0x50b   : > { %v7092_v38 = vpop.f32.mrb[110].mxu1 }
 0x50c   : > { %v7094_v39 = vpop.f32.mrb[111].mxu1 }
 0x513   : > { %v7096_v40 = vpop.f32.mrb[112].mxu1 }
 0x514   : > { %v7098_v41 = vpop.f32.mrb[113].mxu1 }
 0x517   : > { %v6372_v42 = vpop.f32.mrb[114].mxu1 }
 0x518   : > { %v3662_v43 = vpop.f32.mrb[115].mxu1 }
 0x519   : > { %3933 = vxpose.xlu0.b32.start [1/16] (narrow) %v3662_v43, 8  ;;  %v4062_v43 = vld [vmem:[%s8005_s7 + $0x8] sm:$0xff] }
 0x51b   : > { %v6375_v44 = vpop.f32.mrb[116].mxu1 }
 0x51c   : > { %v3672_v45 = vpop.f32.mrb[117].mxu1 }
 0x51d   : > { %3934 = vxpose.xlu0.b32.cont [2/16] (narrow) %v6372_v42, 8  ;;  %v7218_v42 = vld [vmem:[%s8004_s6 + $0x28] sm:$0xff] }
 0x51f   : > { %v6378_v46 = vpop.f32.mrb[118].mxu1 }
 0x520   : > { %v3682_v47 = vpop.f32.mrb[119].mxu1 }
 0x521   : > { %3935 = vxpose.xlu0.b32.cont [3/16] (narrow) %v3672_v45, 8  ;;  %v7232_v45 = vld [vmem:[%s8004_s6 + $0x30] sm:$0xff] }
 0x523   : > { %v6381_v48 = vpop.f32.mrb[120].mxu1 }
 0x524   : > { %v3692_v49 = vpop.f32.mrb[121].mxu1 }
 0x525   : > { %3936 = vxpose.xlu0.b32.cont [4/16] (narrow) %v6375_v44, 8  ;;  %v4061_v44 = vld [vmem:[%s8005_s7] sm:$0xff] }
 0x527   : > { %v6384_v50 = vpop.f32.mrb[122].mxu1 }
 0x528   : > { %v3702_v51 = vpop.f32.mrb[123].mxu1 }
 0x529   : > { %3937 = vxpose.xlu0.b32.cont [5/16] (narrow) %v3682_v47, 8  ;;  %v7243_v47 = vld [vmem:[%s8004_s6 + $0x38] sm:$0xff] }
 0x52b   : > { %v6387_v52 = vpop.f32.mrb[124].mxu1 }
 0x52c   : > { %v3712_v53 = vpop.f32.mrb[125].mxu1 }
 0x52d   : > { %3938 = vxpose.xlu0.b32.cont [6/16] (narrow) %v6378_v46, 8  ;;  %v4063_v46 = vld [vmem:[%s8005_s7 + $0x10] sm:$0xff] }
 0x52f   : > { %v6390_v54 = vpop.f32.mrb[126].mxu1 }
 0x530   : > { %v3722_v55 = vpop.f32.mrb[127].mxu1 }
 0x531   : > { %3939 = vxpose.xlu0.b32.cont [7/16] (narrow) %v3692_v49, 8  ;;  %v7254_v49 = vld [vmem:[%s8004_s6 + $0x40] sm:$0xff] }
 0x533   : > { %v6393_v56 = vpop.f32.mrb[128].mxu1 }
 0x534   : > { %v3732_v57 = vpop.f32.mrb[129].mxu1 }
 0x535   : > { %3940 = vxpose.xlu0.b32.cont [8/16] (narrow) %v6381_v48, 8  ;;  %v4064_v48 = vld [vmem:[%s8005_s7 + $0x18] sm:$0xff] }
 0x537   : > { %v7100_v58 = vpop.f32.mrb[130].mxu1 }
 0x538   : > { %v7102_v59 = vpop.f32.mrb[131].mxu1 }
 0x539   : > { %3941 = vxpose.xlu0.b32.cont [9/16] (narrow) %v3702_v51, 8  ;;  %v7265_v51 = vld [vmem:[%s8004_s6 + $0x48] sm:$0xff] }
 0x53b   : > { %v7104_v60 = vpop.f32.mrb[132].mxu1 }
 0x53c   : > { %v7106_v61 = vpop.f32.mrb[133].mxu1 }
 0x53d   : > { %3942 = vxpose.xlu0.b32.cont [10/16] (narrow) %v6384_v50, 8  ;;  %v4065_v50 = vld [vmem:[%s8005_s7 + $0x20] sm:$0xff] }
 0x53f   : > { %v7108_v62 = vpop.f32.mrb[134].mxu1 }
 0x540   : > { %v7110_v63 = vpop.f32.mrb[135].mxu1 }
 0x541   : > { %3943 = vxpose.xlu0.b32.cont [11/16] (narrow) %v3712_v53, 8  ;;  %v4066_v53 = vld [vmem:[%s8005_s7 + $0x28] sm:$0xff] }
 0x543   : > { %v7112_v0 = vpop.f32.mrb[136].mxu1 }
 0x544   : > { %v7114_v1 = vpop.f32.mrb[137].mxu1 }
 0x545   : > { %3944 = vxpose.xlu0.b32.cont [12/16] (narrow) %v6387_v52, 8  ;;  %v4067_v52 = vld [vmem:[%s8005_s7 + $0x30] sm:$0xff] }
 0x547   : > { %v7116_v2 = vpop.f32.mrb[138].mxu1 }
 0x548   : > { %v7118_v3 = vpop.f32.mrb[139].mxu1 }
 0x549   : > { %3945 = vxpose.xlu0.b32.cont [13/16] (narrow) %v3722_v55, 8  ;;  %v4069_v55 = vld [vmem:[%s8005_s7 + $0x40] sm:$0xff] }
 0x54b   : > { %v7120_v4 = vpop.f32.mrb[140].mxu1 }
 0x54c   : > { %v7122_v5 = vpop.f32.mrb[141].mxu1 }
 0x54d   : > { %3946 = vxpose.xlu0.b32.cont [14/16] (narrow) %v6390_v54, 8  ;;  %v7279_v54 = vld [vmem:[%s8004_s6 + $0x50] sm:$0xff] }
 0x54f   : > { %v7124_v6 = vpop.f32.mrb[142].mxu1 }
 0x550   : > { %v7126_v7 = vpop.f32.mrb[143].mxu1 }
 0x551   : > { %3947 = vxpose.xlu0.b32.cont [15/16] (narrow) %v3732_v57, 8  ;;  %v7293_v57 = vld [vmem:[%s8004_s6 + $0x58] sm:$0xff] }
 0x553   : > { %v7128_v8 = vpop.f32.mrb[144].mxu1 }
 0x554   : > { %v7130_v9 = vpop.f32.mrb[145].mxu1 }
 0x555   : > { %3948 = vxpose.xlu0.b32.end [16/16] (narrow) %v6393_v56, 8  ;;  %v4068_v56 = vld [vmem:[%s8005_s7 + $0x38] sm:$0xff] }
 0x557   : > { %v6420_v10 = vpop.f32.mrb[146].mxu1 }
 0x558   : > { %v3822_v11 = vpop.f32.mrb[147].mxu1 }
 0x559   : > { %3901 = vxpose.xlu0.b32.start [1/16] (narrow) %v7070_v27, 8  ;;  %3997 = vxpose.xlu1.b32.start [1/16] (narrow) %v3822_v11, 8  ;;  %v7364_v11 = vld [vmem:[%s8004_s6 + $0x80] sm:$0xff] }
 0x55b   : > { %v6423_v12 = vpop.f32.mrb[148].mxu1 }
 0x55c   : > { %v3832_v13 = vpop.f32.mrb[149].mxu1 }
 0x55d   : > { %3902 = vxpose.xlu0.b32.cont [2/16] (narrow) %v7068_v26, 8  ;;  %3998 = vxpose.xlu1.b32.cont [2/16] (narrow) %v6420_v10, 8 }
 0x55f   : > { %v6426_v14 = vpop.f32.mrb[150].mxu1 }
 0x560   : > { %v3842_v15 = vpop.f32.mrb[151].mxu1 }
 0x561   : > { %3903 = vxpose.xlu0.b32.cont [3/16] (narrow) %v7074_v29, 8  ;;  %3999 = vxpose.xlu1.b32.cont [3/16] (narrow) %v3832_v13, 8  ;;  %v4080_v13 = vld [vmem:[%s8005_s7 + $0x98] sm:$0xff] }
 0x563   : > { %v6429_v17 = vpop.f32.mrb[152].mxu1 }
 0x564   : > { %v3852_v18 = vpop.f32.mrb[153].mxu1 }
 0x565   : > { %3904 = vxpose.xlu0.b32.cont [4/16] (narrow) %v7072_v28, 8  ;;  %4000 = vxpose.xlu1.b32.cont [4/16] (narrow) %v6423_v12, 8  ;;  %v4081_v12 = vld [vmem:[%s8005_s7 + $0xa0] sm:$0xff] }
 0x567   : > { %v6432_v19 = vpop.f32.mrb[154].mxu1 }
 0x568   : > { %v3862_v20 = vpop.f32.mrb[155].mxu1 }
 0x569   : > { %3905 = vxpose.xlu0.b32.cont [5/16] (narrow) %v7078_v31, 8  ;;  %4001 = vxpose.xlu1.b32.cont [5/16] (narrow) %v3842_v15, 8  ;;  %v4083_v15 = vld [vmem:[%s8005_s7 + $0xb0] sm:$0xff] }
 0x56b   : > { %v6435_v21 = vpop.f32.mrb[156].mxu1 }
 0x56c   : > { %v3872_v22 = vpop.f32.mrb[157].mxu1 }
 0x56d   : > { %3906 = vxpose.xlu0.b32.cont [6/16] (narrow) %v7076_v30, 8  ;;  %4002 = vxpose.xlu1.b32.cont [6/16] (narrow) %v6426_v14, 8  ;;  %v7381_v14 = vld [vmem:[%s8004_s6 + $0x88] sm:$0xff] }
 0x56f   : > { %v6438_v23 = vpop.f32.mrb[158].mxu1 }
 0x570   : > { %v3882_v24 = vpop.f32.mrb[159].mxu1 }
 0x571   : > { %3907 = vxpose.xlu0.b32.cont [7/16] (narrow) %v7082_v33, 8  ;;  %4003 = vxpose.xlu1.b32.cont [7/16] (narrow) %v3852_v18, 8  ;;  %v7398_v18 = vld [vmem:[%s8004_s6 + $0x90] sm:$0xff] }
 0x573   : > { %v6441_v25 = vpop.f32.mrb[160].mxu1 }
 0x574   : > { %v3892_v26 = vpop.f32.mrb[161].mxu1 }
 0x575   : > { %3908 = vxpose.xlu0.b32.cont [8/16] (narrow) %v7080_v32, 8  ;;  %4004 = vxpose.xlu1.b32.cont [8/16] (narrow) %v6429_v17, 8  ;;  %v4082_v17 = vld [vmem:[%s8005_s7 + $0xa8] sm:$0xff] }
 0x579   : > { %3909 = vxpose.xlu0.b32.cont [9/16] (narrow) %v7086_v35, 8  ;;  %4005 = vxpose.xlu1.b32.cont [9/16] (narrow) %v3862_v20, 8  ;;  %v4084_v20 = vld [vmem:[%s8005_s7 + $0xb8] sm:$0xff] }
 0x57d   : > { %3910 = vxpose.xlu0.b32.cont [10/16] (narrow) %v7084_v34, 8  ;;  %4006 = vxpose.xlu1.b32.cont [10/16] (narrow) %v6432_v19, 8  ;;  %v4085_v19 = vld [vmem:[%s8005_s7 + $0xc0] sm:$0xff] }
 0x581   : > { %3911 = vxpose.xlu0.b32.cont [11/16] (narrow) %v7090_v37, 8  ;;  %4007 = vxpose.xlu1.b32.cont [11/16] (narrow) %v3872_v22, 8  ;;  %v7186_v37 = vld [vmem:[%s8004_s6 + $0x8] sm:$0xff]  ;;  %v4087_v22 = vld [vmem:[%s8005_s7 + $0xd0] sm:$0xff] }
 0x585   : > { %3912 = vxpose.xlu0.b32.cont [12/16] (narrow) %v7088_v36, 8  ;;  %4008 = vxpose.xlu1.b32.cont [12/16] (narrow) %v6435_v21, 8  ;;  %v7178_v36 = vld [vmem:[%s8004_s6] sm:$0xff]  ;;  %v7415_v21 = vld [vmem:[%s8004_s6 + $0x98] sm:$0xff] }
 0x589   : > { %3913 = vxpose.xlu0.b32.cont [13/16] (narrow) %v7094_v39, 8  ;;  %4009 = vxpose.xlu1.b32.cont [13/16] (narrow) %v3882_v24, 8  ;;  %v7202_v39 = vld [vmem:[%s8004_s6 + $0x18] sm:$0xff]  ;;  %v7432_v24 = vld [vmem:[%s8004_s6 + $0xa0] sm:$0xff] }
 0x58d   : > { %3914 = vxpose.xlu0.b32.cont [14/16] (narrow) %v7092_v38, 8  ;;  %4010 = vxpose.xlu1.b32.cont [14/16] (narrow) %v6438_v23, 8  ;;  %v7194_v38 = vld [vmem:[%s8004_s6 + $0x10] sm:$0xff]  ;;  %v4086_v23 = vld [vmem:[%s8005_s7 + $0xc8] sm:$0xff] }
 0x591   : > { %3915 = vxpose.xlu0.b32.cont [15/16] (narrow) %v7098_v41, 8  ;;  %4011 = vxpose.xlu1.b32.cont [15/16] (narrow) %v3892_v26, 8  ;;  %v6599_v41 = vmov 0   ;;  %v4088_v26 = vld [vmem:[%s8005_s7 + $0xd8] sm:$0xff] }
 0x595   : > { %3916 = vxpose.xlu0.b32.end [16/16] (narrow) %v7096_v40, 8  ;;  %4012 = vxpose.xlu1.b32.end [16/16] (narrow) %v6441_v25, 8  ;;  %v7210_v40 = vld [vmem:[%s8004_s6 + $0x20] sm:$0xff] }
 0x596   : > { %v4089_v25 = vld [vmem:[%s8005_s7 + $0xe0] sm:$0xff] }
 0x599   : > { %3965 = vxpose.xlu1.b32.start [1/16] (narrow) %v7102_v59, 8  ;;  %v3949_v27 = vpop.trf.xlu0  ;;  %v4070_v59 = vld [vmem:[%s8005_s7 + $0x48] sm:$0xff] }
 0x59a   : > { %4094 = vst [vmem:[%s7155_s17 + $0x8] sm:$0xff] %v3949_v27  ;;  %v4096_v28 = vmul.f32 0.2, %v3949_v27 }
 0x59c   : > { %v4098_v29 = vmax.f32 %v3949_v27, %v4096_v28  ;;  %v7449_v27 = vld [vmem:[%s8004_s6 + $0xa8] sm:$0xff]  ;;  %v4091_v28 = vld [vmem:[%s8005_s7 + $0xf0] sm:$0xff] }
 0x59d   : > { %3966 = vxpose.xlu1.b32.cont [2/16] (narrow) %v7100_v58, 8  ;;  %v4071_v58 = vld [vmem:[%s8005_s7 + $0x50] sm:$0xff] }
 0x59e   : > { %4355 = vmatprep.subr.mxu0 %v4098_v29  ;;  %v4090_v29 = vld [vmem:[%s8005_s7 + $0xe8] sm:$0xff] }
 0x5a1   : > { %3967 = vxpose.xlu1.b32.cont [3/16] (narrow) %v7106_v61, 8  ;;  %v4073_v61 = vld [vmem:[%s8005_s7 + $0x60] sm:$0xff] }
 0x5a5   : > { %3968 = vxpose.xlu1.b32.cont [4/16] (narrow) %v7104_v60, 8  ;;  %v7307_v60 = vld [vmem:[%s8004_s6 + $0x60] sm:$0xff] }
 0x5a9   : > { %3969 = vxpose.xlu1.b32.cont [5/16] (narrow) %v7110_v63, 8  ;;  %v7321_v63 = vld [vmem:[%s8004_s6 + $0x68] sm:$0xff] }
 0x5ad   : > { %3970 = vxpose.xlu1.b32.cont [6/16] (narrow) %v7108_v62, 8  ;;  %v4072_v62 = vld [vmem:[%s8005_s7 + $0x58] sm:$0xff] }
 0x5b1   : > { %3971 = vxpose.xlu1.b32.cont [7/16] (narrow) %v7114_v1, 8  ;;  %v4074_v1 = vld [vmem:[%s8005_s7 + $0x68] sm:$0xff] }
 0x5b5   : > { %3972 = vxpose.xlu1.b32.cont [8/16] (narrow) %v7112_v0, 8  ;;  %v4075_v0 = vld [vmem:[%s8005_s7 + $0x70] sm:$0xff] }
 0x5b9   : > { %3973 = vxpose.xlu1.b32.cont [9/16] (narrow) %v7118_v3, 8  ;;  %v4077_v3 = vld [vmem:[%s8005_s7 + $0x80] sm:$0xff] }
 0x5bd   : > { %3974 = vxpose.xlu1.b32.cont [10/16] (narrow) %v7116_v2, 8  ;;  %v7335_v2 = vld [vmem:[%s8004_s6 + $0x70] sm:$0xff] }
 0x5be   : > { %6500 = vset.pattern.permute.xlu0 %v6599_v41 }
 0x5bf   : > { %4101 = vperm.xlu0 %6500, %v4061_v44  }
 0x5c1   : > { %3975 = vxpose.xlu1.b32.cont [11/16] (narrow) %v7122_v5, 8  ;;  %v7349_v5 = vld [vmem:[%s8004_s6 + $0x78] sm:$0xff] }
 0x5c3   : > { %4126 = vperm.xlu0 %6500, %v4066_v53  }
 0x5c5   : > { %3976 = vxpose.xlu1.b32.cont [12/16] (narrow) %v7120_v4, 8  ;;  %v4076_v4 = vld [vmem:[%s8005_s7 + $0x78] sm:$0xff] }
 0x5c7   : > { %4136 = vperm.xlu0 %6500, %v4068_v56  }
 0x5c9   : > { %3977 = vxpose.xlu1.b32.cont [13/16] (narrow) %v7126_v7, 8  ;;  %v4079_v7 = vld [vmem:[%s8005_s7 + $0x90] sm:$0xff] }
 0x5cb   : > { %4146 = vperm.xlu0 %6500, %v4070_v59  }
 0x5cd   : > { %3978 = vxpose.xlu1.b32.cont [14/16] (narrow) %v7124_v6, 8 }
 0x5cf   : > { %4156 = vperm.xlu0 %6500, %v4072_v62  }
 0x5d1   : > { %3979 = vxpose.xlu1.b32.cont [15/16] (narrow) %v7130_v9, 8  ;;  %v4078_v9 = vld [vmem:[%s8005_s7 + $0x88] sm:$0xff] }
 0x5d3   : > { %4166 = vperm.xlu0 %6500, %v4074_v1  }
 0x5d5   : > { %3980 = vxpose.xlu1.b32.end [16/16] (narrow) %v7128_v8, 8 }
 0x5d7   : > { %4176 = vperm.xlu0 %6500, %v4076_v4  }
 0x5d9   : > { %v4013_v30 = vpop.trf.xlu1  ;;  %v3917_v31 = vpop.trf.xlu0 }
 0x5da   : > { %5506 = vst [vmem:[%s7155_s17 + $0x18] sm:$0xff] %v4013_v30  ;;  %v4680_v32 = vmul.f32 0.2, %v4013_v30  ;;  %4093 = vst [vmem:[%s7155_s17] sm:$0xff] %v3917_v31  ;;  %v4095_v33 = vmul.f32 0.2, %v3917_v31 }
 0x5db   : > { %4186 = vperm.xlu0 %6500, %v4078_v9  }
 0x5dc   : > { %v4682_v34 = vmax.f32 %v4013_v30, %v4680_v32  ;;  %v4097_v35 = vmax.f32 %v3917_v31, %v4095_v33  ;;  %v7466_v30 = vld [vmem:[%s8004_s6 + $0xb0] sm:$0xff]  ;;  %v4092_v31 = vld [vmem:[%s8005_s7 + $0xf8] sm:$0xff]  ;;  %v4053_v33 = vld [vmem:[%s8004_s6 + $0xc0] sm:$0xff] }
 0x5dd   : > { %v4052_v32 = vld [vmem:[%s8004_s6 + $0xb8] sm:$0xff] }
 0x5de   : > { %4683 = vmatprep.subr.mxu1 %v4682_v34  ;;  %4356 = vmatpush1.msra.mxu0 %v4097_v35  ;;  %v4054_v34 = vld [vmem:[%s8004_s6 + $0xc8] sm:$0xff]  ;;  %v4055_v35 = vld [vmem:[%s8004_s6 + $0xd0] sm:$0xff] }
 0x5df   : > { %5473 = vmatmul.mubr.msk.f32.vlgmr.msra.gmra.mrb[158].mxu0 %vm1205_vm1, %v7178_v36  ;;  %4196 = vperm.xlu0 %6500, %v4080_v13  }
 0x5e0   : > { %4425 = vmatprep.mubr.f32.mxu0 %v6598_v16 }
 0x5e3   : > { %5474 = vmatmul.mubr.msk.f32.gmra.mrb[160].mxu0 %vm1205_vm1, %v7186_v37  ;;  %4206 = vperm.xlu0 %6500, %v4082_v17  }
 0x5e4   : > { %4431 = vmatprep.mubr.f32.mxu0 %v6598_v16 }
 0x5e7   : > { %5475 = vmatmul.mubr.msk.f32.gmra.mrb[162].mxu0 %vm1205_vm1, %v7194_v38  ;;  %4216 = vperm.xlu0 %6500, %v4084_v20  }
 0x5e8   : > { %4437 = vmatprep.mubr.f32.mxu0 %v6598_v16 }
 0x5eb   : > { %5476 = vmatmul.mubr.msk.f32.gmra.mrb[164].mxu0 %vm1205_vm1, %v7202_v39  ;;  %4226 = vperm.xlu0 %6500, %v4086_v23  }
 0x5ec   : > { %4443 = vmatprep.mubr.f32.mxu0 %v6598_v16 }
 0x5ef   : > { %5477 = vmatmul.mubr.msk.f32.gmra.mrb[166].mxu0 %vm1205_vm1, %v7210_v40  ;;  %4236 = vperm.xlu0 %6500, %v4088_v26  }
 0x5f0   : > { %4449 = vmatprep.mubr.f32.mxu0 %v6598_v16 }
 0x5f3   : > { %5478 = vmatmul.mubr.msk.f32.gmra.mrb[168].mxu0 %vm1205_vm1, %v7218_v42  ;;  %6501 = vset.pattern.permute.xlu1 %v6599_v41 }
 0x5f4   : > { %4455 = vmatprep.mubr.f32.mxu0 %v6598_v16  ;;  %4106 = vperm.xlu1 %6501, %v4062_v43  }
 0x5f5   : > { %4246 = vperm.xlu0 %6500, %v4090_v29  }
 0x5f7   : > { %5479 = vmatmul.mubr.msk.f32.gmra.mrb[170].mxu0 %vm1205_vm1, %v7232_v45 }
 0x5f8   : > { %4461 = vmatprep.mubr.f32.mxu0 %v6598_v16  ;;  %4111 = vperm.xlu1 %6501, %v4063_v46  }
 0x5f9   : > { %4256 = vperm.xlu0 %6500, %v4092_v31  }
 0x5fb   : > { %5480 = vmatmul.mubr.msk.f32.gmra.mrb[172].mxu0 %vm1205_vm1, %v7243_v47 }
 0x5fc   : > { %4467 = vmatprep.mubr.f32.mxu0 %v6598_v16  ;;  %4116 = vperm.xlu1 %6501, %v4064_v48  }
 0x5ff   : > { %5481 = vmatmul.mubr.msk.f32.gmra.mrb[174].mxu0 %vm1205_vm1, %v7254_v49 }
 0x600   : > { %4473 = vmatprep.mubr.f32.mxu0 %v6598_v16  ;;  %4121 = vperm.xlu1 %6501, %v4065_v50  }
 0x603   : > { %5482 = vmatmul.mubr.msk.f32.gmra.mrb[176].mxu0 %vm1205_vm1, %v7265_v51 }
 0x604   : > { %4479 = vmatprep.mubr.f32.mxu0 %v6598_v16  ;;  %4131 = vperm.xlu1 %6501, %v4067_v52  }
 0x607   : > { %5483 = vmatmul.mubr.msk.f32.gmra.mrb[178].mxu0 %vm1205_vm1, %v7279_v54 }
 0x608   : > { %4485 = vmatprep.mubr.f32.mxu0 %v6598_v16  ;;  %4141 = vperm.xlu1 %6501, %v4069_v55  }
 0x60b   : > { %5484 = vmatmul.mubr.msk.f32.gmra.mrb[180].mxu0 %vm1205_vm1, %v7293_v57 }
 0x60c   : > { %4491 = vmatprep.mubr.f32.mxu0 %v6598_v16  ;;  %4151 = vperm.xlu1 %6501, %v4071_v58  }
 0x60f   : > { %5485 = vmatmul.mubr.msk.f32.gmra.mrb[182].mxu0 %vm1205_vm1, %v7307_v60 }
 0x610   : > { %4497 = vmatprep.mubr.f32.mxu0 %v6598_v16  ;;  %4161 = vperm.xlu1 %6501, %v4073_v61  }
 0x613   : > { %5486 = vmatmul.mubr.msk.f32.gmra.mrb[184].mxu0 %vm1205_vm1, %v7321_v63 }
 0x614   : > { %4503 = vmatprep.mubr.f32.mxu0 %v6598_v16  ;;  %4171 = vperm.xlu1 %6501, %v4075_v0  }
 0x617   : > { %5487 = vmatmul.mubr.msk.f32.gmra.mrb[186].mxu0 %vm1205_vm1, %v7335_v2 }
 0x618   : > { %4509 = vmatprep.mubr.f32.mxu0 %v6598_v16  ;;  %4181 = vperm.xlu1 %6501, %v4077_v3  }
 0x619   : > { %v3981_v6 = vpop.trf.xlu1 }
 0x61a   : > { %5505 = vst [vmem:[%s7155_s17 + $0x10] sm:$0xff] %v3981_v6  ;;  %v4679_v8 = vmul.f32 0.2, %v3981_v6 }
 0x61b   : > { %5488 = vmatmul.mubr.msk.f32.gmra.mrb[188].mxu0 %vm1205_vm1, %v7349_v5 }
 0x61c   : > { %v4681_v10 = vmax.f32 %v3981_v6, %v4679_v8  ;;  %4515 = vmatprep.mubr.f32.mxu0 %v6598_v16  ;;  %4191 = vperm.xlu1 %6501, %v4079_v7  }
 0x61e   : > { %4684 = vmatpush1.msra.mxu1 %v4681_v10 }
 0x61f   : > { %5507 = vmatmul.mubr.msk.f32.vlgmr.msra.gmra.mrb[162].mxu1 %vm1205_vm1, %v7178_v36  ;;  %5489 = vmatmul.mubr.msk.f32.gmra.mrb[190].mxu0 %vm1205_vm1, %v7364_v11  ;;  %v4056_v36 = vld [vmem:[%s8004_s6 + $0xd8] sm:$0xff] }
 0x620   : > { %4753 = vmatprep.mubr.f32.mxu1 %v6598_v16  ;;  %4521 = vmatprep.mubr.f32.mxu0 %v6598_v16 }
 0x621   : > { %4201 = vperm.xlu1 %6501, %v4081_v12  }
 0x623   : > { %5508 = vmatmul.mubr.msk.f32.gmra.mrb[164].mxu1 %vm1205_vm1, %v7186_v37  ;;  %5490 = vmatmul.mubr.msk.f32.gmra.mrb[192].mxu0 %vm1205_vm1, %v7381_v14  ;;  %v4057_v37 = vld [vmem:[%s8004_s6 + $0xe0] sm:$0xff] }
 0x624   : > { %4759 = vmatprep.mubr.f32.mxu1 %v6598_v16  ;;  %4527 = vmatprep.mubr.f32.mxu0 %v6598_v16 }
 0x625   : > { %4211 = vperm.xlu1 %6501, %v4083_v15  }
 0x627   : > { %5509 = vmatmul.mubr.msk.f32.gmra.mrb[166].mxu1 %vm1205_vm1, %v7194_v38  ;;  %5491 = vmatmul.mubr.msk.f32.gmra.mrb[194].mxu0 %vm1205_vm1, %v7398_v18  ;;  %v4058_v38 = vld [vmem:[%s8004_s6 + $0xe8] sm:$0xff] }
 0x628   : > { %4765 = vmatprep.mubr.f32.mxu1 %v6598_v16  ;;  %4533 = vmatprep.mubr.f32.mxu0 %v6598_v16 }
 0x629   : > { %4221 = vperm.xlu1 %6501, %v4085_v19  }
 0x62b   : > { %5510 = vmatmul.mubr.msk.f32.gmra.mrb[168].mxu1 %vm1205_vm1, %v7202_v39  ;;  %5492 = vmatmul.mubr.msk.f32.gmra.mrb[196].mxu0 %vm1205_vm1, %v7415_v21  ;;  %v4059_v39 = vld [vmem:[%s8004_s6 + $0xf0] sm:$0xff] }
 0x62c   : > { %4771 = vmatprep.mubr.f32.mxu1 %v6598_v16  ;;  %4539 = vmatprep.mubr.f32.mxu0 %v6598_v16 }
 0x62d   : > { %4231 = vperm.xlu1 %6501, %v4087_v22  }
 0x62f   : > { %5511 = vmatmul.mubr.msk.f32.gmra.mrb[170].mxu1 %vm1205_vm1, %v7210_v40  ;;  %5493 = vmatmul.mubr.msk.f32.gmra.mrb[198].mxu0 %vm1205_vm1, %v7432_v24  ;;  %v4060_v40 = vld [vmem:[%s8004_s6 + $0xf8] sm:$0xff] }
 0x630   : > { %4777 = vmatprep.mubr.f32.mxu1 %v6598_v16  ;;  %4545 = vmatprep.mubr.f32.mxu0 %v6598_v16 }
 0x631   : > { %4241 = vperm.xlu1 %6501, %v4089_v25  }
 0x633   : > { %5512 = vmatmul.mubr.msk.f32.gmra.mrb[172].mxu1 %vm1205_vm1, %v7218_v42  ;;  %5494 = vmatmul.mubr.msk.f32.gmra.mrb[200].mxu0 %vm1205_vm1, %v7449_v27 }
 0x634   : > { %4783 = vmatprep.mubr.f32.mxu1 %v6598_v16  ;;  %4551 = vmatprep.mubr.f32.mxu0 %v6598_v16 }
 0x635   : > { %4251 = vperm.xlu1 %6501, %v4091_v28  }
 0x637   : > { %5513 = vmatmul.mubr.msk.f32.gmra.mrb[174].mxu1 %vm1205_vm1, %v7232_v45  ;;  %5495 = vmatmul.mubr.msk.f32.gmra.mrb[202].mxu0 %vm1205_vm1, %v7466_v30 }
 0x638   : > { %4789 = vmatprep.mubr.f32.mxu1 %v6598_v16  ;;  %4557 = vmatprep.mubr.f32.mxu0 %v6598_v16 }
 0x63b   : > { %5514 = vmatmul.mubr.msk.f32.gmra.mrb[176].mxu1 %vm1205_vm1, %v7243_v47  ;;  %5496 = vmatmul.mubr.msk.f32.gmra.mrb[204].mxu0 %vm1205_vm1, %v4052_v32 }
 0x63c   : > { %4795 = vmatprep.mubr.f32.mxu1 %v6598_v16  ;;  %4563 = vmatprep.mubr.f32.mxu0 %v6598_v16 }
 0x63e   : > { %v7589_v42 = vpop.permute.xlu0 %4101 }
 0x63f   : > { %5515 = vmatmul.mubr.msk.f32.gmra.mrb[178].mxu1 %vm1205_vm1, %v7254_v49  ;;  %5497 = vmatmul.mubr.msk.f32.gmra.mrb[206].mxu0 %vm1205_vm1, %v4053_v33 }
 0x640   : > { %4801 = vmatprep.mubr.f32.mxu1 %v6598_v16  ;;  %4569 = vmatprep.mubr.f32.mxu0 %v6598_v16 }
 0x643   : > { %5516 = vmatmul.mubr.msk.f32.gmra.mrb[180].mxu1 %vm1205_vm1, %v7265_v51  ;;  %5498 = vmatmul.mubr.msk.f32.gmra.mrb[208].mxu0 %vm1205_vm1, %v4054_v34 }
 0x644   : > { %4807 = vmatprep.mubr.f32.mxu1 %v6598_v16  ;;  %4575 = vmatprep.mubr.f32.mxu0 %v6598_v16 }
 0x647   : > { %5517 = vmatmul.mubr.msk.f32.gmra.mrb[182].mxu1 %vm1205_vm1, %v7279_v54  ;;  %5499 = vmatmul.mubr.msk.f32.gmra.mrb[210].mxu0 %vm1205_vm1, %v4055_v35 }
 0x648   : > { %4813 = vmatprep.mubr.f32.mxu1 %v6598_v16  ;;  %4581 = vmatprep.mubr.f32.mxu0 %v6598_v16 }
 0x64b   : > { %5518 = vmatmul.mubr.msk.f32.gmra.mrb[184].mxu1 %vm1205_vm1, %v7293_v57  ;;  %5500 = vmatmul.mubr.msk.f32.gmra.mrb[212].mxu0 %vm1205_vm1, %v4056_v36 }
 0x64c   : > { %4819 = vmatprep.mubr.f32.mxu1 %v6598_v16  ;;  %4587 = vmatprep.mubr.f32.mxu0 %v6598_v16 }
 0x64f   : > { %5519 = vmatmul.mubr.msk.f32.gmra.mrb[186].mxu1 %vm1205_vm1, %v7307_v60  ;;  %5501 = vmatmul.mubr.msk.f32.gmra.mrb[214].mxu0 %vm1205_vm1, %v4057_v37 }
 0x650   : > { %4825 = vmatprep.mubr.f32.mxu1 %v6598_v16  ;;  %4593 = vmatprep.mubr.f32.mxu0 %v6598_v16 }
 0x653   : > { %5520 = vmatmul.mubr.msk.f32.gmra.mrb[188].mxu1 %vm1205_vm1, %v7321_v63  ;;  %5502 = vmatmul.mubr.msk.f32.gmra.mrb[216].mxu0 %vm1205_vm1, %v4058_v38 }
 0x654   : > { %4831 = vmatprep.mubr.f32.mxu1 %v6598_v16  ;;  %4599 = vmatprep.mubr.f32.mxu0 %v6598_v16 }
 0x657   : > { %5521 = vmatmul.mubr.msk.f32.gmra.mrb[190].mxu1 %vm1205_vm1, %v7335_v2  ;;  %5503 = vmatmul.mubr.msk.f32.gmra.mrb[218].mxu0 %vm1205_vm1, %v4059_v39  ;;  %v7619_v2 = vpop.permute.xlu0 %4126 }
 0x658   : > { %4837 = vmatprep.mubr.f32.mxu1 %v6598_v16  ;;  %4605 = vmatprep.mubr.f32.mxu0 %v6598_v16 }
 0x65b   : > { %5522 = vmatmul.mubr.msk.f32.gmra.mrb[192].mxu1 %vm1205_vm1, %v7349_v5  ;;  %5504 = vmatmul.mubr.msk.f32.gmra.mrb[220].mxu0 %vm1205_vm1, %v4060_v40  ;;  %v7631_v12 = vpop.permute.xlu0 %4136 }
 0x65c   : > { %4843 = vmatprep.mubr.f32.mxu1 %v6598_v16 }
 0x65f   : > { %5523 = vmatmul.mubr.msk.f32.gmra.mrb[194].mxu1 %vm1205_vm1, %v7364_v11  ;;  %v7643_v23 = vpop.permute.xlu0 %4146 }
 0x660   : > { %4849 = vmatprep.mubr.f32.mxu1 %v6598_v16 }
 0x663   : > { %5524 = vmatmul.mubr.msk.f32.gmra.mrb[196].mxu1 %vm1205_vm1, %v7381_v14 }
 0x664   : > { %4855 = vmatprep.mubr.f32.mxu1 %v6598_v16 }
 0x667   : > { %5525 = vmatmul.mubr.msk.f32.gmra.mrb[198].mxu1 %vm1205_vm1, %v7398_v18 }
 0x668   : > { %4861 = vmatprep.mubr.f32.mxu1 %v6598_v16 }
 0x66b   : > { %5526 = vmatmul.mubr.msk.f32.gmra.mrb[200].mxu1 %vm1205_vm1, %v7415_v21 }
 0x66c   : > { %4867 = vmatprep.mubr.f32.mxu1 %v6598_v16 }
 0x66f   : > { %5527 = vmatmul.mubr.msk.f32.gmra.mrb[202].mxu1 %vm1205_vm1, %v7432_v24 }
 0x670   : > { %4873 = vmatprep.mubr.f32.mxu1 %v6598_v16 }
 0x673   : > { %5528 = vmatmul.mubr.msk.f32.gmra.mrb[204].mxu1 %vm1205_vm1, %v7449_v27  ;;  %v7587_v41 = vpop.permute.xlu1 %4106 }
 0x674   : > { %4879 = vmatprep.mubr.f32.mxu1 %v6598_v16 }
 0x677   : > { %5529 = vmatmul.mubr.msk.f32.gmra.mrb[206].mxu1 %vm1205_vm1, %v7466_v30 }
 0x678   : > { %4885 = vmatprep.mubr.f32.mxu1 %v6598_v16 }
 0x67b   : > { %5530 = vmatmul.mubr.msk.f32.gmra.mrb[208].mxu1 %vm1205_vm1, %v4052_v32 }
 0x67c   : > { %4891 = vmatprep.mubr.f32.mxu1 %v6598_v16 }
 0x67f   : > { %5531 = vmatmul.mubr.msk.f32.gmra.mrb[210].mxu1 %vm1205_vm1, %v4053_v33  ;;  %v7655_v33 = vpop.permute.xlu0 %4156 }
 0x680   : > { %4897 = vmatprep.mubr.f32.mxu1 %v6598_v16 }
 0x683   : > { %5532 = vmatmul.mubr.msk.f32.gmra.mrb[212].mxu1 %vm1205_vm1, %v4054_v34 }
 0x684   : > { %4903 = vmatprep.mubr.f32.mxu1 %v6598_v16 }
 0x687   : > { %5533 = vmatmul.mubr.msk.f32.gmra.mrb[214].mxu1 %vm1205_vm1, %v4055_v35 }
 0x688   : > { %4909 = vmatprep.mubr.f32.mxu1 %v6598_v16 }
 0x68b   : > { %5534 = vmatmul.mubr.msk.f32.gmra.mrb[216].mxu1 %vm1205_vm1, %v4056_v36 }
 0x68c   : > { %4915 = vmatprep.mubr.f32.mxu1 %v6598_v16 }
 0x68f   : > { %5535 = vmatmul.mubr.msk.f32.gmra.mrb[218].mxu1 %vm1205_vm1, %v4057_v37 }
 0x690   : > { %4921 = vmatprep.mubr.f32.mxu1 %v6598_v16 }
 0x693   : > { %5536 = vmatmul.mubr.msk.f32.gmra.mrb[220].mxu1 %vm1205_vm1, %v4058_v38 }
 0x694   : > { %4927 = vmatprep.mubr.f32.mxu1 %v6598_v16 }
 0x697   : > { %5537 = vmatmul.mubr.msk.f32.gmra.mrb[222].mxu1 %vm1205_vm1, %v4059_v39 }
 0x698   : > { %4933 = vmatprep.mubr.f32.mxu1 %v6598_v16  ;;  %v7597_v16 = vpop.permute.xlu1 %4111 }
 0x69b   : > { %5538 = vmatmul.mubr.msk.f32.gmra.mrb[224].mxu1 %vm1205_vm1, %v4060_v40 }
 0x69c   : > { %v7605_v55 = vpop.permute.xlu1 %4116 }
 0x6a0   : > { %v7613_v61 = vpop.permute.xlu1 %4121 }
 0x6a4   : > { %v7624_v7 = vpop.permute.xlu1 %4131 }
 0x6a8   : > { %v7636_v18 = vpop.permute.xlu1 %4141 }
 0x6ac   : > { %v7648_v28 = vpop.permute.xlu1 %4151 }
 0x6b0   : > { %v7660_v38 = vpop.permute.xlu1 %4161 }
 0x6b2   : > { %v4421_v43 = vpop.f32.mrb[158].mxu0 }
 0x6b3   : > { %v4422_v44 = vadd.f32 %v4421_v43, %v7589_v42  ;;  %v4423_v45 = vpop.f32.mrb[159].mxu0 }
 0x6b4   : > { %v4424_v46 = vadd.f32 %v4423_v45, %v7589_v42  ;;  %v7667_v45 = vpop.permute.xlu0 %4166 }
 0x6b5   : > { %4612 = vst [vmem:[%s7593_s16] sm:$0xff] %v4422_v44 }
 0x6b6   : > { %4613 = vst [vmem:[%s7593_s16 + $0x8] sm:$0xff] %v4424_v46  ;;  %v4427_v47 = vpop.f32.mrb[160].mxu0 }
 0x6b7   : > { %v4428_v48 = vadd.f32 %v4427_v47, %v7587_v41  ;;  %v4429_v49 = vpop.f32.mrb[161].mxu0 }
 0x6b8   : > { %v4430_v50 = vadd.f32 %v4429_v49, %v7587_v41 }
 0x6b9   : > { %4614 = vst [vmem:[%s7593_s16 + $0x10] sm:$0xff] %v4428_v48 }
 0x6ba   : > { %4615 = vst [vmem:[%s7593_s16 + $0x18] sm:$0xff] %v4430_v50  ;;  %v4433_v51 = vpop.f32.mrb[162].mxu0  ;;  %v7672_v50 = vpop.permute.xlu1 %4171 }
 0x6bb   : > { %v4434_v52 = vadd.f32 %v4433_v51, %v7597_v16  ;;  %v4435_v53 = vpop.f32.mrb[163].mxu0 }
 0x6bc   : > { %v4436_v54 = vadd.f32 %v4435_v53, %v7597_v16 }
 0x6bd   : > { %4616 = vst [vmem:[%s7593_s16 + $0x20] sm:$0xff] %v4434_v52 }
 0x6be   : > { %4617 = vst [vmem:[%s7593_s16 + $0x28] sm:$0xff] %v4436_v54  ;;  %v4439_v56 = vpop.f32.mrb[164].mxu0 }
 0x6bf   : > { %v4440_v57 = vadd.f32 %v4439_v56, %v7605_v55  ;;  %v4441_v58 = vpop.f32.mrb[165].mxu0  ;;  %v7680_v56 = vpop.permute.xlu0 %4176 }
 0x6c0   : > { %v4442_v59 = vadd.f32 %v4441_v58, %v7605_v55 }
 0x6c1   : > { %4618 = vst [vmem:[%s7593_s16 + $0x30] sm:$0xff] %v4440_v57 }
 0x6c2   : > { %4619 = vst [vmem:[%s7593_s16 + $0x38] sm:$0xff] %v4442_v59  ;;  %v4445_v60 = vpop.f32.mrb[166].mxu0 }
 0x6c3   : > { %v4447_v62 = vpop.f32.mrb[167].mxu0  ;;  %v4446_v63 = vadd.f32 %v4445_v60, %v7613_v61  ;;  %v7686_v60 = vpop.permute.xlu1 %4181 }
 0x6c4   : > { %v4448_v0 = vadd.f32 %v4447_v62, %v7613_v61 }
 0x6c5   : > { %4620 = vst [vmem:[%s7593_s16 + $0x40] sm:$0xff] %v4446_v63 }
 0x6c6   : > { %4621 = vst [vmem:[%s7593_s16 + $0x48] sm:$0xff] %v4448_v0  ;;  %v4451_v1 = vpop.f32.mrb[168].mxu0 }
 0x6c7   : > { %v4453_v3 = vpop.f32.mrb[169].mxu0  ;;  %v4452_v4 = vadd.f32 %v4451_v1, %v7619_v2 }
 0x6c8   : > { %v4454_v5 = vadd.f32 %v4453_v3, %v7619_v2 }
 0x6c9   : > { %4622 = vst [vmem:[%s7593_s16 + $0x50] sm:$0xff] %v4452_v4 }
 0x6ca   : > { %v4457_v6 = vpop.f32.mrb[170].mxu0  ;;  %4623 = vst [vmem:[%s7593_s16 + $0x58] sm:$0xff] %v4454_v5 }
 0x6cb   : > { %v4459_v8 = vpop.f32.mrb[171].mxu0  ;;  %v4458_v9 = vadd.f32 %v4457_v6, %v7624_v7 }
 0x6cc   : > { %v4460_v10 = vadd.f32 %v4459_v8, %v7624_v7 }
 0x6cd   : > { %4624 = vst [vmem:[%s7593_s16 + $0x60] sm:$0xff] %v4458_v9 }
 0x6ce   : > { %4625 = vst [vmem:[%s7593_s16 + $0x68] sm:$0xff] %v4460_v10  ;;  %v4463_v11 = vpop.f32.mrb[172].mxu0 }
 0x6cf   : > { %v4465_v13 = vpop.f32.mrb[173].mxu0  ;;  %v4464_v14 = vadd.f32 %v4463_v11, %v7631_v12 }
 0x6d0   : > { %v4466_v15 = vadd.f32 %v4465_v13, %v7631_v12 }
 0x6d1   : > { %4626 = vst [vmem:[%s7593_s16 + $0x70] sm:$0xff] %v4464_v14 }
 0x6d2   : > { %v4469_v17 = vpop.f32.mrb[174].mxu0  ;;  %4627 = vst [vmem:[%s7593_s16 + $0x78] sm:$0xff] %v4466_v15 }
 0x6d3   : > { %v4471_v19 = vpop.f32.mrb[175].mxu0  ;;  %v4470_v20 = vadd.f32 %v4469_v17, %v7636_v18 }
 0x6d4   : > { %v4472_v21 = vadd.f32 %v4471_v19, %v7636_v18 }
 0x6d5   : > { %4628 = vst [vmem:[%s7593_s16 + $0x80] sm:$0xff] %v4470_v20 }
 0x6d6   : > { %4629 = vst [vmem:[%s7593_s16 + $0x88] sm:$0xff] %v4472_v21  ;;  %v4475_v22 = vpop.f32.mrb[176].mxu0 }
 0x6d7   : > { %v4477_v24 = vpop.f32.mrb[177].mxu0  ;;  %v4476_v25 = vadd.f32 %v4475_v22, %v7643_v23 }
 0x6d8   : > { %v4478_v26 = vadd.f32 %v4477_v24, %v7643_v23 }
 0x6d9   : > { %4630 = vst [vmem:[%s7593_s16 + $0x90] sm:$0xff] %v4476_v25 }
 0x6da   : > { %v4481_v27 = vpop.f32.mrb[178].mxu0  ;;  %4631 = vst [vmem:[%s7593_s16 + $0x98] sm:$0xff] %v4478_v26 }
 0x6db   : > { %v4483_v29 = vpop.f32.mrb[179].mxu0  ;;  %v4482_v30 = vadd.f32 %v4481_v27, %v7648_v28 }
 0x6dc   : > { %v4484_v31 = vadd.f32 %v4483_v29, %v7648_v28 }
 0x6dd   : > { %4632 = vst [vmem:[%s7593_s16 + $0xa0] sm:$0xff] %v4482_v30 }
 0x6de   : > { %4633 = vst [vmem:[%s7593_s16 + $0xa8] sm:$0xff] %v4484_v31  ;;  %v4487_v32 = vpop.f32.mrb[180].mxu0 }
 0x6df   : > { %v4489_v34 = vpop.f32.mrb[181].mxu0  ;;  %v4488_v35 = vadd.f32 %v4487_v32, %v7655_v33 }
 0x6e0   : > { %v4490_v36 = vadd.f32 %v4489_v34, %v7655_v33 }
 0x6e1   : > { %4634 = vst [vmem:[%s7593_s16 + $0xb0] sm:$0xff] %v4488_v35 }
 0x6e2   : > { %v4493_v37 = vpop.f32.mrb[182].mxu0  ;;  %4635 = vst [vmem:[%s7593_s16 + $0xb8] sm:$0xff] %v4490_v36 }
 0x6e3   : > { %v4495_v39 = vpop.f32.mrb[183].mxu0  ;;  %v4494_v40 = vadd.f32 %v4493_v37, %v7660_v38 }
 0x6e4   : > { %v4496_v43 = vadd.f32 %v4495_v39, %v7660_v38 }
 0x6e5   : > { %4636 = vst [vmem:[%s7593_s16 + $0xc0] sm:$0xff] %v4494_v40 }
 0x6e6   : > { %4637 = vst [vmem:[%s7593_s16 + $0xc8] sm:$0xff] %v4496_v43  ;;  %v4499_v44 = vpop.f32.mrb[184].mxu0 }
 0x6e7   : > { %v4501_v46 = vpop.f32.mrb[185].mxu0  ;;  %v4500_v47 = vadd.f32 %v4499_v44, %v7667_v45 }
 0x6e8   : > { %v4502_v48 = vadd.f32 %v4501_v46, %v7667_v45 }
 0x6e9   : > { %4638 = vst [vmem:[%s7593_s16 + $0xd0] sm:$0xff] %v4500_v47 }
 0x6ea   : > { %v4505_v49 = vpop.f32.mrb[186].mxu0  ;;  %4639 = vst [vmem:[%s7593_s16 + $0xd8] sm:$0xff] %v4502_v48 }
 0x6eb   : > { %v4507_v51 = vpop.f32.mrb[187].mxu0  ;;  %v4506_v52 = vadd.f32 %v4505_v49, %v7672_v50 }
 0x6ec   : > { %v4508_v53 = vadd.f32 %v4507_v51, %v7672_v50 }
 0x6ed   : > { %4640 = vst [vmem:[%s7593_s16 + $0xe0] sm:$0xff] %v4506_v52 }
 0x6ee   : > { %4641 = vst [vmem:[%s7593_s16 + $0xe8] sm:$0xff] %v4508_v53  ;;  %v4511_v54 = vpop.f32.mrb[188].mxu0 }
 0x6ef   : > { %v4513_v57 = vpop.f32.mrb[189].mxu0  ;;  %v4512_v58 = vadd.f32 %v4511_v54, %v7680_v56 }
 0x6f0   : > { %v4514_v59 = vadd.f32 %v4513_v57, %v7680_v56 }
 0x6f1   : > { %4642 = vst [vmem:[%s7593_s16 + $0xf0] sm:$0xff] %v4512_v58 }
 0x6f2   : > { %v4749_v62 = vpop.f32.mrb[162].mxu1  ;;  %v4517_v63 = vpop.f32.mrb[190].mxu0  ;;  %4643 = vst [vmem:[%s7593_s16 + $0xf8] sm:$0xff] %v4514_v59 }
 0x6f3   : > { %v4750_v0 = vadd.f32 %v4749_v62, %v7589_v42  ;;  %v4751_v1 = vpop.f32.mrb[163].mxu1  ;;  %v4519_v3 = vpop.f32.mrb[191].mxu0  ;;  %v4518_v4 = vadd.f32 %v4517_v63, %v7686_v60 }
 0x6f4   : > { %v4752_v5 = vadd.f32 %v4751_v1, %v7589_v42  ;;  %v4520_v6 = vadd.f32 %v4519_v3, %v7686_v60 }
 0x6f5   : > { %6515 = shalt.err (!%p6512_p3)
}
 0x6f6   : > { %s6516_s21 = scalar_lea.hbm %s7694_s24, 512  ;;  %s6520_s27 = scalar_lea.hbm %s8006_s8, 1024 }
 0x6f7   : > { %p6517_p4 = scmp.ne.s32.totalorder %s7694_s24, %s6516_s21  ;;  %p6521_p9 = scmp.lt.u32.totalorder %s7694_s24, %s8006_s8 }
 0x6f8   : > { %p6522_p10 = scmp.lt.u32.totalorder %s6520_s27, %s6516_s21  ;;  %p6524_p12 = scmp.lt.u32.totalorder %s6516_s21, %s7694_s24 }
 0x6f9   : > { %p6518_p7 = pnand %p6517_p4, %p6692_p5 }
 0x6fa   : > { %p6523_p11 = por %p6522_p10, %p6521_p9 }
 0x6fb   : > { %p6519_p8 = pneg %p6518_p7 }
 0x6fc   : > { %p6525_p13 = por %p6524_p12, %p6523_p11 }
 0x6fe   : > { %p6526_p0 = pnand %p6525_p13, %p6519_p8 }
 0x700   : > { %6529 = shalt.err (!%p6526_p0)
}
 0x701   : > { %s8008_s26 = smov 256   ;;  %s6602_s29 = smov 16   ;;  %5539 = vst [vmem:[%s7593_s16 + $0x200] sm:$0xff] %v4750_v0  ;;  %4644 = vst [vmem:[%s7593_s16 + $0x100] sm:$0xff] %v4518_v4  ;;  %v7729_v42 = vpop.permute.xlu0 %4186  ;;  %v4755_v8 = vpop.f32.mrb[164].mxu1 }
 0x702   : > { %s8011_s25 = scalar_lea.sflag [#allocation3], %s7150_s14  ;;  %5540 = vst [vmem:[%s7593_s16 + $0x208] sm:$0xff] %v4752_v5  ;;  %4645 = vst [vmem:[%s7593_s16 + $0x108] sm:$0xff] %v4520_v6  ;;  %v4523_v9 = vpop.f32.mrb[192].mxu0  ;;  %v4756_v10 = vadd.f32 %v4755_v8, %v7587_v41  ;;  %v4757_v11 = vpop.f32.mrb[165].mxu1  ;;  %s6603_s28 = smov [#allocation4]  }
 0x703   : > { %6452 = dma.vmem_to_hbm [thread:$0]  (%p6692_p5), %s7684_s22, 512, %s7694_s24, %s8011_s25, %s8008_s26, %s8008_s26, %s6602_s29   ;;  %v4525_v13 = vpop.f32.mrb[193].mxu0  ;;  %v4524_v14 = vadd.f32 %v4523_v9, %v7729_v42  ;;  %v4758_v15 = vadd.f32 %v4757_v11, %v7587_v41  ;;  %v7738_v19 = vpop.permute.xlu1 %4191 }
 0x704   : > { %v4526_v17 = vadd.f32 %v4525_v13, %v7729_v42  ;;  %5541 = vst [vmem:[%s7593_s16 + $0x210] sm:$0xff] %v4756_v10  ;;  %v4761_v20 = vpop.f32.mrb[166].mxu1  ;;  %v4529_v21 = vpop.f32.mrb[194].mxu0  ;;  %s5617_s22 = sshll.u32 %s6675_s13, 14  ;;  %s5042_s24 = sshll.u32 %s7593_s16, 4  ;;  %s7950_s24 = int_to_ptr.vmem [resolvable:$true] %s5042_s24 }
 0x705   : > { %4646 = vst [vmem:[%s7593_s16 + $0x110] sm:$0xff] %v4524_v14  ;;  %5542 = vst [vmem:[%s7593_s16 + $0x218] sm:$0xff] %v4758_v15  ;;  %v4762_v22 = vadd.f32 %v4761_v20, %v7597_v16  ;;  %v4763_v24 = vpop.f32.mrb[167].mxu1  ;;  %v4531_v25 = vpop.f32.mrb[195].mxu0  ;;  %v4530_v26 = vadd.f32 %v4529_v21, %v7738_v19  ;;  %s7948_s23 = scalar_lea.hbm %s8007_s9, %s5617_s22  ;;  %s5011_s13 = scalar_lea.sflag [#allocation5], %s7150_s14 }
 0x706   : > { %4647 = vst [vmem:[%s7593_s16 + $0x118] sm:$0xff] %v4526_v17  ;;  %v4764_v41 = vadd.f32 %v4763_v24, %v7597_v16  ;;  %v4532_v27 = vadd.f32 %v4531_v25, %v7738_v19  ;;  %v7749_v29 = vpop.permute.xlu0 %4196  ;;  %v4767_v30 = vpop.f32.mrb[168].mxu1  ;;  %s6530_s27 = scalar_lea.vmem %s7950_s24, 16384  ;;  %s6534_s25 = sshll.u32 %s6603_s28, 4  ;;  %s6535_s25 = int_to_ptr.vmem [resolvable:$false] %s6534_s25 }
 0x707   : > { %5543 = vst [vmem:[%s7593_s16 + $0x220] sm:$0xff] %v4762_v22  ;;  %4648 = vst [vmem:[%s7593_s16 + $0x120] sm:$0xff] %v4530_v26  ;;  %v4535_v31 = vpop.f32.mrb[196].mxu0  ;;  %v4768_v32 = vadd.f32 %v4767_v30, %v7605_v55  ;;  %v4769_v34 = vpop.f32.mrb[169].mxu1  ;;  %p6531_p1 = scmp.ne.s32.totalorder %s7950_s24, %s6530_s27  ;;  %s6536_s26 = scalar_lea.vmem %s6535_s25, 32768 }
 0x708   : > { %5544 = vst [vmem:[%s7593_s16 + $0x228] sm:$0xff] %v4764_v41  ;;  %4649 = vst [vmem:[%s7593_s16 + $0x128] sm:$0xff] %v4532_v27  ;;  %v4537_v35 = vpop.f32.mrb[197].mxu0  ;;  %v4536_v36 = vadd.f32 %v4535_v31, %v7749_v29  ;;  %v4770_v16 = vadd.f32 %v4769_v34, %v7605_v55  ;;  %v7758_v39 = vpop.permute.xlu1 %4201  ;;  %p6537_p4 = scmp.lt.s32.totalorder %s7950_s24, %s6535_s25  ;;  %p6538_p7 = scmp.lt.s32.totalorder %s6536_s26, %s6530_s27 }
 0x709   : > { %v4538_v37 = vadd.f32 %v4537_v35, %v7749_v29  ;;  %5545 = vst [vmem:[%s7593_s16 + $0x230] sm:$0xff] %v4768_v32  ;;  %v4773_v40 = vpop.f32.mrb[170].mxu1  ;;  %v4541_v43 = vpop.f32.mrb[198].mxu0  ;;  %p6532_p2 = pnand %p6531_p1, %p6692_p5 }
 0x70a   : > { %4650 = vst [vmem:[%s7593_s16 + $0x130] sm:$0xff] %v4536_v36  ;;  %5546 = vst [vmem:[%s7593_s16 + $0x238] sm:$0xff] %v4770_v16  ;;  %v4775_v44 = vpop.f32.mrb[171].mxu1  ;;  %v4774_v46 = vadd.f32 %v4773_v40, %v7613_v61  ;;  %v4543_v47 = vpop.f32.mrb[199].mxu0  ;;  %v4542_v48 = vadd.f32 %v4541_v43, %v7758_v39  ;;  %p6539_p8 = por %p6538_p7, %p6537_p4 }
 0x70b   : > { %4651 = vst [vmem:[%s7593_s16 + $0x138] sm:$0xff] %v4538_v37  ;;  %v4776_v55 = vadd.f32 %v4775_v44, %v7613_v61  ;;  %v4544_v49 = vadd.f32 %v4543_v47, %v7758_v39  ;;  %v7769_v51 = vpop.permute.xlu0 %4206  ;;  %v4779_v52 = vpop.f32.mrb[172].mxu1  ;;  %p6533_p3 = pneg %p6532_p2 }
 0x70c   : > { %5547 = vst [vmem:[%s7593_s16 + $0x240] sm:$0xff] %v4774_v46  ;;  %4652 = vst [vmem:[%s7593_s16 + $0x140] sm:$0xff] %v4542_v48  ;;  %v4547_v53 = vpop.f32.mrb[200].mxu0  ;;  %v4781_v54 = vpop.f32.mrb[173].mxu1  ;;  %v4780_v57 = vadd.f32 %v4779_v52, %v7619_v2 }
 0x70d   : > { %5548 = vst [vmem:[%s7593_s16 + $0x248] sm:$0xff] %v4776_v55  ;;  %4653 = vst [vmem:[%s7593_s16 + $0x148] sm:$0xff] %v4544_v49  ;;  %v4549_v58 = vpop.f32.mrb[201].mxu0  ;;  %v4548_v59 = vadd.f32 %v4547_v53, %v7769_v51  ;;  %v4782_v61 = vadd.f32 %v4781_v54, %v7619_v2  ;;  %v7778_v63 = vpop.permute.xlu1 %4211  ;;  %p6540_p9 = pnand %p6539_p8, %p6533_p3 }
 0x70e   : > { %v4550_v62 = vadd.f32 %v4549_v58, %v7769_v51  ;;  %5549 = vst [vmem:[%s7593_s16 + $0x250] sm:$0xff] %v4780_v57  ;;  %v4785_v0 = vpop.f32.mrb[174].mxu1  ;;  %v4553_v1 = vpop.f32.mrb[202].mxu0 }
 0x70f   : > { %4654 = vst [vmem:[%s7593_s16 + $0x150] sm:$0xff] %v4548_v59  ;;  %5550 = vst [vmem:[%s7593_s16 + $0x258] sm:$0xff] %v4782_v61  ;;  %v4787_v3 = vpop.f32.mrb[175].mxu1  ;;  %v4786_v4 = vadd.f32 %v4785_v0, %v7624_v7  ;;  %v4555_v5 = vpop.f32.mrb[203].mxu0  ;;  %v4554_v6 = vadd.f32 %v4553_v1, %v7778_v63 }
 0x710   : > { %4655 = vst [vmem:[%s7593_s16 + $0x158] sm:$0xff] %v4550_v62  ;;  %v4788_v2 = vadd.f32 %v4787_v3, %v7624_v7  ;;  %v4556_v8 = vadd.f32 %v4555_v5, %v7778_v63  ;;  %v7789_v9 = vpop.permute.xlu0 %4216  ;;  %v4791_v10 = vpop.f32.mrb[176].mxu1 }
 0x711   : > { %5551 = vst [vmem:[%s7593_s16 + $0x260] sm:$0xff] %v4786_v4  ;;  %4656 = vst [vmem:[%s7593_s16 + $0x160] sm:$0xff] %v4554_v6  ;;  %v4559_v11 = vpop.f32.mrb[204].mxu0  ;;  %v4793_v13 = vpop.f32.mrb[177].mxu1  ;;  %v4792_v14 = vadd.f32 %v4791_v10, %v7631_v12 }
 0x712   : > { %5552 = vst [vmem:[%s7593_s16 + $0x268] sm:$0xff] %v4788_v2  ;;  %4657 = vst [vmem:[%s7593_s16 + $0x168] sm:$0xff] %v4556_v8  ;;  %v4561_v15 = vpop.f32.mrb[205].mxu0  ;;  %v4560_v17 = vadd.f32 %v4559_v11, %v7789_v9  ;;  %v4794_v7 = vadd.f32 %v4793_v13, %v7631_v12  ;;  %v7798_v21 = vpop.permute.xlu1 %4221 }
 0x713   : > { %v4562_v20 = vadd.f32 %v4561_v15, %v7789_v9  ;;  %5553 = vst [vmem:[%s7593_s16 + $0x270] sm:$0xff] %v4792_v14  ;;  %v4797_v22 = vpop.f32.mrb[178].mxu1  ;;  %v4565_v24 = vpop.f32.mrb[206].mxu0 }
 0x714   : > { %4658 = vst [vmem:[%s7593_s16 + $0x170] sm:$0xff] %v4560_v17  ;;  %5554 = vst [vmem:[%s7593_s16 + $0x278] sm:$0xff] %v4794_v7  ;;  %v4799_v25 = vpop.f32.mrb[179].mxu1  ;;  %v4798_v26 = vadd.f32 %v4797_v22, %v7636_v18  ;;  %v4567_v41 = vpop.f32.mrb[207].mxu0  ;;  %v4566_v27 = vadd.f32 %v4565_v24, %v7798_v21 }
 0x715   : > { %4659 = vst [vmem:[%s7593_s16 + $0x178] sm:$0xff] %v4562_v20  ;;  %v4800_v12 = vadd.f32 %v4799_v25, %v7636_v18  ;;  %v4568_v30 = vadd.f32 %v4567_v41, %v7798_v21  ;;  %v7809_v31 = vpop.permute.xlu0 %4226 }
 0x716   : > { %5555 = vst [vmem:[%s7593_s16 + $0x280] sm:$0xff] %v4798_v26  ;;  %4660 = vst [vmem:[%s7593_s16 + $0x180] sm:$0xff] %v4566_v27  ;;  %v4803_v32 = vpop.f32.mrb[180].mxu1  ;;  %v4571_v34 = vpop.f32.mrb[208].mxu0 }
 0x717   : > { %5556 = vst [vmem:[%s7593_s16 + $0x288] sm:$0xff] %v4800_v12  ;;  %4661 = vst [vmem:[%s7593_s16 + $0x188] sm:$0xff] %v4568_v30  ;;  %v4805_v35 = vpop.f32.mrb[181].mxu1  ;;  %v4804_v36 = vadd.f32 %v4803_v32, %v7643_v23  ;;  %v4573_v16 = vpop.f32.mrb[209].mxu0  ;;  %v4572_v37 = vadd.f32 %v4571_v34, %v7809_v31 }
 0x718   : > { %v4806_v18 = vadd.f32 %v4805_v35, %v7643_v23  ;;  %v4574_v40 = vadd.f32 %v4573_v16, %v7809_v31  ;;  %v7818_v43 = vpop.permute.xlu1 %4231 }
 0x719   : > { %5557 = vst [vmem:[%s7593_s16 + $0x290] sm:$0xff] %v4804_v36  ;;  %4662 = vst [vmem:[%s7593_s16 + $0x190] sm:$0xff] %v4572_v37  ;;  %v7829_v53 = vpop.permute.xlu0 %4236 }
 0x71a   : > { %v4809_v44 = vpop.f32.mrb[182].mxu1  ;;  %5558 = vst [vmem:[%s7593_s16 + $0x298] sm:$0xff] %v4806_v18  ;;  %v4577_v46 = vpop.f32.mrb[210].mxu0  ;;  %4663 = vst [vmem:[%s7593_s16 + $0x198] sm:$0xff] %v4574_v40 }
 0x71b   : > { %v4811_v47 = vpop.f32.mrb[183].mxu1  ;;  %v4810_v48 = vadd.f32 %v4809_v44, %v7648_v28  ;;  %v4579_v55 = vpop.f32.mrb[211].mxu0  ;;  %v4578_v49 = vadd.f32 %v4577_v46, %v7818_v43 }
 0x71c   : > { %v4812_v23 = vadd.f32 %v4811_v47, %v7648_v28  ;;  %v4580_v52 = vadd.f32 %v4579_v55, %v7818_v43  ;;  %v7838_v1 = vpop.permute.xlu1 %4241 }
 0x71d   : > { %5559 = vst [vmem:[%s7593_s16 + $0x2a0] sm:$0xff] %v4810_v48  ;;  %4664 = vst [vmem:[%s7593_s16 + $0x1a0] sm:$0xff] %v4578_v49  ;;  %v7849_v11 = vpop.permute.xlu0 %4246 }
 0x71e   : > { %5560 = vst [vmem:[%s7593_s16 + $0x2a8] sm:$0xff] %v4812_v23  ;;  %v4815_v54 = vpop.f32.mrb[184].mxu1  ;;  %4665 = vst [vmem:[%s7593_s16 + $0x1a8] sm:$0xff] %v4580_v52  ;;  %v4583_v57 = vpop.f32.mrb[212].mxu0 }
 0x71f   : > { %v4817_v58 = vpop.f32.mrb[185].mxu1  ;;  %v4816_v59 = vadd.f32 %v4815_v54, %v7655_v33  ;;  %v4585_v61 = vpop.f32.mrb[213].mxu0  ;;  %v4584_v62 = vadd.f32 %v4583_v57, %v7829_v53 }
 0x720   : > { %v4818_v28 = vadd.f32 %v4817_v58, %v7655_v33  ;;  %v4586_v0 = vadd.f32 %v4585_v61, %v7829_v53  ;;  %v7856_v22 = vpop.permute.xlu1 %4251 }
 0x721   : > { %5561 = vst [vmem:[%s7593_s16 + $0x2b0] sm:$0xff] %v4816_v59  ;;  %4666 = vst [vmem:[%s7593_s16 + $0x1b0] sm:$0xff] %v4584_v62  ;;  %v7867_v34 = vpop.permute.xlu0 %4256 }
 0x722   : > { %v4821_v3 = vpop.f32.mrb[186].mxu1  ;;  %5562 = vst [vmem:[%s7593_s16 + $0x2b8] sm:$0xff] %v4818_v28  ;;  %v4589_v4 = vpop.f32.mrb[214].mxu0  ;;  %4667 = vst [vmem:[%s7593_s16 + $0x1b8] sm:$0xff] %v4586_v0 }
 0x723   : > { %v4823_v5 = vpop.f32.mrb[187].mxu1  ;;  %v4822_v6 = vadd.f32 %v4821_v3, %v7660_v38  ;;  %v4591_v2 = vpop.f32.mrb[215].mxu0  ;;  %v4590_v8 = vadd.f32 %v4589_v4, %v7838_v1 }
 0x724   : > { %v4824_v33 = vadd.f32 %v4823_v5, %v7660_v38  ;;  %v4592_v10 = vadd.f32 %v4591_v2, %v7838_v1 }
 0x725   : > { %5563 = vst [vmem:[%s7593_s16 + $0x2c0] sm:$0xff] %v4822_v6  ;;  %4668 = vst [vmem:[%s7593_s16 + $0x1c0] sm:$0xff] %v4590_v8 }
 0x726   : > { %5564 = vst [vmem:[%s7593_s16 + $0x2c8] sm:$0xff] %v4824_v33  ;;  %v4827_v13 = vpop.f32.mrb[188].mxu1  ;;  %4669 = vst [vmem:[%s7593_s16 + $0x1c8] sm:$0xff] %v4592_v10  ;;  %v4595_v14 = vpop.f32.mrb[216].mxu0 }
 0x727   : > { %v4829_v15 = vpop.f32.mrb[189].mxu1  ;;  %v4828_v17 = vadd.f32 %v4827_v13, %v7667_v45  ;;  %v4597_v7 = vpop.f32.mrb[217].mxu0  ;;  %v4596_v38 = vadd.f32 %v4595_v14, %v7849_v11 }
 0x728   : > { %v4830_v20 = vadd.f32 %v4829_v15, %v7667_v45  ;;  %v4598_v24 = vadd.f32 %v4597_v7, %v7849_v11 }
 0x729   : > { %5565 = vst [vmem:[%s7593_s16 + $0x2d0] sm:$0xff] %v4828_v17  ;;  %4670 = vst [vmem:[%s7593_s16 + $0x1d0] sm:$0xff] %v4596_v38 }
 0x72a   : > { %v4833_v25 = vpop.f32.mrb[190].mxu1  ;;  %5566 = vst [vmem:[%s7593_s16 + $0x2d8] sm:$0xff] %v4830_v20  ;;  %v4601_v26 = vpop.f32.mrb[218].mxu0  ;;  %4671 = vst [vmem:[%s7593_s16 + $0x1d8] sm:$0xff] %v4598_v24 }
 0x72b   : > { %v4835_v41 = vpop.f32.mrb[191].mxu1  ;;  %v4834_v27 = vadd.f32 %v4833_v25, %v7672_v50  ;;  %v4603_v12 = vpop.f32.mrb[219].mxu0  ;;  %v4602_v45 = vadd.f32 %v4601_v26, %v7856_v22 }
 0x72c   : > { %v4836_v30 = vadd.f32 %v4835_v41, %v7672_v50  ;;  %v4604_v32 = vadd.f32 %v4603_v12, %v7856_v22 }
 0x72d   : > { %5567 = vst [vmem:[%s7593_s16 + $0x2e0] sm:$0xff] %v4834_v27  ;;  %4672 = vst [vmem:[%s7593_s16 + $0x1e0] sm:$0xff] %v4602_v45 }
 0x72e   : > { %5568 = vst [vmem:[%s7593_s16 + $0x2e8] sm:$0xff] %v4836_v30  ;;  %v4839_v35 = vpop.f32.mrb[192].mxu1  ;;  %4673 = vst [vmem:[%s7593_s16 + $0x1e8] sm:$0xff] %v4604_v32  ;;  %v4607_v36 = vpop.f32.mrb[220].mxu0 }
 0x72f   : > { %v4841_v16 = vpop.f32.mrb[193].mxu1  ;;  %v4840_v37 = vadd.f32 %v4839_v35, %v7680_v56  ;;  %v4608_v50 = vadd.f32 %v4607_v36, %v7867_v34  ;;  %v4609_v18 = vpop.f32.mrb[221].mxu0 }
 0x730   : > { %v4842_v40 = vadd.f32 %v4841_v16, %v7680_v56  ;;  %v4610_v44 = vadd.f32 %v4609_v18, %v7867_v34 }
 0x731   : > { %5569 = vst [vmem:[%s7593_s16 + $0x2f0] sm:$0xff] %v4840_v37  ;;  %4674 = vst [vmem:[%s7593_s16 + $0x1f0] sm:$0xff] %v4608_v50 }
 0x732   : > { %v4845_v46 = vpop.f32.mrb[194].mxu1  ;;  %5570 = vst [vmem:[%s7593_s16 + $0x2f8] sm:$0xff] %v4842_v40  ;;  %4675 = vst [vmem:[%s7593_s16 + $0x1f8] sm:$0xff] %v4610_v44 }
 0x733   : > { %v4847_v47 = vpop.f32.mrb[195].mxu1  ;;  %v4846_v48 = vadd.f32 %v4845_v46, %v7686_v60 }
 0x734   : > { %v4848_v55 = vadd.f32 %v4847_v47, %v7686_v60 }
 0x735   : > { %5571 = vst [vmem:[%s7593_s16 + $0x300] sm:$0xff] %v4846_v48 }
 0x736   : > { %5572 = vst [vmem:[%s7593_s16 + $0x308] sm:$0xff] %v4848_v55  ;;  %v4851_v49 = vpop.f32.mrb[196].mxu1 }
 0x737   : > { %v4853_v56 = vpop.f32.mrb[197].mxu1  ;;  %v4852_v23 = vadd.f32 %v4851_v49, %v7729_v42 }
 0x738   : > { %v4854_v52 = vadd.f32 %v4853_v56, %v7729_v42 }
 0x739   : > { %5573 = vst [vmem:[%s7593_s16 + $0x310] sm:$0xff] %v4852_v23 }
 0x73a   : > { %v4857_v54 = vpop.f32.mrb[198].mxu1  ;;  %5574 = vst [vmem:[%s7593_s16 + $0x318] sm:$0xff] %v4854_v52 }
 0x73b   : > { %v4859_v57 = vpop.f32.mrb[199].mxu1  ;;  %v4858_v58 = vadd.f32 %v4857_v54, %v7738_v19 }
 0x73c   : > { %v4860_v60 = vadd.f32 %v4859_v57, %v7738_v19 }
 0x73d   : > { %5575 = vst [vmem:[%s7593_s16 + $0x320] sm:$0xff] %v4858_v58 }
 0x73e   : > { %5576 = vst [vmem:[%s7593_s16 + $0x328] sm:$0xff] %v4860_v60  ;;  %v4863_v59 = vpop.f32.mrb[200].mxu1 }
 0x73f   : > { %v4865_v61 = vpop.f32.mrb[201].mxu1  ;;  %v4864_v62 = vadd.f32 %v4863_v59, %v7749_v29 }
 0x740   : > { %v4866_v42 = vadd.f32 %v4865_v61, %v7749_v29 }
 0x741   : > { %5577 = vst [vmem:[%s7593_s16 + $0x330] sm:$0xff] %v4864_v62 }
 0x742   : > { %v4869_v28 = vpop.f32.mrb[202].mxu1  ;;  %5578 = vst [vmem:[%s7593_s16 + $0x338] sm:$0xff] %v4866_v42 }
 0x743   : > { %v4871_v0 = vpop.f32.mrb[203].mxu1  ;;  %v4870_v3 = vadd.f32 %v4869_v28, %v7758_v39 }
 0x744   : > { %v4872_v19 = vadd.f32 %v4871_v0, %v7758_v39 }
 0x745   : > { %5579 = vst [vmem:[%s7593_s16 + $0x340] sm:$0xff] %v4870_v3 }
 0x746   : > { %5580 = vst [vmem:[%s7593_s16 + $0x348] sm:$0xff] %v4872_v19  ;;  %v4875_v4 = vpop.f32.mrb[204].mxu1 }
 0x747   : > { %v4877_v5 = vpop.f32.mrb[205].mxu1  ;;  %v4876_v6 = vadd.f32 %v4875_v4, %v7769_v51 }
 0x748   : > { %v4878_v29 = vadd.f32 %v4877_v5, %v7769_v51 }
 0x749   : > { %5581 = vst [vmem:[%s7593_s16 + $0x350] sm:$0xff] %v4876_v6 }
 0x74a   : > { %v4881_v2 = vpop.f32.mrb[206].mxu1  ;;  %5582 = vst [vmem:[%s7593_s16 + $0x358] sm:$0xff] %v4878_v29 }
 0x74b   : > { %v4883_v8 = vpop.f32.mrb[207].mxu1  ;;  %v4882_v33 = vadd.f32 %v4881_v2, %v7778_v63 }
 0x74c   : > { %v4884_v39 = vadd.f32 %v4883_v8, %v7778_v63 }
 0x74d   : > { %5583 = vst [vmem:[%s7593_s16 + $0x360] sm:$0xff] %v4882_v33 }
 0x74e   : > { %5584 = vst [vmem:[%s7593_s16 + $0x368] sm:$0xff] %v4884_v39  ;;  %v4887_v10 = vpop.f32.mrb[208].mxu1 }
 0x74f   : > { %v4889_v13 = vpop.f32.mrb[209].mxu1  ;;  %v4888_v14 = vadd.f32 %v4887_v10, %v7789_v9 }
 0x750   : > { %v4890_v51 = vadd.f32 %v4889_v13, %v7789_v9 }
 0x751   : > { %5585 = vst [vmem:[%s7593_s16 + $0x370] sm:$0xff] %v4888_v14 }
 0x752   : > { %v4893_v15 = vpop.f32.mrb[210].mxu1  ;;  %5586 = vst [vmem:[%s7593_s16 + $0x378] sm:$0xff] %v4890_v51 }
 0x753   : > { %v4895_v17 = vpop.f32.mrb[211].mxu1  ;;  %v4894_v7 = vadd.f32 %v4893_v15, %v7798_v21 }
 0x754   : > { %v4896_v63 = vadd.f32 %v4895_v17, %v7798_v21 }
 0x755   : > { %5587 = vst [vmem:[%s7593_s16 + $0x380] sm:$0xff] %v4894_v7 }
 0x756   : > { %5588 = vst [vmem:[%s7593_s16 + $0x388] sm:$0xff] %v4896_v63  ;;  %v4899_v38 = vpop.f32.mrb[212].mxu1 }
 0x757   : > { %v4901_v20 = vpop.f32.mrb[213].mxu1  ;;  %v4900_v24 = vadd.f32 %v4899_v38, %v7809_v31 }
 0x758   : > { %v4902_v9 = vadd.f32 %v4901_v20, %v7809_v31 }
 0x759   : > { %5589 = vst [vmem:[%s7593_s16 + $0x390] sm:$0xff] %v4900_v24 }
 0x75a   : > { %v4905_v25 = vpop.f32.mrb[214].mxu1  ;;  %5590 = vst [vmem:[%s7593_s16 + $0x398] sm:$0xff] %v4902_v9 }
 0x75b   : > { %v4907_v26 = vpop.f32.mrb[215].mxu1  ;;  %v4906_v41 = vadd.f32 %v4905_v25, %v7818_v43 }
 0x75c   : > { %v4908_v21 = vadd.f32 %v4907_v26, %v7818_v43 }
 0x75d   : > { %5591 = vst [vmem:[%s7593_s16 + $0x3a0] sm:$0xff] %v4906_v41 }
 0x75e   : > { %5592 = vst [vmem:[%s7593_s16 + $0x3a8] sm:$0xff] %v4908_v21  ;;  %v4911_v27 = vpop.f32.mrb[216].mxu1 }
 0x75f   : > { %v4913_v12 = vpop.f32.mrb[217].mxu1  ;;  %v4912_v45 = vadd.f32 %v4911_v27, %v7829_v53 }
 0x760   : > { %v4914_v31 = vadd.f32 %v4913_v12, %v7829_v53 }
 0x761   : > { %5593 = vst [vmem:[%s7593_s16 + $0x3b0] sm:$0xff] %v4912_v45 }
 0x762   : > { %v4917_v30 = vpop.f32.mrb[218].mxu1  ;;  %5594 = vst [vmem:[%s7593_s16 + $0x3b8] sm:$0xff] %v4914_v31 }
 0x763   : > { %v4919_v32 = vpop.f32.mrb[219].mxu1  ;;  %v4918_v35 = vadd.f32 %v4917_v30, %v7838_v1 }
 0x764   : > { %v4920_v43 = vadd.f32 %v4919_v32, %v7838_v1 }
 0x765   : > { %5595 = vst [vmem:[%s7593_s16 + $0x3c0] sm:$0xff] %v4918_v35 }
 0x766   : > { %5596 = vst [vmem:[%s7593_s16 + $0x3c8] sm:$0xff] %v4920_v43  ;;  %v4923_v36 = vpop.f32.mrb[220].mxu1 }
 0x767   : > { %v4925_v16 = vpop.f32.mrb[221].mxu1  ;;  %v4924_v37 = vadd.f32 %v4923_v36, %v7849_v11 }
 0x768   : > { %v4926_v53 = vadd.f32 %v4925_v16, %v7849_v11 }
 0x769   : > { %5597 = vst [vmem:[%s7593_s16 + $0x3d0] sm:$0xff] %v4924_v37 }
 0x76a   : > { %v4929_v50 = vpop.f32.mrb[222].mxu1  ;;  %5598 = vst [vmem:[%s7593_s16 + $0x3d8] sm:$0xff] %v4926_v53 }
 0x76b   : > { %v4931_v18 = vpop.f32.mrb[223].mxu1  ;;  %v4930_v40 = vadd.f32 %v4929_v50, %v7856_v22 }
 0x76c   : > { %v4932_v1 = vadd.f32 %v4931_v18, %v7856_v22 }
 0x76d   : > { %5599 = vst [vmem:[%s7593_s16 + $0x3e0] sm:$0xff] %v4930_v40 }
 0x76e   : > { %5600 = vst [vmem:[%s7593_s16 + $0x3e8] sm:$0xff] %v4932_v1  ;;  %v4935_v44 = vpop.f32.mrb[224].mxu1 }
 0x76f   : > { %v4936_v46 = vadd.f32 %v4935_v44, %v7867_v34  ;;  %v4937_v11 = vpop.f32.mrb[225].mxu1 }
 0x770   : > { %v4938_v47 = vadd.f32 %v4937_v11, %v7867_v34 }
 0x771   : > { %5601 = vst [vmem:[%s7593_s16 + $0x3f0] sm:$0xff] %v4936_v46 }
 0x772   : > { %5602 = vst [vmem:[%s7593_s16 + $0x3f8] sm:$0xff] %v4938_v47 }
 0x773   : > { %6543 = shalt.err (!%p6540_p9)
}
 0x774   : > { %s6544_s16 = scalar_lea.hbm %s7948_s23, 16384  ;;  %s6548_s17 = scalar_lea.hbm %s8007_s9, 32768 }
 0x775   : > { %p6545_p10 = scmp.ne.s32.totalorder %s7948_s23, %s6544_s16  ;;  %p6549_p13 = scmp.lt.u32.totalorder %s7948_s23, %s8007_s9 }
 0x776   : > { %p6550_p0 = scmp.lt.u32.totalorder %s6548_s17, %s6544_s16  ;;  %p6552_p2 = scmp.lt.u32.totalorder %s6544_s16, %s7948_s23 }
 0x777   : > { %p6546_p11 = pnand %p6545_p10, %p6692_p5 }
 0x778   : > { %p6551_p1 = por %p6550_p0, %p6549_p13 }
 0x779   : > { %p6547_p12 = pneg %p6546_p11 }
 0x77a   : > { %p6553_p3 = por %p6552_p2, %p6551_p1 }
 0x77c   : > { %p6554_p4 = pnand %p6553_p3, %p6547_p12 }
 0x77e   : > { %6557 = shalt.err (!%p6554_p4)
}
 0x77f   : > { %s8012_s26 = smov 256  }
 0x780   : > { %6453 = dma.vmem_to_hbm [thread:$0]  (%p6692_p5), %s7950_s24, 16384, %s7948_s23, %s5011_s13, %s8012_s26, %s8012_s26, %s6602_s29  }
 0x781 PF: > { %p6463_p7 = scmp.ge.s32.totalorder %s6596_s12, 2  ;;  %s5057_s27 = sand.u32 1, %s6584_s30  }
 0x782   : > { %s5058_s16 = scalar_lea.sflag [#allocation3], %s5057_s27 }
 0x783   : > { %p6457_p8 = pnand %p6463_p7, %p6696_p6 }
 0x785   : > { %6575 = dma.done.wait (!%p6457_p8), %s5058_s16, 512  }
 0x786   : > { %6577 = vsyncadd (!%p6457_p8), %s5058_s16, 4294966784  ;;  %s5067_s19 = scalar_lea.sflag [#allocation5], %s5057_s27 }
 0x787   : > { %6579 = dma.done.wait (!%p6457_p8), %s5067_s19, 16384  }
 0x788   : > { %6581 = vsyncadd (!%p6457_p8), %s5067_s19, 4294950912  ;;  %p23_p5 = scmp.ge.s32.totalorder %s6679_s15, 4   ;;  %s8013_s30 = smov %s6588_s10 }
 0x789   : > { %s8014_s10 = smov %s6592_s11  ;;  %s8015_s11 = smov %s6690_s18 }
 0x78a   : > { %s8016_s12 = smov %s6679_s15  ;;  %25 = sbr.rel (!%p23_p5) target bundleno = 5 (0x5), region = 107 }
 0x791   :  { %5072 = vsyncpa [#allocation3], 1 }
 0x792   :  { %5074 = vsyncpa [#allocation3 + $0x1], 1 }
 0x793   :  { %5075 = vsyncpa [#allocation5], 1 }
 0x794   :  { %5077 = vsyncpa [#allocation5 + $0x1], 1 }

</bundles_post_ra>
